<compile_context>
chip_gen: v7x
topology: tpu7x:2x2x1
jax: 0.10.0
libtpu: 0.0.40
codegen_flags: <defaults>
</compile_context>

<pallas_src>
import jax
import jax.numpy as jnp
import numpy as np
from jax import lax
from jax.experimental import pallas as pl
from jax.experimental.pallas import tpu as pltpu


def _round_up(x, m):
    return ((x + m - 1) // m) * m


def _gather_matrix(hin, win, rows_in):
    """Constant gather matrix for one Conv_Block (conv3x3 pad1 + 2x2 maxpool).

    Returns (G, R) with G of shape (4*R, 9*rows_in) float32 and
    R = round_up(Ho*Wo, 8).
      row  p*R + (oh*Wo + ow)       : pool phase p, pooled output position
      col  t*rows_in + yin*win + xin: tap t = dy*3+dx reading input row
    Entries are 1 where the tap hits a real input pixel; 0 where it falls in
    the conv zero-padding or the row is sublane padding.
    """
    hout, wout = hin // 2, win // 2
    s = hout * wout
    r = _round_up(s, 8)
    g = np.zeros((4 * r, 9 * rows_in), np.float32)
    for a in range(2):
        for b in range(2):
            p = a * 2 + b
            for oh in range(hout):
                for ow in range(wout):
                    row = p * r + oh * wout + ow
                    for dy in range(3):
                        for dx in range(3):
                            yin = 2 * oh + a + dy - 1
                            xin = 2 * ow + b + dx - 1
                            if 0 <= yin < hin and 0 <= xin < win:
                                t = dy * 3 + dx
                                g[row, t * rows_in + yin * win + xin] = 1.0
    return g, r


def _make_fused_kernel(num_layers):
    """Kernel refs: x, G_1..G_L, W_1..W_L, b_1..b_L, out."""

    def kernel(*refs):
        x_ref = refs[0]
        g_refs = refs[1:1 + num_layers]
        w_refs = refs[1 + num_layers:1 + 2 * num_layers]
        b_refs = refs[1 + 2 * num_layers:1 + 3 * num_layers]
        out_ref = refs[1 + 3 * num_layers]

        x = x_ref[0]                                    # (HW_in, Cin), f32
        for g_ref, w_ref, b_ref in zip(g_refs, w_refs, b_refs):
            r = g_ref.shape[0] // 4
            # Per-tap channel projections, stacked along rows so the gather
            # GEMM below covers all 9 taps AND all 4 pool phases in one MXU
            # pass (M = 4*R, K = 9*HW_in).
            z = jnp.concatenate(
                [jnp.dot(x, w_ref[t], preferred_element_type=jnp.float32)
                 for t in range(9)],
                axis=0)                                  # (9*HW_in, Cout)
            y = jnp.dot(g_ref[...], z,
                        preferred_element_type=jnp.float32)   # (4*R, Cout)
            y = jnp.tanh(y + b_ref[...])                 # bias broadcast once
            # 2x2 max-pool == elementwise max over the 4 phase row-blocks.
            x = jnp.maximum(jnp.maximum(y[0:r], y[r:2 * r]),
                            jnp.maximum(y[2 * r:3 * r], y[3 * r:4 * r]))
        out_ref[0] = x.astype(out_ref.dtype)

    return kernel


def cnn_forward(image_nchw, params, phys_feature=True):
    """Replicates CNN.forward: returns {} or {"Features": enc} (enc in NCHW)."""
    num_layers = len(params)
    n, c0, h, w = image_nchw.shape
    assert h % (2 ** num_layers) == 0 and w % (2 ** num_layers) == 0, (
        "spatial dims must stay even through every 2x2 max-pool")

    x_nhwc = jnp.transpose(image_nchw, (0, 2, 3, 1)).astype(jnp.float32)
    x2d = x_nhwc.reshape(n, h * w, c0)

    gs, ws, bs = [], [], []
    hin, win, rows_in = h, w, h * w
    for (wgt, bias) in params:
        g_np, r = _gather_matrix(hin, win, rows_in)
        ci, co = wgt.shape[2], wgt.shape[3]
        gs.append(jnp.asarray(g_np))
        ws.append(wgt.reshape(9, ci, co).astype(jnp.float32))
        bs.append(bias.reshape(1, co).astype(jnp.float32))
        hin, win, rows_in = hin // 2, win // 2, r

    h_out, w_out = hin, win
    r_last = rows_in
    c_last = params[-1][0].shape[3]

    const_specs = (
        [pl.BlockSpec(g.shape, lambda i: (0, 0)) for g in gs]
        + [pl.BlockSpec(wm.shape, lambda i: (0, 0, 0)) for wm in ws]
        + [pl.BlockSpec(bm.shape, lambda i: (0, 0)) for bm in bs])
    in_specs = [pl.BlockSpec((1, h * w, c0), lambda i: (i, 0, 0))] + const_specs
    out_specs = pl.BlockSpec((1, r_last, c_last), lambda i: (i, 0, 0))

    out = pl.pallas_call(
        _make_fused_kernel(num_layers),
        out_shape=jax.ShapeDtypeStruct((n, r_last, c_last), jnp.float32),
        grid=(n,),
        in_specs=in_specs,
        out_specs=out_specs,
        compiler_params=pltpu.CompilerParams(
            dimension_semantics=("parallel",)),
    )(x2d, *gs, *ws, *bs)

    feat = out[:, :h_out * w_out, :].reshape(n, h_out, w_out, c_last)
    enc = jnp.transpose(feat, (0, 3, 1, 2))              # NHWC -> NCHW (torch)
    result = {}
    if phys_feature:
        result["Features"] = enc
    return result
    # TODO(synk): traj2cnn / social_states MLPs exist only under
    # insert_trajectory/social_pooling=True and are unused by forward(); not emitted.


def init_cnn_params(key, in_channels=3, channels_cnn=4, num_layers=3):
    """Deterministic synthetic init; mirrors the CNN.__init__ channel plan."""
    dims = []
    layer_in, layer_out = in_channels, channels_cnn
    dims.append((layer_in, layer_out))
    layer_in = layer_out
    for layer in range(2, num_layers + 1):
        layer_out = layer_in * 2 if layer != num_layers else layer_in
        dims.append((layer_in, layer_out))
        layer_in = layer_out

    params = []
    for (ci, co) in dims:
        key, sub = jax.random.split(key)
        fan_in, fan_out = ci * 9, co * 9
        limit = float(np.sqrt(6.0 / (fan_in + fan_out)))   # xavier-style (tanh)
        wgt = jax.random.uniform(sub, (3, 3, ci, co), jnp.float32, -limit, limit)
        bias = jnp.full((co,), 0.01, jnp.float32)
        params.append((wgt, bias))
    return params


def cnn_forward_ref(image_nchw, params):
    """Pure-JAX reference (conv + tanh + maxpool) for correctness check."""
    x = image_nchw
    for (wgt, bias) in params:
        w_oihw = jnp.transpose(wgt, (3, 2, 0, 1))
        y = lax.conv_general_dilated(
            x, w_oihw, window_strides=(1, 1), padding=((1, 1), (1, 1)),
            dimension_numbers=("NCHW", "OIHW", "NCHW"))
        y = jnp.tanh(y + bias.reshape(1, -1, 1, 1))
        x = lax.reduce_window(y, -jnp.inf, lax.max,
                              (1, 1, 2, 2), (1, 1, 2, 2), "VALID")
    return x


if __name__ == "__main__":
    key = jax.random.PRNGKey(0)
    pkey, xkey = jax.random.split(key)
    params = init_cnn_params(pkey)

    image = jax.random.normal(xkey, (2, 3, 16, 16), jnp.float32)  # NCHW

    out = cnn_forward(image, params, phys_feature=True)
    feats = jax.block_until_ready(out["Features"])
    assert feats.shape == (2, 8, 2, 2), feats.shape

    ref = jax.block_until_ready(cnn_forward_ref(image, params))
    np.testing.assert_allclose(np.asarray(feats), np.asarray(ref),
                               rtol=1e-4, atol=1e-4)
    print("KERNEL_OK")
</pallas_src>

<mosaic_0001>
module attributes {stable_mosaic.version = 11 : i64} {
  func.func @kernel(%arg0: i32, %arg1: memref<1x256x3xf32, #tpu.memory_space<vmem>>, %arg2: memref<256x2304xf32, #tpu.memory_space<vmem>>, %arg3: memref<64x576xf32, #tpu.memory_space<vmem>>, %arg4: memref<32x144xf32, #tpu.memory_space<vmem>>, %arg5: memref<9x3x4xf32, #tpu.memory_space<vmem>>, %arg6: memref<9x4x8xf32, #tpu.memory_space<vmem>>, %arg7: memref<9x8x8xf32, #tpu.memory_space<vmem>>, %arg8: memref<1x4xf32, #tpu.memory_space<vmem>>, %arg9: memref<1x8xf32, #tpu.memory_space<vmem>>, %arg10: memref<1x8xf32, #tpu.memory_space<vmem>>, %arg11: memref<1x8x8xf32, #tpu.memory_space<vmem>>) attributes {dimension_semantics = [#tpu.dimension_semantics<parallel>], iteration_bounds = array<i64: 2>, scalar_prefetch = 0 : i64, scratch_operands = 0 : i64, tpu.core_type = #tpu.core_type<tc>, window_params = [{transform_indices = @transform_0, window_bounds = array<i64: 1, 256, 3>}, {pipeline_mode = #tpu.pipeline_mode<synchronous>, transform_indices = @transform_1, window_bounds = array<i64: 256, 2304>}, {pipeline_mode = #tpu.pipeline_mode<synchronous>, transform_indices = @transform_2, window_bounds = array<i64: 64, 576>}, {pipeline_mode = #tpu.pipeline_mode<synchronous>, transform_indices = @transform_3, window_bounds = array<i64: 32, 144>}, {pipeline_mode = #tpu.pipeline_mode<synchronous>, transform_indices = @transform_4, window_bounds = array<i64: 9, 3, 4>}, {pipeline_mode = #tpu.pipeline_mode<synchronous>, transform_indices = @transform_5, window_bounds = array<i64: 9, 4, 8>}, {pipeline_mode = #tpu.pipeline_mode<synchronous>, transform_indices = @transform_6, window_bounds = array<i64: 9, 8, 8>}, {pipeline_mode = #tpu.pipeline_mode<synchronous>, transform_indices = @transform_7, window_bounds = array<i64: 1, 4>}, {pipeline_mode = #tpu.pipeline_mode<synchronous>, transform_indices = @transform_8, window_bounds = array<i64: 1, 8>}, {pipeline_mode = #tpu.pipeline_mode<synchronous>, transform_indices = @transform_9, window_bounds = array<i64: 1, 8>}, {transform_indices = @transform_10, window_bounds = array<i64: 1, 8, 8>}]} {
    %c0 = arith.constant 0 : index
    %c0_0 = arith.constant 0 : index
    %c0_1 = arith.constant 0 : index
    %0 = vector.load %arg1[%c0, %c0_0, %c0_1] : memref<1x256x3xf32, #tpu.memory_space<vmem>>, vector<1x256x3xf32>
    %1 = vector.shape_cast %0 : vector<1x256x3xf32> to vector<256x3xf32>
    %c0_2 = arith.constant 0 : index
    %c0_3 = arith.constant 0 : index
    %c0_4 = arith.constant 0 : index
    %2 = vector.load %arg5[%c0_2, %c0_3, %c0_4] : memref<9x3x4xf32, #tpu.memory_space<vmem>>, vector<1x3x4xf32>
    %3 = vector.shape_cast %2 : vector<1x3x4xf32> to vector<3x4xf32>
    %cst = arith.constant dense<0.000000e+00> : vector<256x4xf32>
    %4 = tpu.matmul %1, %3, %cst {dimension_numbers = #tpu.dot_dimension_numbers<[1], [0], [0], [1], [0, 0, 1, 1], [], []>} : vector<256x3xf32>, vector<3x4xf32>, vector<256x4xf32> -> vector<256x4xf32>
    %c1 = arith.constant 1 : index
    %c0_5 = arith.constant 0 : index
    %c0_6 = arith.constant 0 : index
    %5 = vector.load %arg5[%c1, %c0_5, %c0_6] : memref<9x3x4xf32, #tpu.memory_space<vmem>>, vector<1x3x4xf32>
    %6 = vector.shape_cast %5 : vector<1x3x4xf32> to vector<3x4xf32>
    %cst_7 = arith.constant dense<0.000000e+00> : vector<256x4xf32>
    %7 = tpu.matmul %1, %6, %cst_7 {dimension_numbers = #tpu.dot_dimension_numbers<[1], [0], [0], [1], [0, 0, 1, 1], [], []>} : vector<256x3xf32>, vector<3x4xf32>, vector<256x4xf32> -> vector<256x4xf32>
    %c2 = arith.constant 2 : index
    %c0_8 = arith.constant 0 : index
    %c0_9 = arith.constant 0 : index
    %8 = vector.load %arg5[%c2, %c0_8, %c0_9] : memref<9x3x4xf32, #tpu.memory_space<vmem>>, vector<1x3x4xf32>
    %9 = vector.shape_cast %8 : vector<1x3x4xf32> to vector<3x4xf32>
    %cst_10 = arith.constant dense<0.000000e+00> : vector<256x4xf32>
    %10 = tpu.matmul %1, %9, %cst_10 {dimension_numbers = #tpu.dot_dimension_numbers<[1], [0], [0], [1], [0, 0, 1, 1], [], []>} : vector<256x3xf32>, vector<3x4xf32>, vector<256x4xf32> -> vector<256x4xf32>
    %c3 = arith.constant 3 : index
    %c0_11 = arith.constant 0 : index
    %c0_12 = arith.constant 0 : index
    %11 = vector.load %arg5[%c3, %c0_11, %c0_12] : memref<9x3x4xf32, #tpu.memory_space<vmem>>, vector<1x3x4xf32>
    %12 = vector.shape_cast %11 : vector<1x3x4xf32> to vector<3x4xf32>
    %cst_13 = arith.constant dense<0.000000e+00> : vector<256x4xf32>
    %13 = tpu.matmul %1, %12, %cst_13 {dimension_numbers = #tpu.dot_dimension_numbers<[1], [0], [0], [1], [0, 0, 1, 1], [], []>} : vector<256x3xf32>, vector<3x4xf32>, vector<256x4xf32> -> vector<256x4xf32>
    %c4 = arith.constant 4 : index
    %c0_14 = arith.constant 0 : index
    %c0_15 = arith.constant 0 : index
    %14 = vector.load %arg5[%c4, %c0_14, %c0_15] : memref<9x3x4xf32, #tpu.memory_space<vmem>>, vector<1x3x4xf32>
    %15 = vector.shape_cast %14 : vector<1x3x4xf32> to vector<3x4xf32>
    %cst_16 = arith.constant dense<0.000000e+00> : vector<256x4xf32>
    %16 = tpu.matmul %1, %15, %cst_16 {dimension_numbers = #tpu.dot_dimension_numbers<[1], [0], [0], [1], [0, 0, 1, 1], [], []>} : vector<256x3xf32>, vector<3x4xf32>, vector<256x4xf32> -> vector<256x4xf32>
    %c5 = arith.constant 5 : index
    %c0_17 = arith.constant 0 : index
    %c0_18 = arith.constant 0 : index
    %17 = vector.load %arg5[%c5, %c0_17, %c0_18] : memref<9x3x4xf32, #tpu.memory_space<vmem>>, vector<1x3x4xf32>
    %18 = vector.shape_cast %17 : vector<1x3x4xf32> to vector<3x4xf32>
    %cst_19 = arith.constant dense<0.000000e+00> : vector<256x4xf32>
    %19 = tpu.matmul %1, %18, %cst_19 {dimension_numbers = #tpu.dot_dimension_numbers<[1], [0], [0], [1], [0, 0, 1, 1], [], []>} : vector<256x3xf32>, vector<3x4xf32>, vector<256x4xf32> -> vector<256x4xf32>
    %c6 = arith.constant 6 : index
    %c0_20 = arith.constant 0 : index
    %c0_21 = arith.constant 0 : index
    %20 = vector.load %arg5[%c6, %c0_20, %c0_21] : memref<9x3x4xf32, #tpu.memory_space<vmem>>, vector<1x3x4xf32>
    %21 = vector.shape_cast %20 : vector<1x3x4xf32> to vector<3x4xf32>
    %cst_22 = arith.constant dense<0.000000e+00> : vector<256x4xf32>
    %22 = tpu.matmul %1, %21, %cst_22 {dimension_numbers = #tpu.dot_dimension_numbers<[1], [0], [0], [1], [0, 0, 1, 1], [], []>} : vector<256x3xf32>, vector<3x4xf32>, vector<256x4xf32> -> vector<256x4xf32>
    %c7 = arith.constant 7 : index
    %c0_23 = arith.constant 0 : index
    %c0_24 = arith.constant 0 : index
    %23 = vector.load %arg5[%c7, %c0_23, %c0_24] : memref<9x3x4xf32, #tpu.memory_space<vmem>>, vector<1x3x4xf32>
    %24 = vector.shape_cast %23 : vector<1x3x4xf32> to vector<3x4xf32>
    %cst_25 = arith.constant dense<0.000000e+00> : vector<256x4xf32>
    %25 = tpu.matmul %1, %24, %cst_25 {dimension_numbers = #tpu.dot_dimension_numbers<[1], [0], [0], [1], [0, 0, 1, 1], [], []>} : vector<256x3xf32>, vector<3x4xf32>, vector<256x4xf32> -> vector<256x4xf32>
    %c8 = arith.constant 8 : index
    %c0_26 = arith.constant 0 : index
    %c0_27 = arith.constant 0 : index
    %26 = vector.load %arg5[%c8, %c0_26, %c0_27] : memref<9x3x4xf32, #tpu.memory_space<vmem>>, vector<1x3x4xf32>
    %27 = vector.shape_cast %26 : vector<1x3x4xf32> to vector<3x4xf32>
    %cst_28 = arith.constant dense<0.000000e+00> : vector<256x4xf32>
    %28 = tpu.matmul %1, %27, %cst_28 {dimension_numbers = #tpu.dot_dimension_numbers<[1], [0], [0], [1], [0, 0, 1, 1], [], []>} : vector<256x3xf32>, vector<3x4xf32>, vector<256x4xf32> -> vector<256x4xf32>
    %29 = tpu.concatenate %4, %7, %10, %13, %16, %19, %22, %25, %28 in 0 : vector<256x4xf32>, vector<256x4xf32>, vector<256x4xf32>, vector<256x4xf32>, vector<256x4xf32>, vector<256x4xf32>, vector<256x4xf32>, vector<256x4xf32>, vector<256x4xf32> -> vector<2304x4xf32>
    %c0_29 = arith.constant 0 : index
    %c0_30 = arith.constant 0 : index
    %30 = vector.load %arg2[%c0_29, %c0_30] : memref<256x2304xf32, #tpu.memory_space<vmem>>, vector<256x2304xf32>
    %cst_31 = arith.constant dense<0.000000e+00> : vector<256x4xf32>
    %31 = tpu.matmul %30, %29, %cst_31 {dimension_numbers = #tpu.dot_dimension_numbers<[1], [0], [0], [1], [0, 0, 1, 1], [], []>} : vector<256x2304xf32>, vector<2304x4xf32>, vector<256x4xf32> -> vector<256x4xf32>
    %c0_32 = arith.constant 0 : index
    %c0_33 = arith.constant 0 : index
    %32 = vector.load %arg8[%c0_32, %c0_33] : memref<1x4xf32, #tpu.memory_space<vmem>>, vector<1x4xf32>
    %33 = vector.broadcast %32 : vector<1x4xf32> to vector<256x4xf32>
    %34 = arith.addf %31, %33 : vector<256x4xf32>
    %35 = math.tanh %34 : vector<256x4xf32>
    %36 = vector.extract_strided_slice %35 {offsets = [0, 0], sizes = [64, 4], strides = [1, 1]} : vector<256x4xf32> to vector<64x4xf32>
    %37 = vector.extract_strided_slice %35 {offsets = [64, 0], sizes = [64, 4], strides = [1, 1]} : vector<256x4xf32> to vector<64x4xf32>
    %38 = arith.maximumf %36, %37 : vector<64x4xf32>
    %39 = vector.extract_strided_slice %35 {offsets = [128, 0], sizes = [64, 4], strides = [1, 1]} : vector<256x4xf32> to vector<64x4xf32>
    %40 = vector.extract_strided_slice %35 {offsets = [192, 0], sizes = [64, 4], strides = [1, 1]} : vector<256x4xf32> to vector<64x4xf32>
    %41 = arith.maximumf %39, %40 : vector<64x4xf32>
    %42 = arith.maximumf %38, %41 : vector<64x4xf32>
    %c0_34 = arith.constant 0 : index
    %c0_35 = arith.constant 0 : index
    %c0_36 = arith.constant 0 : index
    %43 = vector.load %arg6[%c0_34, %c0_35, %c0_36] : memref<9x4x8xf32, #tpu.memory_space<vmem>>, vector<1x4x8xf32>
    %44 = vector.shape_cast %43 : vector<1x4x8xf32> to vector<4x8xf32>
    %cst_37 = arith.constant dense<0.000000e+00> : vector<64x8xf32>
    %45 = tpu.matmul %42, %44, %cst_37 {dimension_numbers = #tpu.dot_dimension_numbers<[1], [0], [0], [1], [0, 0, 1, 1], [], []>} : vector<64x4xf32>, vector<4x8xf32>, vector<64x8xf32> -> vector<64x8xf32>
    %c1_38 = arith.constant 1 : index
    %c0_39 = arith.constant 0 : index
    %c0_40 = arith.constant 0 : index
    %46 = vector.load %arg6[%c1_38, %c0_39, %c0_40] : memref<9x4x8xf32, #tpu.memory_space<vmem>>, vector<1x4x8xf32>
    %47 = vector.shape_cast %46 : vector<1x4x8xf32> to vector<4x8xf32>
    %cst_41 = arith.constant dense<0.000000e+00> : vector<64x8xf32>
    %48 = tpu.matmul %42, %47, %cst_41 {dimension_numbers = #tpu.dot_dimension_numbers<[1], [0], [0], [1], [0, 0, 1, 1], [], []>} : vector<64x4xf32>, vector<4x8xf32>, vector<64x8xf32> -> vector<64x8xf32>
    %c2_42 = arith.constant 2 : index
    %c0_43 = arith.constant 0 : index
    %c0_44 = arith.constant 0 : index
    %49 = vector.load %arg6[%c2_42, %c0_43, %c0_44] : memref<9x4x8xf32, #tpu.memory_space<vmem>>, vector<1x4x8xf32>
    %50 = vector.shape_cast %49 : vector<1x4x8xf32> to vector<4x8xf32>
    %cst_45 = arith.constant dense<0.000000e+00> : vector<64x8xf32>
    %51 = tpu.matmul %42, %50, %cst_45 {dimension_numbers = #tpu.dot_dimension_numbers<[1], [0], [0], [1], [0, 0, 1, 1], [], []>} : vector<64x4xf32>, vector<4x8xf32>, vector<64x8xf32> -> vector<64x8xf32>
    %c3_46 = arith.constant 3 : index
    %c0_47 = arith.constant 0 : index
    %c0_48 = arith.constant 0 : index
    %52 = vector.load %arg6[%c3_46, %c0_47, %c0_48] : memref<9x4x8xf32, #tpu.memory_space<vmem>>, vector<1x4x8xf32>
    %53 = vector.shape_cast %52 : vector<1x4x8xf32> to vector<4x8xf32>
    %cst_49 = arith.constant dense<0.000000e+00> : vector<64x8xf32>
    %54 = tpu.matmul %42, %53, %cst_49 {dimension_numbers = #tpu.dot_dimension_numbers<[1], [0], [0], [1], [0, 0, 1, 1], [], []>} : vector<64x4xf32>, vector<4x8xf32>, vector<64x8xf32> -> vector<64x8xf32>
    %c4_50 = arith.constant 4 : index
    %c0_51 = arith.constant 0 : index
    %c0_52 = arith.constant 0 : index
    %55 = vector.load %arg6[%c4_50, %c0_51, %c0_52] : memref<9x4x8xf32, #tpu.memory_space<vmem>>, vector<1x4x8xf32>
    %56 = vector.shape_cast %55 : vector<1x4x8xf32> to vector<4x8xf32>
    %cst_53 = arith.constant dense<0.000000e+00> : vector<64x8xf32>
    %57 = tpu.matmul %42, %56, %cst_53 {dimension_numbers = #tpu.dot_dimension_numbers<[1], [0], [0], [1], [0, 0, 1, 1], [], []>} : vector<64x4xf32>, vector<4x8xf32>, vector<64x8xf32> -> vector<64x8xf32>
    %c5_54 = arith.constant 5 : index
    %c0_55 = arith.constant 0 : index
    %c0_56 = arith.constant 0 : index
    %58 = vector.load %arg6[%c5_54, %c0_55, %c0_56] : memref<9x4x8xf32, #tpu.memory_space<vmem>>, vector<1x4x8xf32>
    %59 = vector.shape_cast %58 : vector<1x4x8xf32> to vector<4x8xf32>
    %cst_57 = arith.constant dense<0.000000e+00> : vector<64x8xf32>
    %60 = tpu.matmul %42, %59, %cst_57 {dimension_numbers = #tpu.dot_dimension_numbers<[1], [0], [0], [1], [0, 0, 1, 1], [], []>} : vector<64x4xf32>, vector<4x8xf32>, vector<64x8xf32> -> vector<64x8xf32>
    %c6_58 = arith.constant 6 : index
    %c0_59 = arith.constant 0 : index
    %c0_60 = arith.constant 0 : index
    %61 = vector.load %arg6[%c6_58, %c0_59, %c0_60] : memref<9x4x8xf32, #tpu.memory_space<vmem>>, vector<1x4x8xf32>
    %62 = vector.shape_cast %61 : vector<1x4x8xf32> to vector<4x8xf32>
    %cst_61 = arith.constant dense<0.000000e+00> : vector<64x8xf32>
    %63 = tpu.matmul %42, %62, %cst_61 {dimension_numbers = #tpu.dot_dimension_numbers<[1], [0], [0], [1], [0, 0, 1, 1], [], []>} : vector<64x4xf32>, vector<4x8xf32>, vector<64x8xf32> -> vector<64x8xf32>
    %c7_62 = arith.constant 7 : index
    %c0_63 = arith.constant 0 : index
    %c0_64 = arith.constant 0 : index
    %64 = vector.load %arg6[%c7_62, %c0_63, %c0_64] : memref<9x4x8xf32, #tpu.memory_space<vmem>>, vector<1x4x8xf32>
    %65 = vector.shape_cast %64 : vector<1x4x8xf32> to vector<4x8xf32>
    %cst_65 = arith.constant dense<0.000000e+00> : vector<64x8xf32>
    %66 = tpu.matmul %42, %65, %cst_65 {dimension_numbers = #tpu.dot_dimension_numbers<[1], [0], [0], [1], [0, 0, 1, 1], [], []>} : vector<64x4xf32>, vector<4x8xf32>, vector<64x8xf32> -> vector<64x8xf32>
    %c8_66 = arith.constant 8 : index
    %c0_67 = arith.constant 0 : index
    %c0_68 = arith.constant 0 : index
    %67 = vector.load %arg6[%c8_66, %c0_67, %c0_68] : memref<9x4x8xf32, #tpu.memory_space<vmem>>, vector<1x4x8xf32>
    %68 = vector.shape_cast %67 : vector<1x4x8xf32> to vector<4x8xf32>
    %cst_69 = arith.constant dense<0.000000e+00> : vector<64x8xf32>
    %69 = tpu.matmul %42, %68, %cst_69 {dimension_numbers = #tpu.dot_dimension_numbers<[1], [0], [0], [1], [0, 0, 1, 1], [], []>} : vector<64x4xf32>, vector<4x8xf32>, vector<64x8xf32> -> vector<64x8xf32>
    %70 = tpu.concatenate %45, %48, %51, %54, %57, %60, %63, %66, %69 in 0 : vector<64x8xf32>, vector<64x8xf32>, vector<64x8xf32>, vector<64x8xf32>, vector<64x8xf32>, vector<64x8xf32>, vector<64x8xf32>, vector<64x8xf32>, vector<64x8xf32> -> vector<576x8xf32>
    %c0_70 = arith.constant 0 : index
    %c0_71 = arith.constant 0 : index
    %71 = vector.load %arg3[%c0_70, %c0_71] : memref<64x576xf32, #tpu.memory_space<vmem>>, vector<64x576xf32>
    %cst_72 = arith.constant dense<0.000000e+00> : vector<64x8xf32>
    %72 = tpu.matmul %71, %70, %cst_72 {dimension_numbers = #tpu.dot_dimension_numbers<[1], [0], [0], [1], [0, 0, 1, 1], [], []>} : vector<64x576xf32>, vector<576x8xf32>, vector<64x8xf32> -> vector<64x8xf32>
    %c0_73 = arith.constant 0 : index
    %c0_74 = arith.constant 0 : index
    %73 = vector.load %arg9[%c0_73, %c0_74] : memref<1x8xf32, #tpu.memory_space<vmem>>, vector<1x8xf32>
    %74 = vector.broadcast %73 : vector<1x8xf32> to vector<64x8xf32>
    %75 = arith.addf %72, %74 : vector<64x8xf32>
    %76 = math.tanh %75 : vector<64x8xf32>
    %77 = vector.extract_strided_slice %76 {offsets = [0, 0], sizes = [16, 8], strides = [1, 1]} : vector<64x8xf32> to vector<16x8xf32>
    %78 = vector.extract_strided_slice %76 {offsets = [16, 0], sizes = [16, 8], strides = [1, 1]} : vector<64x8xf32> to vector<16x8xf32>
    %79 = arith.maximumf %77, %78 : vector<16x8xf32>
    %80 = vector.extract_strided_slice %76 {offsets = [32, 0], sizes = [16, 8], strides = [1, 1]} : vector<64x8xf32> to vector<16x8xf32>
    %81 = vector.extract_strided_slice %76 {offsets = [48, 0], sizes = [16, 8], strides = [1, 1]} : vector<64x8xf32> to vector<16x8xf32>
    %82 = arith.maximumf %80, %81 : vector<16x8xf32>
    %83 = arith.maximumf %79, %82 : vector<16x8xf32>
    %c0_75 = arith.constant 0 : index
    %c0_76 = arith.constant 0 : index
    %c0_77 = arith.constant 0 : index
    %84 = vector.load %arg7[%c0_75, %c0_76, %c0_77] : memref<9x8x8xf32, #tpu.memory_space<vmem>>, vector<1x8x8xf32>
    %85 = vector.shape_cast %84 : vector<1x8x8xf32> to vector<8x8xf32>
    %cst_78 = arith.constant dense<0.000000e+00> : vector<16x8xf32>
    %86 = tpu.matmul %83, %85, %cst_78 {dimension_numbers = #tpu.dot_dimension_numbers<[1], [0], [0], [1], [0, 0, 1, 1], [], []>} : vector<16x8xf32>, vector<8x8xf32>, vector<16x8xf32> -> vector<16x8xf32>
    %c1_79 = arith.constant 1 : index
    %c0_80 = arith.constant 0 : index
    %c0_81 = arith.constant 0 : index
    %87 = vector.load %arg7[%c1_79, %c0_80, %c0_81] : memref<9x8x8xf32, #tpu.memory_space<vmem>>, vector<1x8x8xf32>
    %88 = vector.shape_cast %87 : vector<1x8x8xf32> to vector<8x8xf32>
    %cst_82 = arith.constant dense<0.000000e+00> : vector<16x8xf32>
    %89 = tpu.matmul %83, %88, %cst_82 {dimension_numbers = #tpu.dot_dimension_numbers<[1], [0], [0], [1], [0, 0, 1, 1], [], []>} : vector<16x8xf32>, vector<8x8xf32>, vector<16x8xf32> -> vector<16x8xf32>
    %c2_83 = arith.constant 2 : index
    %c0_84 = arith.constant 0 : index
    %c0_85 = arith.constant 0 : index
    %90 = vector.load %arg7[%c2_83, %c0_84, %c0_85] : memref<9x8x8xf32, #tpu.memory_space<vmem>>, vector<1x8x8xf32>
    %91 = vector.shape_cast %90 : vector<1x8x8xf32> to vector<8x8xf32>
    %cst_86 = arith.constant dense<0.000000e+00> : vector<16x8xf32>
    %92 = tpu.matmul %83, %91, %cst_86 {dimension_numbers = #tpu.dot_dimension_numbers<[1], [0], [0], [1], [0, 0, 1, 1], [], []>} : vector<16x8xf32>, vector<8x8xf32>, vector<16x8xf32> -> vector<16x8xf32>
    %c3_87 = arith.constant 3 : index
    %c0_88 = arith.constant 0 : index
    %c0_89 = arith.constant 0 : index
    %93 = vector.load %arg7[%c3_87, %c0_88, %c0_89] : memref<9x8x8xf32, #tpu.memory_space<vmem>>, vector<1x8x8xf32>
    %94 = vector.shape_cast %93 : vector<1x8x8xf32> to vector<8x8xf32>
    %cst_90 = arith.constant dense<0.000000e+00> : vector<16x8xf32>
    %95 = tpu.matmul %83, %94, %cst_90 {dimension_numbers = #tpu.dot_dimension_numbers<[1], [0], [0], [1], [0, 0, 1, 1], [], []>} : vector<16x8xf32>, vector<8x8xf32>, vector<16x8xf32> -> vector<16x8xf32>
    %c4_91 = arith.constant 4 : index
    %c0_92 = arith.constant 0 : index
    %c0_93 = arith.constant 0 : index
    %96 = vector.load %arg7[%c4_91, %c0_92, %c0_93] : memref<9x8x8xf32, #tpu.memory_space<vmem>>, vector<1x8x8xf32>
    %97 = vector.shape_cast %96 : vector<1x8x8xf32> to vector<8x8xf32>
    %cst_94 = arith.constant dense<0.000000e+00> : vector<16x8xf32>
    %98 = tpu.matmul %83, %97, %cst_94 {dimension_numbers = #tpu.dot_dimension_numbers<[1], [0], [0], [1], [0, 0, 1, 1], [], []>} : vector<16x8xf32>, vector<8x8xf32>, vector<16x8xf32> -> vector<16x8xf32>
    %c5_95 = arith.constant 5 : index
    %c0_96 = arith.constant 0 : index
    %c0_97 = arith.constant 0 : index
    %99 = vector.load %arg7[%c5_95, %c0_96, %c0_97] : memref<9x8x8xf32, #tpu.memory_space<vmem>>, vector<1x8x8xf32>
    %100 = vector.shape_cast %99 : vector<1x8x8xf32> to vector<8x8xf32>
    %cst_98 = arith.constant dense<0.000000e+00> : vector<16x8xf32>
    %101 = tpu.matmul %83, %100, %cst_98 {dimension_numbers = #tpu.dot_dimension_numbers<[1], [0], [0], [1], [0, 0, 1, 1], [], []>} : vector<16x8xf32>, vector<8x8xf32>, vector<16x8xf32> -> vector<16x8xf32>
    %c6_99 = arith.constant 6 : index
    %c0_100 = arith.constant 0 : index
    %c0_101 = arith.constant 0 : index
    %102 = vector.load %arg7[%c6_99, %c0_100, %c0_101] : memref<9x8x8xf32, #tpu.memory_space<vmem>>, vector<1x8x8xf32>
    %103 = vector.shape_cast %102 : vector<1x8x8xf32> to vector<8x8xf32>
    %cst_102 = arith.constant dense<0.000000e+00> : vector<16x8xf32>
    %104 = tpu.matmul %83, %103, %cst_102 {dimension_numbers = #tpu.dot_dimension_numbers<[1], [0], [0], [1], [0, 0, 1, 1], [], []>} : vector<16x8xf32>, vector<8x8xf32>, vector<16x8xf32> -> vector<16x8xf32>
    %c7_103 = arith.constant 7 : index
    %c0_104 = arith.constant 0 : index
    %c0_105 = arith.constant 0 : index
    %105 = vector.load %arg7[%c7_103, %c0_104, %c0_105] : memref<9x8x8xf32, #tpu.memory_space<vmem>>, vector<1x8x8xf32>
    %106 = vector.shape_cast %105 : vector<1x8x8xf32> to vector<8x8xf32>
    %cst_106 = arith.constant dense<0.000000e+00> : vector<16x8xf32>
    %107 = tpu.matmul %83, %106, %cst_106 {dimension_numbers = #tpu.dot_dimension_numbers<[1], [0], [0], [1], [0, 0, 1, 1], [], []>} : vector<16x8xf32>, vector<8x8xf32>, vector<16x8xf32> -> vector<16x8xf32>
    %c8_107 = arith.constant 8 : index
    %c0_108 = arith.constant 0 : index
    %c0_109 = arith.constant 0 : index
    %108 = vector.load %arg7[%c8_107, %c0_108, %c0_109] : memref<9x8x8xf32, #tpu.memory_space<vmem>>, vector<1x8x8xf32>
    %109 = vector.shape_cast %108 : vector<1x8x8xf32> to vector<8x8xf32>
    %cst_110 = arith.constant dense<0.000000e+00> : vector<16x8xf32>
    %110 = tpu.matmul %83, %109, %cst_110 {dimension_numbers = #tpu.dot_dimension_numbers<[1], [0], [0], [1], [0, 0, 1, 1], [], []>} : vector<16x8xf32>, vector<8x8xf32>, vector<16x8xf32> -> vector<16x8xf32>
    %111 = tpu.concatenate %86, %89, %92, %95, %98, %101, %104, %107, %110 in 0 : vector<16x8xf32>, vector<16x8xf32>, vector<16x8xf32>, vector<16x8xf32>, vector<16x8xf32>, vector<16x8xf32>, vector<16x8xf32>, vector<16x8xf32>, vector<16x8xf32> -> vector<144x8xf32>
    %c0_111 = arith.constant 0 : index
    %c0_112 = arith.constant 0 : index
    %112 = vector.load %arg4[%c0_111, %c0_112] : memref<32x144xf32, #tpu.memory_space<vmem>>, vector<32x144xf32>
    %cst_113 = arith.constant dense<0.000000e+00> : vector<32x8xf32>
    %113 = tpu.matmul %112, %111, %cst_113 {dimension_numbers = #tpu.dot_dimension_numbers<[1], [0], [0], [1], [0, 0, 1, 1], [], []>} : vector<32x144xf32>, vector<144x8xf32>, vector<32x8xf32> -> vector<32x8xf32>
    %c0_114 = arith.constant 0 : index
    %c0_115 = arith.constant 0 : index
    %114 = vector.load %arg10[%c0_114, %c0_115] : memref<1x8xf32, #tpu.memory_space<vmem>>, vector<1x8xf32>
    %115 = vector.broadcast %114 : vector<1x8xf32> to vector<32x8xf32>
    %116 = arith.addf %113, %115 : vector<32x8xf32>
    %117 = math.tanh %116 : vector<32x8xf32>
    %118 = vector.extract_strided_slice %117 {offsets = [0, 0], sizes = [8, 8], strides = [1, 1]} : vector<32x8xf32> to vector<8x8xf32>
    %119 = vector.extract_strided_slice %117 {offsets = [8, 0], sizes = [8, 8], strides = [1, 1]} : vector<32x8xf32> to vector<8x8xf32>
    %120 = arith.maximumf %118, %119 : vector<8x8xf32>
    %121 = vector.extract_strided_slice %117 {offsets = [16, 0], sizes = [8, 8], strides = [1, 1]} : vector<32x8xf32> to vector<8x8xf32>
    %122 = vector.extract_strided_slice %117 {offsets = [24, 0], sizes = [8, 8], strides = [1, 1]} : vector<32x8xf32> to vector<8x8xf32>
    %123 = arith.maximumf %121, %122 : vector<8x8xf32>
    %124 = arith.maximumf %120, %123 : vector<8x8xf32>
    %c0_116 = arith.constant 0 : index
    %c0_117 = arith.constant 0 : index
    %c0_118 = arith.constant 0 : index
    %125 = vector.load %arg11[%c0_116, %c0_117, %c0_118] : memref<1x8x8xf32, #tpu.memory_space<vmem>>, vector<1x8x8xf32>
    %126 = vector.shape_cast %125 : vector<1x8x8xf32> to vector<8x8xf32>
    %127 = vector.shape_cast %124 : vector<8x8xf32> to vector<1x8x8xf32>
    tpu.vector_store %arg11[%c0_116, %c0_117, %c0_118], %127 {strides = array<i32>} : memref<1x8x8xf32, #tpu.memory_space<vmem>>, vector<1x8x8xf32>,
    return
  }
  func.func @transform_0(%arg0: i32) -> (i32, i32, i32) {
    %c0_i32 = arith.constant 0 : i32
    %c0_i32_0 = arith.constant 0 : i32
    %c0_i32_1 = arith.constant 0 : i32
    return %arg0, %c0_i32, %c0_i32_0 : i32, i32, i32
  }
  func.func @transform_1(%arg0: i32) -> (i32, i32) {
    %c0_i32 = arith.constant 0 : i32
    %c0_i32_0 = arith.constant 0 : i32
    %c0_i32_1 = arith.constant 0 : i32
    return %c0_i32, %c0_i32_0 : i32, i32
  }
  func.func @transform_2(%arg0: i32) -> (i32, i32) {
    %c0_i32 = arith.constant 0 : i32
    %c0_i32_0 = arith.constant 0 : i32
    %c0_i32_1 = arith.constant 0 : i32
    return %c0_i32, %c0_i32_0 : i32, i32
  }
  func.func @transform_3(%arg0: i32) -> (i32, i32) {
    %c0_i32 = arith.constant 0 : i32
    %c0_i32_0 = arith.constant 0 : i32
    %c0_i32_1 = arith.constant 0 : i32
    return %c0_i32, %c0_i32_0 : i32, i32
  }
  func.func @transform_4(%arg0: i32) -> (i32, i32, i32) {
    %c0_i32 = arith.constant 0 : i32
    %c0_i32_0 = arith.constant 0 : i32
    %c0_i32_1 = arith.constant 0 : i32
    %c0_i32_2 = arith.constant 0 : i32
    return %c0_i32, %c0_i32_0, %c0_i32_1 : i32, i32, i32
  }
  func.func @transform_5(%arg0: i32) -> (i32, i32, i32) {
    %c0_i32 = arith.constant 0 : i32
    %c0_i32_0 = arith.constant 0 : i32
    %c0_i32_1 = arith.constant 0 : i32
    %c0_i32_2 = arith.constant 0 : i32
    return %c0_i32, %c0_i32_0, %c0_i32_1 : i32, i32, i32
  }
  func.func @transform_6(%arg0: i32) -> (i32, i32, i32) {
    %c0_i32 = arith.constant 0 : i32
    %c0_i32_0 = arith.constant 0 : i32
    %c0_i32_1 = arith.constant 0 : i32
    %c0_i32_2 = arith.constant 0 : i32
    return %c0_i32, %c0_i32_0, %c0_i32_1 : i32, i32, i32
  }
  func.func @transform_7(%arg0: i32) -> (i32, i32) {
    %c0_i32 = arith.constant 0 : i32
    %c0_i32_0 = arith.constant 0 : i32
    %c0_i32_1 = arith.constant 0 : i32
    return %c0_i32, %c0_i32_0 : i32, i32
  }
  func.func @transform_8(%arg0: i32) -> (i32, i32) {
    %c0_i32 = arith.constant 0 : i32
    %c0_i32_0 = arith.constant 0 : i32
    %c0_i32_1 = arith.constant 0 : i32
    return %c0_i32, %c0_i32_0 : i32, i32
  }
  func.func @transform_9(%arg0: i32) -> (i32, i32) {
    %c0_i32 = arith.constant 0 : i32
    %c0_i32_0 = arith.constant 0 : i32
    %c0_i32_1 = arith.constant 0 : i32
    return %c0_i32, %c0_i32_0 : i32, i32
  }
  func.func @transform_10(%arg0: i32) -> (i32, i32, i32) {
    %c0_i32 = arith.constant 0 : i32
    %c0_i32_0 = arith.constant 0 : i32
    %c0_i32_1 = arith.constant 0 : i32
    return %arg0, %c0_i32, %c0_i32_0 : i32, i32, i32
  }
}

</mosaic_0001>

<bundles_post_ra>
// kernel: tpu_custom_call.1
= control target key start
LH: loop header
LB: loop body
LE: loop exit
PB: predicated region body
PF: predicated region fallthrough
CT: control target
= control target key end

     0   :  { %15 = vsyncpa [#allocation3], 0  ;;  %s13525_s0 = inlined_call_operand.vmem [shape: f32[2,256,3], index: 0, kind: input, shape index: {}]   ;;  %s13526_s1 = inlined_call_operand.hbm [shape: f32[256,2304], index: 1, kind: input, shape index: {}]   ;;  %s13527_s2 = inlined_call_operand.hbm [shape: f32[64,576], index: 2, kind: input, shape index: {}]   ;;  %s13528_s3 = inlined_call_operand.hbm [shape: f32[32,144], index: 3, kind: input, shape index: {}]   ;;  %s13529_s4 = inlined_call_operand.vmem [shape: f32[9,3,4], index: 4, kind: input, shape index: {}]   ;;  %s13530_s5 = inlined_call_operand.vmem [shape: f32[9,4,8], index: 5, kind: input, shape index: {}]   ;;  %s13531_s6 = inlined_call_operand.vmem [shape: f32[9,8,8], index: 6, kind: input, shape index: {}]   ;;  %s13532_s7 = inlined_call_operand.hbm [shape: f32[1,4], index: 7, kind: input, shape index: {}]   ;;  %s13533_s8 = inlined_call_operand.hbm [shape: f32[1,8], index: 8, kind: input, shape index: {}]   ;;  %s13534_s9 = inlined_call_operand.hbm [shape: f32[1,8], index: 9, kind: input, shape index: {}]   ;;  %s13535_s10 = inlined_call_operand.hbm [shape: f32[2,8,8], index: 10, kind: output, shape index: {}]  }
   0x1   :  { %16 = vsyncpa [#allocation6], 0 }
   0x2   :  { %17 = vsyncpa [#allocation9], 0 }
   0x3   :  { %18 = vsyncpa [#allocation12], 0 }
   0x4   :  { %19 = vsyncpa [#allocation4], 0 }
   0x5   :  { %21 = vsyncpa [#allocation4 + $0x1], 0  ;;  %s10876_s13 = smov 0   ;;  %s10878_s14 = smov 0  }
   0x6   :  { %s10880_s15 = smov 0   ;;  %s10882_s16 = smov 0  }
   0x7 LB: > { %13604 = sst [smem:[#allocation19_spill]] %s10793_s13  ;;  %s10897_s17 = sadd.s32 4294967295, %s10805_s16   ;;  %s10805_s16 = sphi %s10882_s16, %s13841_s16   ;;  %s10801_s15 = sphi %s10880_s15, %s13846_s15   ;;  %s10797_s14 = sphi %s10878_s14, %s13845_s14   ;;  %s10793_s13 = sphi %s10876_s13, %s13844_s13  }
   0x8   : > { %13605 = sst [smem:[#allocation20_spill]] %s10801_s15  ;;  %s7672_s18 = sadd.s32 4294967294, %s10805_s16  }
   0x9   : > { %13606 = sst [smem:[#allocation21_spill]] %s10805_s16  ;;  %s10901_s19 = sadd.s32 1, %s10805_s16  }
   0xa   : > { %13607 = sst [smem:[#allocation22_spill]] %s10901_s19  ;;  %s249_s20 = sadd.s32 1, %s10801_s15 }
   0xb   : > { %s246_s21 = ssub.s32 %s10805_s16, %s10901_s19  ;;  %p259_p0 = scmp.ne.s32.totalorder %s10801_s15, %s10797_s14 }
   0xc   : > { %p247_p1 = scmp.eq.s32.totalorder %s246_s21, 0  ;;  %p260_p2 = scmp.eq.s32.totalorder %s10897_s17, 1 }
   0xd   : > { %p265_p3 = scmp.ne.s32.totalorder %s10797_s14, %s10793_s13  ;;  %p266_p4 = scmp.eq.s32.totalorder %s7672_s18, 1 }
   0xe   : > { %s10912_s22 = scalar_select %p247_p1, %s10801_s15, %s249_s20  }
   0xf   : > { %p10914_p5 = por %p260_p2, %p259_p0  ;;  %p10918_p6 = por %p266_p4, %p265_p3 }
  0x10   : > { %13608 = sst [smem:[#allocation23_spill]] %s10912_s22  ;;  %p7673_p7 = scmp.ge.s32.totalorder %s10805_s16, 1 }
  0x11   : > { %s13609_s23 = scalar_select %p10914_p5, 1, 0 }
  0x12   : > { %s13610_s24 = scalar_select %p10918_p6, 1, 0 }
  0x13   : > { %p273_p8 = scmp.lt.s32.totalorder %s10805_s16, 3  ;;  %p13537_p9 = scmp.eq.s32.totalorder %s10897_s17, 0 }
  0x14   : > { %13611 = sst [smem:[#allocation24_spill]] %s13610_s24  ;;  %s10807_s26 = smov [#allocation5]  }
  0x15   : > { %p10925_p10 = pnand %p7673_p7, %p273_p8  ;;  %s298_s27 = sshll.u32 %s10807_s26, 4  ;;  %s10931_s27 = int_to_ptr.vmem [resolvable:$true] %s298_s27 }
  0x16   : > { %s10808_s29 = smov [#allocation8]   ;;  %s10809_s11 = smov [#allocation2]  }
  0x17   : > { %s13612_s25 = scalar_select %p10925_p10, 1, 0 }
  0x18   : > { %p10390_p11 = pneg %p10925_p10  ;;  %s334_s30 = sshll.u32 %s10808_s29, 4  ;;  %s10939_s30 = int_to_ptr.vmem [resolvable:$true] %s334_s30 }
  0x19   : > { %s10941_s12 = sshll.u32 %s10809_s11, 4  ;;  %s10559_s21 = scalar_lea.hbm %s13527_s2, 5120  ;;  %s286_s12 = int_to_ptr.vmem [resolvable:$true] %s10941_s12 }
  0x1a   : > { %p10935_p12 = pnand %p13537_p9, %p10390_p11  ;;  %p10560_p13 = scmp.ne.s32.totalorder %s13527_s2, %s10559_s21 }
  0x1b   : > { %p10566_p3 = scmp.lt.u32.totalorder %s10559_s21, %s13527_s2 }
  0x1c   : > { %p10951_p0 = pneg %p10935_p12 }
  0x1e   : > { %p10562_p1 = pnand %p10951_p0, %p10560_p13 }
  0x20   : > { %p10563_p2 = pneg %p10562_p1 }
  0x22   : > { %p10568_p4 = pnand %p10566_p3, %p10563_p2 }
  0x24   : > { %10571 = shalt.err (!%p10568_p4)
}
  0x25   : > { %s10572_s22 = scalar_lea.vmem %s10931_s27, 5120  ;;  %p10580_p9 = scmp.lt.s32.totalorder %s10931_s27, %s10931_s27 }
  0x26   : > { %p10573_p7 = scmp.ne.s32.totalorder %s10931_s27, %s10572_s22  ;;  %p10581_p6 = scmp.lt.s32.totalorder %s10572_s22, %s10572_s22 }
  0x28   : > { %p10575_p8 = pnand %p10573_p7, %p10951_p0  ;;  %p10582_p13 = por %p10581_p6, %p10580_p9 }
  0x2a   : > { %p10576_p11 = pneg %p10575_p8 }
  0x2c   : > { %p10583_p1 = pnand %p10582_p13, %p10576_p11 }
  0x2e   : > { %10586 = shalt.err (!%p10583_p1)
}
  0x2f   : > { %s10810_s18 = smov 640   ;;  %s10811_s20 = smov 40  }
  0x30   : > { %10396 = dma.hbm_to_vmem [thread:$0]  (!%p10935_p12), %s13527_s2, 5120, %s10931_s27, [#allocation6], %s10810_s18, %s10810_s18, %s10811_s20  }
  0x31   : > { %s10587_s19 = scalar_lea.hbm %s13532_s7, 16 }
  0x32   : > { %p10588_p6 = scmp.ne.s32.totalorder %s13532_s7, %s10587_s19  ;;  %p10594_p3 = scmp.lt.u32.totalorder %s10587_s19, %s13532_s7 }
  0x34   : > { %p10590_p9 = pnand %p10588_p6, %p10951_p0 }
  0x36   : > { %p10591_p2 = pneg %p10590_p9 }
  0x38   : > { %p10596_p4 = pnand %p10594_p3, %p10591_p2 }
  0x3a   : > { %10599 = shalt.err (!%p10596_p4)
}
  0x3b   : > { %s10600_s27 = scalar_lea.vmem %s10939_s30, 16  ;;  %s10607_s13 = scalar_lea.vmem %s10939_s30, 32 }
  0x3c   : > { %p10601_p7 = scmp.ne.s32.totalorder %s10939_s30, %s10600_s27  ;;  %p10608_p13 = scmp.lt.s32.totalorder %s10939_s30, %s10939_s30 }
  0x3d   : > { %p10609_p1 = scmp.lt.s32.totalorder %s10607_s13, %s10600_s27 }
  0x3e   : > { %p10603_p8 = pnand %p10601_p7, %p10951_p0 }
  0x3f   : > { %p10610_p6 = por %p10609_p1, %p10608_p13 }
  0x40   : > { %p10604_p11 = pneg %p10603_p8 }
  0x42   : > { %p10611_p9 = pnand %p10610_p6, %p10604_p11 }
  0x44   : > { %10614 = shalt.err (!%p10611_p9)
}
  0x45   : > { %10402 = dma.hbm_to_vmem [thread:$0]  (!%p10935_p12), %s13532_s7, 16, %s10939_s30, [#allocation9]  }
  0x46   : > { %s10615_s20 = scalar_lea.hbm %s13526_s1, 73728 }
  0x47   : > { %p10616_p2 = scmp.ne.s32.totalorder %s13526_s1, %s10615_s20  ;;  %p10622_p7 = scmp.lt.u32.totalorder %s10615_s20, %s13526_s1 }
  0x49   : > { %p10618_p3 = pnand %p10616_p2, %p10951_p0 }
  0x4b   : > { %p10619_p4 = pneg %p10618_p3 }
  0x4d   : > { %p10624_p8 = pnand %p10622_p7, %p10619_p4 }
  0x4f   : > { %10627 = shalt.err (!%p10624_p8)
}
  0x50   : > { %s10628_s22 = scalar_lea.vmem %s286_s12, 73728  ;;  %p10636_p6 = scmp.lt.s32.totalorder %s286_s12, %s286_s12 }
  0x51   : > { %p10629_p11 = scmp.ne.s32.totalorder %s286_s12, %s10628_s22  ;;  %p10637_p9 = scmp.lt.s32.totalorder %s10628_s22, %s10628_s22 }
  0x53   : > { %p10631_p13 = pnand %p10629_p11, %p10951_p0  ;;  %p10638_p5 = por %p10637_p9, %p10636_p6 }
  0x55   : > { %p10632_p1 = pneg %p10631_p13 }
  0x57   : > { %p10639_p10 = pnand %p10638_p5, %p10632_p1 }
  0x59   : > { %10642 = shalt.err (!%p10639_p10)
}
  0x5a   : > { %s10812_s30 = smov 2304   ;;  %s10813_s27 = smov 144  }
  0x5b   : > { %10393 = dma.hbm_to_vmem [thread:$0]  (!%p10935_p12), %s13526_s1, 73728, %s286_s12, [#allocation3], %s10812_s30, %s10812_s30, %s10813_s27  }
  0x5c   : > { %s10814_s19 = smov [#allocation7]   ;;  %s10643_s21 = scalar_lea.hbm %s13528_s3, 1024 }
  0x5d   : > { %s311_s24 = sshll.u32 %s10814_s19, 4  ;;  %p10644_p5 = scmp.ne.s32.totalorder %s13528_s3, %s10643_s21  ;;  %s312_s24 = int_to_ptr.vmem [resolvable:$true] %s311_s24 }
  0x5e   : > { %p10650_p3 = scmp.lt.u32.totalorder %s10643_s21, %s13528_s3 }
  0x5f   : > { %p10646_p10 = pnand %p10644_p5, %p10951_p0 }
  0x61   : > { %p10647_p2 = pneg %p10646_p10 }
  0x63   : > { %p10652_p4 = pnand %p10650_p3, %p10647_p2 }
  0x65   : > { %10655 = shalt.err (!%p10652_p4)
}
  0x66   : > { %s10656_s12 = scalar_lea.vmem %s312_s24, 1024  ;;  %p10664_p13 = scmp.lt.s32.totalorder %s312_s24, %s312_s24 }
  0x67   : > { %p10657_p7 = scmp.ne.s32.totalorder %s312_s24, %s10656_s12  ;;  %p10665_p1 = scmp.lt.s32.totalorder %s10656_s12, %s10656_s12 }
  0x69   : > { %p10659_p8 = pnand %p10657_p7, %p10951_p0  ;;  %p10666_p6 = por %p10665_p1, %p10664_p13 }
  0x6b   : > { %p10660_p11 = pneg %p10659_p8 }
  0x6d   : > { %p10667_p9 = pnand %p10666_p6, %p10660_p11 }
  0x6f   : > { %10670 = shalt.err (!%p10667_p9)
}
  0x70   : > { %s10815_s30 = smov 256   ;;  %s10816_s27 = smov 16  }
  0x71   : > { %10399 = dma.hbm_to_vmem [thread:$0]  (!%p10935_p12), %s13528_s3, 1024, %s312_s24, [#allocation6], %s10815_s30, %s10815_s30, %s10816_s27  }
  0x72   : > { %s10817_s19 = smov [#allocation10]   ;;  %s10818_s20 = smov [#allocation11]  }
  0x73   : > { %s345_s18 = sshll.u32 %s10817_s19, 4  ;;  %s356_s21 = sshll.u32 %s10818_s20, 4  ;;  %s346_s18 = int_to_ptr.vmem [resolvable:$true] %s345_s18  ;;  %s11033_s21 = int_to_ptr.vmem [resolvable:$true] %s356_s21 }
  0x74   : > { %s10671_s11 = scalar_lea.hbm %s13533_s8, 16 }
  0x75   : > { %p10672_p5 = scmp.ne.s32.totalorder %s13533_s8, %s10671_s11  ;;  %p10678_p3 = scmp.lt.u32.totalorder %s10671_s11, %s13533_s8 }
  0x77   : > { %p10674_p10 = pnand %p10672_p5, %p10951_p0 }
  0x79   : > { %p10675_p2 = pneg %p10674_p10 }
  0x7b   : > { %p10680_p4 = pnand %p10678_p3, %p10675_p2 }
  0x7d   : > { %10683 = shalt.err (!%p10680_p4)
}
  0x7e   : > { %s10684_s30 = scalar_lea.vmem %s346_s18, 16  ;;  %s10691_s27 = scalar_lea.vmem %s346_s18, 32 }
  0x7f   : > { %p10685_p7 = scmp.ne.s32.totalorder %s346_s18, %s10684_s30  ;;  %p10692_p13 = scmp.lt.s32.totalorder %s346_s18, %s346_s18 }
  0x80   : > { %p10693_p1 = scmp.lt.s32.totalorder %s10691_s27, %s10684_s30 }
  0x81   : > { %p10687_p8 = pnand %p10685_p7, %p10951_p0 }
  0x82   : > { %p10694_p6 = por %p10693_p1, %p10692_p13 }
  0x83   : > { %p10688_p11 = pneg %p10687_p8 }
  0x85   : > { %p10695_p9 = pnand %p10694_p6, %p10688_p11 }
  0x87   : > { %10698 = shalt.err (!%p10695_p9)
}
  0x88   : > { %10405 = dma.hbm_to_vmem [thread:$0]  (!%p10935_p12), %s13533_s8, 16, %s346_s18, [#allocation9]  }
  0x89   : > { %s10699_s29 = scalar_lea.hbm %s13534_s9, 16 }
  0x8a   : > { %p10700_p5 = scmp.ne.s32.totalorder %s13534_s9, %s10699_s29  ;;  %p10706_p3 = scmp.lt.u32.totalorder %s10699_s29, %s13534_s9 }
  0x8c   : > { %p10702_p10 = pnand %p10700_p5, %p10951_p0 }
  0x8e   : > { %p10703_p2 = pneg %p10702_p10 }
  0x90   : > { %p10708_p4 = pnand %p10706_p3, %p10703_p2 }
  0x92   : > { %10711 = shalt.err (!%p10708_p4)
}
  0x93   : > { %s10712_s18 = scalar_lea.vmem %s11033_s21, 16  ;;  %s10719_s24 = scalar_lea.vmem %s11033_s21, 32 }
  0x94   : > { %p10713_p7 = scmp.ne.s32.totalorder %s11033_s21, %s10712_s18  ;;  %p10720_p13 = scmp.lt.s32.totalorder %s11033_s21, %s11033_s21 }
  0x95   : > { %p10721_p1 = scmp.lt.s32.totalorder %s10719_s24, %s10712_s18 }
  0x96   : > { %p10715_p8 = pnand %p10713_p7, %p10951_p0 }
  0x97   : > { %p10722_p6 = por %p10721_p1, %p10720_p13 }
  0x98   : > { %p10716_p11 = pneg %p10715_p8 }
  0x9a   : > { %p10723_p9 = pnand %p10722_p6, %p10716_p11 }
  0x9c   : > { %10726 = shalt.err (!%p10723_p9)
}
  0x9d   : > { %10408 = dma.hbm_to_vmem [thread:$0]  (!%p10935_p12), %s13534_s9, 16, %s11033_s21, [#allocation12]  }
  0x9e   : > { %p13615_p5 = scmp.ne.s32.totalorder %s13612_s25, 0 }
  0xa0   : > { %377 = sbr.rel (%p13615_p5) target bundleno = 2633 (0xa49), region = 60 }
  0xa7   : > { %p13616_p0 = scmp.eq.s32.totalorder %s10897_s17, 0 }
  0xa9   : > { %10772 = dma.done.wait (%p13616_p0), [#allocation3], 73728   ;;  %p13617_p10 = pmov %p13616_p0 }
  0xaa   : > { %p13618_p2 = pmov %p13616_p0 }
  0xab   : > { %10774 = vsyncadd (%p13617_p10), [#allocation3], 4294893568 }
  0xac   : > { %10776 = dma.done.wait (%p13618_p2), [#allocation6], 6144   ;;  %p13619_p3 = pmov %p13616_p0 }
  0xad   : > { %p13620_p4 = pmov %p13616_p0 }
  0xae   : > { %10778 = vsyncadd (%p13619_p3), [#allocation6], 4294961152 }
  0xaf   : > { %10780 = dma.done.wait (%p13620_p4), [#allocation9], 32   ;;  %p13621_p12 = pmov %p13616_p0 }
  0xb0   : > { %p13622_p7 = pmov %p13616_p0 }
  0xb1   : > { %10782 = vsyncadd (%p13621_p12), [#allocation9], 4294967264 }
  0xb2   : > { %10784 = dma.done.wait (%p13622_p7), [#allocation12], 16   ;;  %p13623_p8 = pmov %p13616_p0 }
  0xb3   : > { %p435_p11 = scmp.lt.s32.totalorder %s10897_s17, 1  ;;  %vm570_vm0 = vcmask 1042432   ;;  %vm473_vm1 = vcmask 23552   ;;  %v472_v0 = vld [vmem:[%s13529_s4] sm:$0x7]  ;;  %v13545_v41 = vmov 0.0|0.0  }
  0xb4   : > { %10786 = vsyncadd (%p13623_p8), [#allocation12], 4294967280  ;;  %v7724_v1 = vld [vmem:[%s13529_s4 + $0x4] sm:$0x7]  ;;  %8664 = vmatprep.subr.msk.mxu0 %vm570_vm0, %v472_v0  ;;  %v7792_v4 = vld [vmem:[%s13529_s4 + $0xc] sm:$0x7] }
  0xb5   : > { %s436_s15 = scalar_select %p435_p11, %s10897_s17, 1  ;;  %8714 = vmatprep.subr.msk.mxu1 %vm570_vm0, %v7724_v1  ;;  %8665 = vmatpush3.msk.msra.mxu0 %vm570_vm0, %v472_v0  ;;  %v7758_v10 = vld [vmem:[%s13529_s4 + $0x8] sm:$0x7]  ;;  %v11180_v13 = vld [vmem:[%s13529_s4 + $0x10] sm:$0x7]  ;;  %vm5329_vm2 = vcmask 1043456  }
  0xb6   : > { %8715 = vmatpush3.msk.msra.mxu1 %vm570_vm0, %v7724_v1  ;;  %8764 = vmatprep.subr.msk.mxu0 %vm570_vm0, %v7758_v10  ;;  %v11219_v18 = vld [vmem:[%s13529_s4 + $0x14] sm:$0x7]  ;;  %v11371_v38 = vld [vmem:[%s13529_s4 + $0x18] sm:$0x7]  ;;  %v7928_v39 = vld [vmem:[%s13529_s4 + $0x1c] sm:$0x7] }
  0xb7   : > { %s8130_s25 = sshll.u32 %s436_s15, 8  ;;  %8814 = vmatprep.subr.msk.mxu1 %vm570_vm0, %v7792_v4  ;;  %v11514_v40 = vld [vmem:[%s13529_s4 + $0x20] sm:$0x7]  ;;  %vm5304_vm3 = vcmask 31744   ;;  %vm6365_vm4 = vcmask 523264   ;;  %vm6720_vm5 = vcmask 64512  }
  0xb8   : > { %s11100_s16 = scalar_lea.vmem %s13525_s0, %s8130_s25  ;;  %vm7433_vm6 = vcmask 130048   ;;  %s432_s29 = sand.u32 1, %s10797_s14  }
  0xb9   : > { %v11109_v2 = vld [vmem:[%s11100_s16] sm:$0xff]  ;;  %v11114_v3 = vld [vmem:[%s11100_s16 + $0x8] sm:$0xff]  ;;  %v11123_v5 = vld [vmem:[%s11100_s16 + $0x10] sm:$0xff]  ;;  %s7688_s11 = sshll.u32 %s432_s29, 3  ;;  %s8127_s22 = sshll.u32 %s10897_s17, 7 }
  0xba   : > { %8666 = vmatprep.mubr.msk.f32.mxu0 %vm473_vm1, %v11109_v2  ;;  %8716 = vmatprep.mubr.msk.f32.mxu1 %vm473_vm1, %v11109_v2  ;;  %v11136_v6 = vld [vmem:[%s11100_s16 + $0x18] sm:$0xff]  ;;  %v11142_v7 = vld [vmem:[%s11100_s16 + $0x20] sm:$0xff]  ;;  %v11153_v8 = vld [vmem:[%s11100_s16 + $0x28] sm:$0xff]  ;;  %s434_s12 = scalar_lea.vmem [#allocation13], %s7688_s11  ;;  %s13482_s30 = scalar_lea.hbm %s13535_s10, %s8127_s22 }
  0xbb   : > { %8667 = vmatmul.mubr.msk.f32.vlgmr.msra.gmra.mrb[0].mxu0 %vm473_vm1, %v11114_v3  ;;  %8717 = vmatmul.mubr.msk.f32.vlgmr.msra.gmra.mrb[0].mxu1 %vm473_vm1, %v11114_v3  ;;  %v11156_v9 = vld [vmem:[%s11100_s16 + $0x30] sm:$0xff]  ;;  %v11170_v11 = vld [vmem:[%s11100_s16 + $0x38] sm:$0xff]  ;;  %v11173_v12 = vld [vmem:[%s11100_s16 + $0x40] sm:$0xff]  ;;  %s7553_s13 = sshll.u32 %s434_s12, 4  ;;  %s7540_s27 = scalar_lea.sflag [#allocation4], %s432_s29  ;;  %s13484_s13 = int_to_ptr.vmem [resolvable:$true] %s7553_s13 }
  0xbc   : > { %8669 = vmatprep.mubr.msk.f32.mxu0 %vm473_vm1, %v11123_v5  ;;  %8815 = vmatpush3.msk.msra.mxu1 %vm570_vm0, %v7792_v4  ;;  %v11191_v14 = vld [vmem:[%s11100_s16 + $0x48] sm:$0xff]  ;;  %v11194_v15 = vld [vmem:[%s11100_s16 + $0x50] sm:$0xff]  ;;  %v11207_v16 = vld [vmem:[%s11100_s16 + $0x58] sm:$0xff]  ;;  %s10727_s15 = scalar_lea.vmem %s13484_s13, 128  ;;  %p13836_p1 = scmp.ne.s32.totalorder %s13609_s23, 0 }
  0xbd   : > { %8719 = vmatprep.mubr.msk.f32.mxu1 %vm473_vm1, %v11123_v5  ;;  %8765 = vmatpush3.msk.msra.mxu0 %vm570_vm0, %v7758_v10  ;;  %v11210_v17 = vld [vmem:[%s11100_s16 + $0x60] sm:$0xff]  ;;  %v11226_v19 = vld [vmem:[%s11100_s16 + $0x68] sm:$0xff]  ;;  %v11229_v20 = vld [vmem:[%s11100_s16 + $0x70] sm:$0xff]  ;;  %p10728_p13 = scmp.ne.s32.totalorder %s13484_s13, %s10727_s15  ;;  %s10820_s17 = smov [#allocation13]  }
  0xbe   : > { %8864 = vmatprep.subr.msk.mxu0 %vm570_vm0, %v11180_v13  ;;  %8914 = vmatprep.subr.msk.mxu1 %vm570_vm0, %v11219_v18  ;;  %v11242_v21 = vld [vmem:[%s11100_s16 + $0x78] sm:$0xff]  ;;  %v11245_v22 = vld [vmem:[%s11100_s16 + $0x80] sm:$0xff]  ;;  %v11256_v23 = vld [vmem:[%s11100_s16 + $0x88] sm:$0xff]  ;;  %s10731_s25 = sshll.u32 %s10820_s17, 4  ;;  %s10732_s25 = int_to_ptr.vmem [resolvable:$false] %s10731_s25 }
  0xbf   : > { %8670 = vmatmul.mubr.msk.f32.gmra.mrb[2].mxu0 %vm473_vm1, %v11136_v6  ;;  %8720 = vmatmul.mubr.msk.f32.gmra.mrb[2].mxu1 %vm473_vm1, %v11136_v6  ;;  %v11259_v24 = vld [vmem:[%s11100_s16 + $0x90] sm:$0xff]  ;;  %v11270_v25 = vld [vmem:[%s11100_s16 + $0x98] sm:$0xff]  ;;  %v11273_v26 = vld [vmem:[%s11100_s16 + $0xa0] sm:$0xff]  ;;  %p10729_p6 = pnand %p10728_p13, %p13836_p1  ;;  %s10733_s28 = scalar_lea.vmem %s10732_s25, 256 }
  0xc0   : > { %8672 = vmatprep.mubr.msk.f32.mxu0 %vm473_vm1, %v11142_v7  ;;  %8722 = vmatprep.mubr.msk.f32.mxu1 %vm473_vm1, %v11142_v7  ;;  %v11284_v27 = vld [vmem:[%s11100_s16 + $0xa8] sm:$0xff]  ;;  %v11287_v28 = vld [vmem:[%s11100_s16 + $0xb0] sm:$0xff]  ;;  %v11298_v29 = vld [vmem:[%s11100_s16 + $0xb8] sm:$0xff]  ;;  %p10734_p5 = scmp.lt.s32.totalorder %s13484_s13, %s10732_s25  ;;  %p10735_p0 = scmp.lt.s32.totalorder %s10733_s28, %s10727_s15 }
  0xc1   : > { %v11301_v30 = vld [vmem:[%s11100_s16 + $0xc0] sm:$0xff]  ;;  %v11312_v31 = vld [vmem:[%s11100_s16 + $0xc8] sm:$0xff]  ;;  %v11315_v32 = vld [vmem:[%s11100_s16 + $0xd0] sm:$0xff]  ;;  %p10730_p9 = pneg %p10729_p6 }
  0xc2   : > { %v11326_v33 = vld [vmem:[%s11100_s16 + $0xd8] sm:$0xff]  ;;  %v11329_v34 = vld [vmem:[%s11100_s16 + $0xe0] sm:$0xff]  ;;  %v11340_v35 = vld [vmem:[%s11100_s16 + $0xe8] sm:$0xff]  ;;  %p10736_p10 = por %p10735_p0, %p10734_p5 }
  0xc3   : > { %8673 = vmatmul.mubr.msk.f32.gmra.mrb[4].mxu0 %vm473_vm1, %v11153_v8  ;;  %8723 = vmatmul.mubr.msk.f32.gmra.mrb[4].mxu1 %vm473_vm1, %v11153_v8  ;;  %v11343_v36 = vld [vmem:[%s11100_s16 + $0xf0] sm:$0xff]  ;;  %v11354_v37 = vld [vmem:[%s11100_s16 + $0xf8] sm:$0xff] }
  0xc4   : > { %8675 = vmatprep.mubr.msk.f32.mxu0 %vm473_vm1, %v11156_v9  ;;  %8725 = vmatprep.mubr.msk.f32.mxu1 %vm473_vm1, %v11156_v9  ;;  %p10737_p2 = pnand %p10736_p10, %p10730_p9 }
  0xc7   : > { %8676 = vmatmul.mubr.msk.f32.gmra.mrb[6].mxu0 %vm473_vm1, %v11170_v11  ;;  %8726 = vmatmul.mubr.msk.f32.gmra.mrb[6].mxu1 %vm473_vm1, %v11170_v11 }
  0xc8   : > { %8678 = vmatprep.mubr.msk.f32.mxu0 %vm473_vm1, %v11173_v12  ;;  %8728 = vmatprep.mubr.msk.f32.mxu1 %vm473_vm1, %v11173_v12 }
  0xcb   : > { %8679 = vmatmul.mubr.msk.f32.gmra.mrb[8].mxu0 %vm473_vm1, %v11191_v14  ;;  %8729 = vmatmul.mubr.msk.f32.gmra.mrb[8].mxu1 %vm473_vm1, %v11191_v14 }
  0xcc   : > { %8681 = vmatprep.mubr.msk.f32.mxu0 %vm473_vm1, %v11194_v15  ;;  %8731 = vmatprep.mubr.msk.f32.mxu1 %vm473_vm1, %v11194_v15 }
  0xcf   : > { %8682 = vmatmul.mubr.msk.f32.gmra.mrb[10].mxu0 %vm473_vm1, %v11207_v16  ;;  %8732 = vmatmul.mubr.msk.f32.gmra.mrb[10].mxu1 %vm473_vm1, %v11207_v16 }
  0xd0   : > { %8684 = vmatprep.mubr.msk.f32.mxu0 %vm473_vm1, %v11210_v17  ;;  %8734 = vmatprep.mubr.msk.f32.mxu1 %vm473_vm1, %v11210_v17 }
  0xd3   : > { %8685 = vmatmul.mubr.msk.f32.gmra.mrb[12].mxu0 %vm473_vm1, %v11226_v19  ;;  %8735 = vmatmul.mubr.msk.f32.gmra.mrb[12].mxu1 %vm473_vm1, %v11226_v19 }
  0xd4   : > { %8687 = vmatprep.mubr.msk.f32.mxu0 %vm473_vm1, %v11229_v20  ;;  %8737 = vmatprep.mubr.msk.f32.mxu1 %vm473_vm1, %v11229_v20 }
  0xd7   : > { %8688 = vmatmul.mubr.msk.f32.gmra.mrb[14].mxu0 %vm473_vm1, %v11242_v21  ;;  %8738 = vmatmul.mubr.msk.f32.gmra.mrb[14].mxu1 %vm473_vm1, %v11242_v21 }
  0xd8   : > { %8690 = vmatprep.mubr.msk.f32.mxu0 %vm473_vm1, %v11245_v22  ;;  %8740 = vmatprep.mubr.msk.f32.mxu1 %vm473_vm1, %v11245_v22 }
  0xdb   : > { %8691 = vmatmul.mubr.msk.f32.gmra.mrb[16].mxu0 %vm473_vm1, %v11256_v23  ;;  %8741 = vmatmul.mubr.msk.f32.gmra.mrb[16].mxu1 %vm473_vm1, %v11256_v23 }
  0xdc   : > { %8693 = vmatprep.mubr.msk.f32.mxu0 %vm473_vm1, %v11259_v24  ;;  %8743 = vmatprep.mubr.msk.f32.mxu1 %vm473_vm1, %v11259_v24 }
  0xdf   : > { %8694 = vmatmul.mubr.msk.f32.gmra.mrb[18].mxu0 %vm473_vm1, %v11270_v25  ;;  %8744 = vmatmul.mubr.msk.f32.gmra.mrb[18].mxu1 %vm473_vm1, %v11270_v25 }
  0xe0   : > { %8696 = vmatprep.mubr.msk.f32.mxu0 %vm473_vm1, %v11273_v26  ;;  %8746 = vmatprep.mubr.msk.f32.mxu1 %vm473_vm1, %v11273_v26 }
  0xe3   : > { %8697 = vmatmul.mubr.msk.f32.gmra.mrb[20].mxu0 %vm473_vm1, %v11284_v27  ;;  %8747 = vmatmul.mubr.msk.f32.gmra.mrb[20].mxu1 %vm473_vm1, %v11284_v27 }
  0xe4   : > { %8699 = vmatprep.mubr.msk.f32.mxu0 %vm473_vm1, %v11287_v28  ;;  %8749 = vmatprep.mubr.msk.f32.mxu1 %vm473_vm1, %v11287_v28 }
  0xe7   : > { %8700 = vmatmul.mubr.msk.f32.gmra.mrb[22].mxu0 %vm473_vm1, %v11298_v29  ;;  %8750 = vmatmul.mubr.msk.f32.gmra.mrb[22].mxu1 %vm473_vm1, %v11298_v29 }
  0xe8   : > { %8702 = vmatprep.mubr.msk.f32.mxu0 %vm473_vm1, %v11301_v30  ;;  %8752 = vmatprep.mubr.msk.f32.mxu1 %vm473_vm1, %v11301_v30 }
  0xeb   : > { %8703 = vmatmul.mubr.msk.f32.gmra.mrb[24].mxu0 %vm473_vm1, %v11312_v31  ;;  %8753 = vmatmul.mubr.msk.f32.gmra.mrb[24].mxu1 %vm473_vm1, %v11312_v31 }
  0xec   : > { %8705 = vmatprep.mubr.msk.f32.mxu0 %vm473_vm1, %v11315_v32  ;;  %8755 = vmatprep.mubr.msk.f32.mxu1 %vm473_vm1, %v11315_v32 }
  0xef   : > { %8706 = vmatmul.mubr.msk.f32.gmra.mrb[26].mxu0 %vm473_vm1, %v11326_v33  ;;  %8756 = vmatmul.mubr.msk.f32.gmra.mrb[26].mxu1 %vm473_vm1, %v11326_v33 }
  0xf0   : > { %8708 = vmatprep.mubr.msk.f32.mxu0 %vm473_vm1, %v11329_v34  ;;  %8758 = vmatprep.mubr.msk.f32.mxu1 %vm473_vm1, %v11329_v34 }
  0xf3   : > { %8709 = vmatmul.mubr.msk.f32.gmra.mrb[28].mxu0 %vm473_vm1, %v11340_v35  ;;  %8759 = vmatmul.mubr.msk.f32.gmra.mrb[28].mxu1 %vm473_vm1, %v11340_v35 }
  0xf4   : > { %8711 = vmatprep.mubr.msk.f32.mxu0 %vm473_vm1, %v11343_v36  ;;  %8761 = vmatprep.mubr.msk.f32.mxu1 %vm473_vm1, %v11343_v36 }
  0xf7   : > { %8712 = vmatmul.mubr.msk.f32.gmra.mrb[30].mxu0 %vm473_vm1, %v11354_v37  ;;  %8762 = vmatmul.mubr.msk.f32.gmra.mrb[30].mxu1 %vm473_vm1, %v11354_v37 }
  0xf8   : > { %8766 = vmatprep.mubr.msk.f32.mxu0 %vm473_vm1, %v11109_v2  ;;  %8816 = vmatprep.mubr.msk.f32.mxu1 %vm473_vm1, %v11109_v2 }
  0xfb   : > { %8767 = vmatmul.mubr.msk.f32.vlgmr.msra.gmra.mrb[32].mxu0 %vm473_vm1, %v11114_v3  ;;  %8817 = vmatmul.mubr.msk.f32.vlgmr.msra.gmra.mrb[32].mxu1 %vm473_vm1, %v11114_v3 }
  0xfc   : > { %8769 = vmatprep.mubr.msk.f32.mxu0 %vm473_vm1, %v11123_v5  ;;  %8819 = vmatprep.mubr.msk.f32.mxu1 %vm473_vm1, %v11123_v5 }
  0xfd   : > { %8865 = vmatpush3.msk.msra.mxu0 %vm570_vm0, %v11180_v13  ;;  %8915 = vmatpush3.msk.msra.mxu1 %vm570_vm0, %v11219_v18 }
  0xfe   : > { %8964 = vmatprep.subr.msk.mxu0 %vm570_vm0, %v11371_v38  ;;  %9014 = vmatprep.subr.msk.mxu1 %vm570_vm0, %v7928_v39 }
  0xff   : > { %8770 = vmatmul.mubr.msk.f32.gmra.mrb[34].mxu0 %vm473_vm1, %v11136_v6  ;;  %8820 = vmatmul.mubr.msk.f32.gmra.mrb[34].mxu1 %vm473_vm1, %v11136_v6 }
 0x100   : > { %8772 = vmatprep.mubr.msk.f32.mxu0 %vm473_vm1, %v11142_v7  ;;  %8822 = vmatprep.mubr.msk.f32.mxu1 %vm473_vm1, %v11142_v7 }
 0x103   : > { %8773 = vmatmul.mubr.msk.f32.gmra.mrb[36].mxu0 %vm473_vm1, %v11153_v8  ;;  %8823 = vmatmul.mubr.msk.f32.gmra.mrb[36].mxu1 %vm473_vm1, %v11153_v8 }
 0x104   : > { %8775 = vmatprep.mubr.msk.f32.mxu0 %vm473_vm1, %v11156_v9  ;;  %8825 = vmatprep.mubr.msk.f32.mxu1 %vm473_vm1, %v11156_v9 }
 0x107   : > { %8776 = vmatmul.mubr.msk.f32.gmra.mrb[38].mxu0 %vm473_vm1, %v11170_v11  ;;  %8826 = vmatmul.mubr.msk.f32.gmra.mrb[38].mxu1 %vm473_vm1, %v11170_v11 }
 0x108   : > { %8778 = vmatprep.mubr.msk.f32.mxu0 %vm473_vm1, %v11173_v12  ;;  %8828 = vmatprep.mubr.msk.f32.mxu1 %vm473_vm1, %v11173_v12 }
 0x10b   : > { %8779 = vmatmul.mubr.msk.f32.gmra.mrb[40].mxu0 %vm473_vm1, %v11191_v14  ;;  %8829 = vmatmul.mubr.msk.f32.gmra.mrb[40].mxu1 %vm473_vm1, %v11191_v14 }
 0x10c   : > { %8781 = vmatprep.mubr.msk.f32.mxu0 %vm473_vm1, %v11194_v15  ;;  %8831 = vmatprep.mubr.msk.f32.mxu1 %vm473_vm1, %v11194_v15 }
 0x10f   : > { %8782 = vmatmul.mubr.msk.f32.gmra.mrb[42].mxu0 %vm473_vm1, %v11207_v16  ;;  %8832 = vmatmul.mubr.msk.f32.gmra.mrb[42].mxu1 %vm473_vm1, %v11207_v16 }
 0x110   : > { %8784 = vmatprep.mubr.msk.f32.mxu0 %vm473_vm1, %v11210_v17  ;;  %8834 = vmatprep.mubr.msk.f32.mxu1 %vm473_vm1, %v11210_v17 }
 0x113   : > { %8785 = vmatmul.mubr.msk.f32.gmra.mrb[44].mxu0 %vm473_vm1, %v11226_v19  ;;  %8835 = vmatmul.mubr.msk.f32.gmra.mrb[44].mxu1 %vm473_vm1, %v11226_v19 }
 0x114   : > { %8787 = vmatprep.mubr.msk.f32.mxu0 %vm473_vm1, %v11229_v20  ;;  %8837 = vmatprep.mubr.msk.f32.mxu1 %vm473_vm1, %v11229_v20 }
 0x117   : > { %8788 = vmatmul.mubr.msk.f32.gmra.mrb[46].mxu0 %vm473_vm1, %v11242_v21  ;;  %8838 = vmatmul.mubr.msk.f32.gmra.mrb[46].mxu1 %vm473_vm1, %v11242_v21 }
 0x118   : > { %8790 = vmatprep.mubr.msk.f32.mxu0 %vm473_vm1, %v11245_v22  ;;  %8840 = vmatprep.mubr.msk.f32.mxu1 %vm473_vm1, %v11245_v22 }
 0x11b   : > { %8791 = vmatmul.mubr.msk.f32.gmra.mrb[48].mxu0 %vm473_vm1, %v11256_v23  ;;  %8841 = vmatmul.mubr.msk.f32.gmra.mrb[48].mxu1 %vm473_vm1, %v11256_v23 }
 0x11c   : > { %8793 = vmatprep.mubr.msk.f32.mxu0 %vm473_vm1, %v11259_v24  ;;  %8843 = vmatprep.mubr.msk.f32.mxu1 %vm473_vm1, %v11259_v24 }
 0x11f   : > { %8794 = vmatmul.mubr.msk.f32.gmra.mrb[50].mxu0 %vm473_vm1, %v11270_v25  ;;  %8844 = vmatmul.mubr.msk.f32.gmra.mrb[50].mxu1 %vm473_vm1, %v11270_v25 }
 0x120   : > { %8796 = vmatprep.mubr.msk.f32.mxu0 %vm473_vm1, %v11273_v26  ;;  %8846 = vmatprep.mubr.msk.f32.mxu1 %vm473_vm1, %v11273_v26 }
 0x123   : > { %8797 = vmatmul.mubr.msk.f32.gmra.mrb[52].mxu0 %vm473_vm1, %v11284_v27  ;;  %8847 = vmatmul.mubr.msk.f32.gmra.mrb[52].mxu1 %vm473_vm1, %v11284_v27 }
 0x124   : > { %8799 = vmatprep.mubr.msk.f32.mxu0 %vm473_vm1, %v11287_v28  ;;  %8849 = vmatprep.mubr.msk.f32.mxu1 %vm473_vm1, %v11287_v28 }
 0x127   : > { %8800 = vmatmul.mubr.msk.f32.gmra.mrb[54].mxu0 %vm473_vm1, %v11298_v29  ;;  %8850 = vmatmul.mubr.msk.f32.gmra.mrb[54].mxu1 %vm473_vm1, %v11298_v29 }
 0x128   : > { %8802 = vmatprep.mubr.msk.f32.mxu0 %vm473_vm1, %v11301_v30  ;;  %8852 = vmatprep.mubr.msk.f32.mxu1 %vm473_vm1, %v11301_v30 }
 0x12b   : > { %8803 = vmatmul.mubr.msk.f32.gmra.mrb[56].mxu0 %vm473_vm1, %v11312_v31  ;;  %8853 = vmatmul.mubr.msk.f32.gmra.mrb[56].mxu1 %vm473_vm1, %v11312_v31 }
 0x12c   : > { %8805 = vmatprep.mubr.msk.f32.mxu0 %vm473_vm1, %v11315_v32  ;;  %8855 = vmatprep.mubr.msk.f32.mxu1 %vm473_vm1, %v11315_v32 }
 0x12f   : > { %8806 = vmatmul.mubr.msk.f32.gmra.mrb[58].mxu0 %vm473_vm1, %v11326_v33  ;;  %8856 = vmatmul.mubr.msk.f32.gmra.mrb[58].mxu1 %vm473_vm1, %v11326_v33 }
 0x130   : > { %8808 = vmatprep.mubr.msk.f32.mxu0 %vm473_vm1, %v11329_v34  ;;  %8858 = vmatprep.mubr.msk.f32.mxu1 %vm473_vm1, %v11329_v34 }
 0x133   : > { %8809 = vmatmul.mubr.msk.f32.gmra.mrb[60].mxu0 %vm473_vm1, %v11340_v35  ;;  %8859 = vmatmul.mubr.msk.f32.gmra.mrb[60].mxu1 %vm473_vm1, %v11340_v35 }
 0x134   : > { %8811 = vmatprep.mubr.msk.f32.mxu0 %vm473_vm1, %v11343_v36  ;;  %8861 = vmatprep.mubr.msk.f32.mxu1 %vm473_vm1, %v11343_v36 }
 0x137   : > { %8812 = vmatmul.mubr.msk.f32.gmra.mrb[62].mxu0 %vm473_vm1, %v11354_v37  ;;  %8862 = vmatmul.mubr.msk.f32.gmra.mrb[62].mxu1 %vm473_vm1, %v11354_v37 }
 0x138   : > { %8866 = vmatprep.mubr.msk.f32.mxu0 %vm473_vm1, %v11109_v2  ;;  %8916 = vmatprep.mubr.msk.f32.mxu1 %vm473_vm1, %v11109_v2 }
 0x13b   : > { %8867 = vmatmul.mubr.msk.f32.vlgmr.msra.gmra.mrb[64].mxu0 %vm473_vm1, %v11114_v3  ;;  %8917 = vmatmul.mubr.msk.f32.vlgmr.msra.gmra.mrb[64].mxu1 %vm473_vm1, %v11114_v3 }
 0x13c   : > { %8869 = vmatprep.mubr.msk.f32.mxu0 %vm473_vm1, %v11123_v5  ;;  %8965 = vmatpush3.msk.msra.mxu0 %vm570_vm0, %v11371_v38 }
 0x13d   : > { %9015 = vmatpush3.msk.msra.mxu1 %vm570_vm0, %v7928_v39  ;;  %8919 = vmatprep.mubr.msk.f32.mxu1 %vm473_vm1, %v11123_v5 }
 0x13e   : > { %9064 = vmatprep.subr.msk.mxu0 %vm570_vm0, %v11514_v40  ;;  %9457 = vmatprep.subr.bf16.mxu1 %v13545_v41 }
 0x13f   : > { %8870 = vmatmul.mubr.msk.f32.gmra.mrb[66].mxu0 %vm473_vm1, %v11136_v6  ;;  %8920 = vmatmul.mubr.msk.f32.gmra.mrb[66].mxu1 %vm473_vm1, %v11136_v6 }
 0x140   : > { %8872 = vmatprep.mubr.msk.f32.mxu0 %vm473_vm1, %v11142_v7  ;;  %8922 = vmatprep.mubr.msk.f32.mxu1 %vm473_vm1, %v11142_v7 }
 0x143   : > { %8873 = vmatmul.mubr.msk.f32.gmra.mrb[68].mxu0 %vm473_vm1, %v11153_v8  ;;  %8923 = vmatmul.mubr.msk.f32.gmra.mrb[68].mxu1 %vm473_vm1, %v11153_v8 }
 0x144   : > { %8875 = vmatprep.mubr.msk.f32.mxu0 %vm473_vm1, %v11156_v9  ;;  %8925 = vmatprep.mubr.msk.f32.mxu1 %vm473_vm1, %v11156_v9 }
 0x147   : > { %8876 = vmatmul.mubr.msk.f32.gmra.mrb[70].mxu0 %vm473_vm1, %v11170_v11  ;;  %8926 = vmatmul.mubr.msk.f32.gmra.mrb[70].mxu1 %vm473_vm1, %v11170_v11 }
 0x148   : > { %8878 = vmatprep.mubr.msk.f32.mxu0 %vm473_vm1, %v11173_v12  ;;  %8928 = vmatprep.mubr.msk.f32.mxu1 %vm473_vm1, %v11173_v12 }
 0x14b   : > { %8879 = vmatmul.mubr.msk.f32.gmra.mrb[72].mxu0 %vm473_vm1, %v11191_v14  ;;  %8929 = vmatmul.mubr.msk.f32.gmra.mrb[72].mxu1 %vm473_vm1, %v11191_v14 }
 0x14c   : > { %8881 = vmatprep.mubr.msk.f32.mxu0 %vm473_vm1, %v11194_v15  ;;  %8931 = vmatprep.mubr.msk.f32.mxu1 %vm473_vm1, %v11194_v15 }
 0x14f   : > { %8882 = vmatmul.mubr.msk.f32.gmra.mrb[74].mxu0 %vm473_vm1, %v11207_v16  ;;  %8932 = vmatmul.mubr.msk.f32.gmra.mrb[74].mxu1 %vm473_vm1, %v11207_v16 }
 0x150   : > { %8884 = vmatprep.mubr.msk.f32.mxu0 %vm473_vm1, %v11210_v17  ;;  %8934 = vmatprep.mubr.msk.f32.mxu1 %vm473_vm1, %v11210_v17 }
 0x153   : > { %8885 = vmatmul.mubr.msk.f32.gmra.mrb[76].mxu0 %vm473_vm1, %v11226_v19  ;;  %8935 = vmatmul.mubr.msk.f32.gmra.mrb[76].mxu1 %vm473_vm1, %v11226_v19 }
 0x154   : > { %8887 = vmatprep.mubr.msk.f32.mxu0 %vm473_vm1, %v11229_v20  ;;  %8937 = vmatprep.mubr.msk.f32.mxu1 %vm473_vm1, %v11229_v20 }
 0x157   : > { %8888 = vmatmul.mubr.msk.f32.gmra.mrb[78].mxu0 %vm473_vm1, %v11242_v21  ;;  %8938 = vmatmul.mubr.msk.f32.gmra.mrb[78].mxu1 %vm473_vm1, %v11242_v21 }
 0x158   : > { %8890 = vmatprep.mubr.msk.f32.mxu0 %vm473_vm1, %v11245_v22  ;;  %8940 = vmatprep.mubr.msk.f32.mxu1 %vm473_vm1, %v11245_v22 }
 0x15b   : > { %8891 = vmatmul.mubr.msk.f32.gmra.mrb[80].mxu0 %vm473_vm1, %v11256_v23  ;;  %8941 = vmatmul.mubr.msk.f32.gmra.mrb[80].mxu1 %vm473_vm1, %v11256_v23 }
 0x15c   : > { %8893 = vmatprep.mubr.msk.f32.mxu0 %vm473_vm1, %v11259_v24  ;;  %8943 = vmatprep.mubr.msk.f32.mxu1 %vm473_vm1, %v11259_v24 }
 0x15f   : > { %8894 = vmatmul.mubr.msk.f32.gmra.mrb[82].mxu0 %vm473_vm1, %v11270_v25  ;;  %8944 = vmatmul.mubr.msk.f32.gmra.mrb[82].mxu1 %vm473_vm1, %v11270_v25 }
 0x160   : > { %8896 = vmatprep.mubr.msk.f32.mxu0 %vm473_vm1, %v11273_v26  ;;  %8946 = vmatprep.mubr.msk.f32.mxu1 %vm473_vm1, %v11273_v26 }
 0x163   : > { %8897 = vmatmul.mubr.msk.f32.gmra.mrb[84].mxu0 %vm473_vm1, %v11284_v27  ;;  %8947 = vmatmul.mubr.msk.f32.gmra.mrb[84].mxu1 %vm473_vm1, %v11284_v27 }
 0x164   : > { %8899 = vmatprep.mubr.msk.f32.mxu0 %vm473_vm1, %v11287_v28  ;;  %8949 = vmatprep.mubr.msk.f32.mxu1 %vm473_vm1, %v11287_v28 }
 0x167   : > { %8900 = vmatmul.mubr.msk.f32.gmra.mrb[86].mxu0 %vm473_vm1, %v11298_v29  ;;  %8950 = vmatmul.mubr.msk.f32.gmra.mrb[86].mxu1 %vm473_vm1, %v11298_v29 }
 0x168   : > { %8902 = vmatprep.mubr.msk.f32.mxu0 %vm473_vm1, %v11301_v30  ;;  %8952 = vmatprep.mubr.msk.f32.mxu1 %vm473_vm1, %v11301_v30 }
 0x16b   : > { %8903 = vmatmul.mubr.msk.f32.gmra.mrb[88].mxu0 %vm473_vm1, %v11312_v31  ;;  %8953 = vmatmul.mubr.msk.f32.gmra.mrb[88].mxu1 %vm473_vm1, %v11312_v31 }
 0x16c   : > { %8905 = vmatprep.mubr.msk.f32.mxu0 %vm473_vm1, %v11315_v32  ;;  %8955 = vmatprep.mubr.msk.f32.mxu1 %vm473_vm1, %v11315_v32 }
 0x16f   : > { %8906 = vmatmul.mubr.msk.f32.gmra.mrb[90].mxu0 %vm473_vm1, %v11326_v33  ;;  %8956 = vmatmul.mubr.msk.f32.gmra.mrb[90].mxu1 %vm473_vm1, %v11326_v33 }
 0x170   : > { %8908 = vmatprep.mubr.msk.f32.mxu0 %vm473_vm1, %v11329_v34  ;;  %8958 = vmatprep.mubr.msk.f32.mxu1 %vm473_vm1, %v11329_v34 }
 0x173   : > { %8909 = vmatmul.mubr.msk.f32.gmra.mrb[92].mxu0 %vm473_vm1, %v11340_v35  ;;  %8959 = vmatmul.mubr.msk.f32.gmra.mrb[92].mxu1 %vm473_vm1, %v11340_v35 }
 0x174   : > { %8911 = vmatprep.mubr.msk.f32.mxu0 %vm473_vm1, %v11343_v36  ;;  %8961 = vmatprep.mubr.msk.f32.mxu1 %vm473_vm1, %v11343_v36 }
 0x177   : > { %8912 = vmatmul.mubr.msk.f32.gmra.mrb[94].mxu0 %vm473_vm1, %v11354_v37  ;;  %8962 = vmatmul.mubr.msk.f32.gmra.mrb[94].mxu1 %vm473_vm1, %v11354_v37 }
 0x178   : > { %8966 = vmatprep.mubr.msk.f32.mxu0 %vm473_vm1, %v11109_v2  ;;  %9016 = vmatprep.mubr.msk.f32.mxu1 %vm473_vm1, %v11109_v2 }
 0x17b   : > { %8967 = vmatmul.mubr.msk.f32.vlgmr.msra.gmra.mrb[96].mxu0 %vm473_vm1, %v11114_v3  ;;  %9017 = vmatmul.mubr.msk.f32.vlgmr.msra.gmra.mrb[96].mxu1 %vm473_vm1, %v11114_v3 }
 0x17c   : > { %8969 = vmatprep.mubr.msk.f32.mxu0 %vm473_vm1, %v11123_v5  ;;  %9065 = vmatpush3.msk.msra.mxu0 %vm570_vm0, %v11514_v40 }
 0x17d   : > { %9313 = vmatprep.subr.bf16.mxu0 %v13545_v41  ;;  %9019 = vmatprep.mubr.msk.f32.mxu1 %vm473_vm1, %v11123_v5 }
 0x17f   : > { %8970 = vmatmul.mubr.msk.f32.gmra.mrb[98].mxu0 %vm473_vm1, %v11136_v6  ;;  %9020 = vmatmul.mubr.msk.f32.gmra.mrb[98].mxu1 %vm473_vm1, %v11136_v6 }
 0x180   : > { %8972 = vmatprep.mubr.msk.f32.mxu0 %vm473_vm1, %v11142_v7  ;;  %9022 = vmatprep.mubr.msk.f32.mxu1 %vm473_vm1, %v11142_v7 }
 0x183   : > { %8973 = vmatmul.mubr.msk.f32.gmra.mrb[100].mxu0 %vm473_vm1, %v11153_v8  ;;  %9023 = vmatmul.mubr.msk.f32.gmra.mrb[100].mxu1 %vm473_vm1, %v11153_v8 }
 0x184   : > { %8975 = vmatprep.mubr.msk.f32.mxu0 %vm473_vm1, %v11156_v9  ;;  %9025 = vmatprep.mubr.msk.f32.mxu1 %vm473_vm1, %v11156_v9 }
 0x187   : > { %8976 = vmatmul.mubr.msk.f32.gmra.mrb[102].mxu0 %vm473_vm1, %v11170_v11  ;;  %9026 = vmatmul.mubr.msk.f32.gmra.mrb[102].mxu1 %vm473_vm1, %v11170_v11 }
 0x188   : > { %8978 = vmatprep.mubr.msk.f32.mxu0 %vm473_vm1, %v11173_v12  ;;  %9028 = vmatprep.mubr.msk.f32.mxu1 %vm473_vm1, %v11173_v12 }
 0x18b   : > { %8979 = vmatmul.mubr.msk.f32.gmra.mrb[104].mxu0 %vm473_vm1, %v11191_v14  ;;  %9029 = vmatmul.mubr.msk.f32.gmra.mrb[104].mxu1 %vm473_vm1, %v11191_v14 }
 0x18c   : > { %8981 = vmatprep.mubr.msk.f32.mxu0 %vm473_vm1, %v11194_v15  ;;  %9031 = vmatprep.mubr.msk.f32.mxu1 %vm473_vm1, %v11194_v15 }
 0x18e   : > { %v11689_v42 = vpop.f32.mrb[0].mxu0  ;;  %v11691_v43 = vpop.f32.mrb[0].mxu1 }
 0x18f   : > { %13624 = vst [vmem:[#allocation25_spill] sm:$0xff] %v11691_v43  ;;  %v11693_v44 = vpop.f32.mrb[1].mxu0  ;;  %v11695_v45 = vpop.f32.mrb[1].mxu1  ;;  %8982 = vmatmul.mubr.msk.f32.gmra.mrb[106].mxu0 %vm473_vm1, %v11207_v16  ;;  %9032 = vmatmul.mubr.msk.f32.gmra.mrb[106].mxu1 %vm473_vm1, %v11207_v16 }
 0x190   : > { %13625 = vst [vmem:[#allocation26_spill] sm:$0xff] %v11695_v45  ;;  %8984 = vmatprep.mubr.msk.f32.mxu0 %vm473_vm1, %v11210_v17  ;;  %9034 = vmatprep.mubr.msk.f32.mxu1 %vm473_vm1, %v11210_v17 }
 0x192   : > { %v11709_v48 = vpop.f32.mrb[2].mxu0  ;;  %v11711_v49 = vpop.f32.mrb[2].mxu1 }
 0x193   : > { %13626 = vst [vmem:[#allocation27_spill] sm:$0xff] %v11711_v49  ;;  %v11713_v50 = vpop.f32.mrb[3].mxu0  ;;  %v11715_v51 = vpop.f32.mrb[3].mxu1  ;;  %8985 = vmatmul.mubr.msk.f32.gmra.mrb[108].mxu0 %vm473_vm1, %v11226_v19  ;;  %9035 = vmatmul.mubr.msk.f32.gmra.mrb[108].mxu1 %vm473_vm1, %v11226_v19 }
 0x194   : > { %13627 = vst [vmem:[#allocation28_spill] sm:$0xff] %v11715_v51  ;;  %8987 = vmatprep.mubr.msk.f32.mxu0 %vm473_vm1, %v11229_v20  ;;  %9037 = vmatprep.mubr.msk.f32.mxu1 %vm473_vm1, %v11229_v20 }
 0x196   : > { %v11729_v54 = vpop.f32.mrb[4].mxu0  ;;  %v11731_v55 = vpop.f32.mrb[4].mxu1 }
 0x197   : > { %13628 = vst [vmem:[#allocation29_spill] sm:$0xff] %v11731_v55  ;;  %v11733_v56 = vpop.f32.mrb[5].mxu0  ;;  %v11735_v57 = vpop.f32.mrb[5].mxu1  ;;  %8988 = vmatmul.mubr.msk.f32.gmra.mrb[110].mxu0 %vm473_vm1, %v11242_v21  ;;  %9038 = vmatmul.mubr.msk.f32.gmra.mrb[110].mxu1 %vm473_vm1, %v11242_v21 }
 0x198   : > { %13629 = vst [vmem:[#allocation30_spill] sm:$0xff] %v11735_v57  ;;  %8990 = vmatprep.mubr.msk.f32.mxu0 %vm473_vm1, %v11245_v22  ;;  %9040 = vmatprep.mubr.msk.f32.mxu1 %vm473_vm1, %v11245_v22 }
 0x19a   : > { %v11749_v60 = vpop.f32.mrb[6].mxu0  ;;  %v11751_v61 = vpop.f32.mrb[6].mxu1 }
 0x19b   : > { %13630 = vst [vmem:[#allocation31_spill] sm:$0xff] %v11751_v61  ;;  %v11753_v62 = vpop.f32.mrb[7].mxu0  ;;  %v11755_v63 = vpop.f32.mrb[7].mxu1  ;;  %8991 = vmatmul.mubr.msk.f32.gmra.mrb[112].mxu0 %vm473_vm1, %v11256_v23  ;;  %9041 = vmatmul.mubr.msk.f32.gmra.mrb[112].mxu1 %vm473_vm1, %v11256_v23 }
 0x19c   : > { %13631 = vst [vmem:[#allocation32_spill] sm:$0xff] %v11755_v63  ;;  %8993 = vmatprep.mubr.msk.f32.mxu0 %vm473_vm1, %v11259_v24  ;;  %9043 = vmatprep.mubr.msk.f32.mxu1 %vm473_vm1, %v11259_v24 }
 0x19e   : > { %v11769_v4 = vpop.f32.mrb[8].mxu0  ;;  %v11771_v10 = vpop.f32.mrb[8].mxu1 }
 0x19f   : > { %13632 = vst [vmem:[#allocation33_spill] sm:$0xff] %v11771_v10  ;;  %v11773_v13 = vpop.f32.mrb[9].mxu0  ;;  %v11775_v18 = vpop.f32.mrb[9].mxu1  ;;  %8994 = vmatmul.mubr.msk.f32.gmra.mrb[114].mxu0 %vm473_vm1, %v11270_v25  ;;  %9044 = vmatmul.mubr.msk.f32.gmra.mrb[114].mxu1 %vm473_vm1, %v11270_v25 }
 0x1a0   : > { %13633 = vst [vmem:[#allocation34_spill] sm:$0xff] %v11775_v18  ;;  %8996 = vmatprep.mubr.msk.f32.mxu0 %vm473_vm1, %v11273_v26  ;;  %9046 = vmatprep.mubr.msk.f32.mxu1 %vm473_vm1, %v11273_v26 }
 0x1a2   : > { %v11789_v40 = vpop.f32.mrb[10].mxu0  ;;  %v11791_v1 = vpop.f32.mrb[10].mxu1 }
 0x1a3   : > { %13634 = vst [vmem:[#allocation35_spill] sm:$0xff] %v11791_v1  ;;  %v11793_v59 = vpop.f32.mrb[11].mxu0  ;;  %v11795_v53 = vpop.f32.mrb[11].mxu1  ;;  %8997 = vmatmul.mubr.msk.f32.gmra.mrb[116].mxu0 %vm473_vm1, %v11284_v27  ;;  %9047 = vmatmul.mubr.msk.f32.gmra.mrb[116].mxu1 %vm473_vm1, %v11284_v27 }
 0x1a4   : > { %13635 = vst [vmem:[#allocation36_spill] sm:$0xff] %v11795_v53  ;;  %8999 = vmatprep.mubr.msk.f32.mxu0 %vm473_vm1, %v11287_v28  ;;  %9049 = vmatprep.mubr.msk.f32.mxu1 %vm473_vm1, %v11287_v28 }
 0x1a6   : > { %v11809_v38 = vpop.f32.mrb[12].mxu0  ;;  %v11811_v0 = vpop.f32.mrb[12].mxu1 }
 0x1a7   : > { %13636 = vst [vmem:[#allocation37_spill] sm:$0xff] %v11811_v0  ;;  %v11813_v58 = vpop.f32.mrb[13].mxu0  ;;  %v11815_v52 = vpop.f32.mrb[13].mxu1  ;;  %9000 = vmatmul.mubr.msk.f32.gmra.mrb[118].mxu0 %vm473_vm1, %v11298_v29  ;;  %9050 = vmatmul.mubr.msk.f32.gmra.mrb[118].mxu1 %vm473_vm1, %v11298_v29 }
 0x1a8   : > { %13637 = vst [vmem:[#allocation38_spill] sm:$0xff] %v11815_v52  ;;  %9002 = vmatprep.mubr.msk.f32.mxu0 %vm473_vm1, %v11301_v30  ;;  %9052 = vmatprep.mubr.msk.f32.mxu1 %vm473_vm1, %v11301_v30 }
 0x1aa   : > { %v11829_v41 = vpop.f32.mrb[14].mxu0  ;;  %v11831_v46 = vpop.f32.mrb[14].mxu1 }
 0x1ab   : > { %13638 = vst [vmem:[#allocation39_spill] sm:$0xff] %v11831_v46  ;;  %v11833_v53 = vpop.f32.mrb[15].mxu0  ;;  %v11835_v1 = vpop.f32.mrb[15].mxu1  ;;  %9003 = vmatmul.mubr.msk.f32.gmra.mrb[120].mxu0 %vm473_vm1, %v11312_v31  ;;  %9053 = vmatmul.mubr.msk.f32.gmra.mrb[120].mxu1 %vm473_vm1, %v11312_v31 }
 0x1ac   : > { %13639 = vst [vmem:[#allocation40_spill] sm:$0xff] %v11835_v1  ;;  %9005 = vmatprep.mubr.msk.f32.mxu0 %vm473_vm1, %v11315_v32  ;;  %9055 = vmatprep.mubr.msk.f32.mxu1 %vm473_vm1, %v11315_v32 }
 0x1ae   : > { %v11849_v52 = vpop.f32.mrb[16].mxu0  ;;  %v11851_v0 = vpop.f32.mrb[16].mxu1 }
 0x1af   : > { %13640 = vst [vmem:[#allocation41_spill] sm:$0xff] %v11851_v0  ;;  %v11853_v18 = vpop.f32.mrb[17].mxu0  ;;  %v11855_v10 = vpop.f32.mrb[17].mxu1  ;;  %9006 = vmatmul.mubr.msk.f32.gmra.mrb[122].mxu0 %vm473_vm1, %v11326_v33  ;;  %9056 = vmatmul.mubr.msk.f32.gmra.mrb[122].mxu1 %vm473_vm1, %v11326_v33 }
 0x1b0   : > { %13641 = vst [vmem:[#allocation42_spill] sm:$0xff] %v11855_v10  ;;  %9008 = vmatprep.mubr.msk.f32.mxu0 %vm473_vm1, %v11329_v34  ;;  %9058 = vmatprep.mubr.msk.f32.mxu1 %vm473_vm1, %v11329_v34  ;;  %v2646_v10 = vld [vmem:[#allocation2 + $0x38] sm:$0xff] }
 0x1b2   : > { %v11869_v1 = vpop.f32.mrb[18].mxu0  ;;  %v11871_v46 = vpop.f32.mrb[18].mxu1 }
 0x1b3   : > { %13642 = vst [vmem:[#allocation43_spill] sm:$0xff] %v11871_v46  ;;  %v11873_v63 = vpop.f32.mrb[19].mxu0  ;;  %v11875_v61 = vpop.f32.mrb[19].mxu1  ;;  %9009 = vmatmul.mubr.msk.f32.gmra.mrb[124].mxu0 %vm473_vm1, %v11340_v35  ;;  %9059 = vmatmul.mubr.msk.f32.gmra.mrb[124].mxu1 %vm473_vm1, %v11340_v35 }
 0x1b4   : > { %13643 = vst [vmem:[#allocation44_spill] sm:$0xff] %v11875_v61  ;;  %9011 = vmatprep.mubr.msk.f32.mxu0 %vm473_vm1, %v11343_v36  ;;  %9061 = vmatprep.mubr.msk.f32.mxu1 %vm473_vm1, %v11343_v36 }
 0x1b6   : > { %v11889_v0 = vpop.f32.mrb[20].mxu0  ;;  %v11891_v57 = vpop.f32.mrb[20].mxu1 }
 0x1b7   : > { %13644 = vst [vmem:[#allocation45_spill] sm:$0xff] %v11891_v57  ;;  %v11893_v55 = vpop.f32.mrb[21].mxu0  ;;  %v11895_v51 = vpop.f32.mrb[21].mxu1  ;;  %9012 = vmatmul.mubr.msk.f32.gmra.mrb[126].mxu0 %vm473_vm1, %v11354_v37  ;;  %9062 = vmatmul.mubr.msk.f32.gmra.mrb[126].mxu1 %vm473_vm1, %v11354_v37 }
 0x1b8   : > { %13645 = vst [vmem:[#allocation46_spill] sm:$0xff] %v11895_v51  ;;  %9066 = vmatprep.mubr.msk.f32.mxu0 %vm473_vm1, %v11109_v2  ;;  %3961 = vmatprep.mubr.f32.mxu1 %v2646_v10  ;;  %v13646_v2 = vpack.c.bf16 %v11689_v42, %v11693_v44  ;;  %v13647_v10 = vmov 0.0|0.0  }
 0x1ba   : > { %v11907_v61 = vpop.f32.mrb[22].mxu0  ;;  %v11909_v46 = vpop.f32.mrb[22].mxu1 }
 0x1bb   : > { %v11911_v49 = vpop.f32.mrb[23].mxu0  ;;  %v11913_v45 = vpop.f32.mrb[23].mxu1  ;;  %9067 = vmatmul.mubr.msk.f32.vlgmr.msra.gmra.mrb[128].mxu0 %vm473_vm1, %v11114_v3 }
 0x1bc   : > { %9315 = vmatpush1.bf16.msra.mxu0 %v13646_v2  ;;  %9069 = vmatprep.mubr.msk.f32.mxu0 %vm473_vm1, %v11123_v5  ;;  %v13648_v5 = vpack.c.bf16 %v11709_v48, %v11713_v50 }
 0x1bd   : > { %9316 = vmatprep.subr.bf16.mxu0 %v13647_v10 }
 0x1be   : > { %v11927_v51 = vpop.f32.mrb[24].mxu0  ;;  %v11929_v57 = vpop.f32.mrb[24].mxu1 }
 0x1bf   : > { %v11931_v3 = vpop.f32.mrb[25].mxu0  ;;  %v11933_v43 = vpop.f32.mrb[25].mxu1  ;;  %9070 = vmatmul.mubr.msk.f32.gmra.mrb[130].mxu0 %vm473_vm1, %v11136_v6 }
 0x1c0   : > { %9318 = vmatpush1.bf16.msra.mxu0 %v13648_v5  ;;  %9072 = vmatprep.mubr.msk.f32.mxu0 %vm473_vm1, %v11142_v7  ;;  %v13649_v7 = vpack.c.bf16 %v11729_v54, %v11733_v56 }
 0x1c1   : > { %9319 = vmatprep.subr.bf16.mxu0 %v13647_v10 }
 0x1c2   : > { %v11947_v2 = vpop.f32.mrb[26].mxu0  ;;  %v11949_v39 = vpop.f32.mrb[26].mxu1 }
 0x1c3   : > { %v11951_v6 = vpop.f32.mrb[27].mxu0  ;;  %v11953_v47 = vpop.f32.mrb[27].mxu1  ;;  %9073 = vmatmul.mubr.msk.f32.gmra.mrb[132].mxu0 %vm473_vm1, %v11153_v8 }
 0x1c4   : > { %9321 = vmatpush1.bf16.msra.mxu0 %v13649_v7  ;;  %9075 = vmatprep.mubr.msk.f32.mxu0 %vm473_vm1, %v11156_v9  ;;  %v13650_v9 = vpack.c.bf16 %v11749_v60, %v11753_v62 }
 0x1c5   : > { %9322 = vmatprep.subr.bf16.mxu0 %v13647_v10 }
 0x1c6   : > { %v11967_v5 = vpop.f32.mrb[28].mxu0  ;;  %v11969_v44 = vpop.f32.mrb[28].mxu1 }
 0x1c7   : > { %v11971_v8 = vpop.f32.mrb[29].mxu0  ;;  %v11973_v42 = vpop.f32.mrb[29].mxu1  ;;  %9076 = vmatmul.mubr.msk.f32.gmra.mrb[134].mxu0 %vm473_vm1, %v11170_v11 }
 0x1c8   : > { %9324 = vmatpush1.bf16.msra.mxu0 %v13650_v9  ;;  %9078 = vmatprep.mubr.msk.f32.mxu0 %vm473_vm1, %v11173_v12  ;;  %v13651_v12 = vpack.c.bf16 %v11769_v4, %v11773_v13  ;;  %v13652_v4 = vpack.c.bf16 %v11789_v40, %v11793_v59  ;;  %v2700_v59 = vld [vmem:[#allocation2 + $0x1e8] sm:$0xff] }
 0x1c9   : > { %9325 = vmatprep.subr.bf16.mxu0 %v13647_v10 }
 0x1ca   : > { %v11987_v7 = vpop.f32.mrb[30].mxu0  ;;  %v11989_v50 = vpop.f32.mrb[30].mxu1 }
 0x1cb   : > { %v11991_v11 = vpop.f32.mrb[31].mxu0  ;;  %v11993_v48 = vpop.f32.mrb[31].mxu1  ;;  %9079 = vmatmul.mubr.msk.f32.gmra.mrb[136].mxu0 %vm473_vm1, %v11191_v14 }
 0x1cc   : > { %9327 = vmatpush1.bf16.msra.mxu0 %v13651_v12  ;;  %9081 = vmatprep.mubr.msk.f32.mxu0 %vm473_vm1, %v11194_v15 }
 0x1cd   : > { %9328 = vmatprep.subr.bf16.mxu0 %v13647_v10 }
 0x1ce   : > { %v12007_v9 = vpop.f32.mrb[32].mxu0  ;;  %v8818_v56 = vpop.f32.mrb[32].mxu1 }
 0x1cf   : > { %v12009_v54 = vpop.f32.mrb[33].mxu0  ;;  %v1330_v14 = vpop.f32.mrb[33].mxu1  ;;  %9082 = vmatmul.mubr.msk.f32.gmra.mrb[138].mxu0 %vm473_vm1, %v11207_v16 }
 0x1d0   : > { %v9458_v60 = vpack.c.bf16 %v8818_v56, %v1330_v14  ;;  %9330 = vmatpush1.bf16.msra.mxu0 %v13652_v4  ;;  %9084 = vmatprep.mubr.msk.f32.mxu0 %vm473_vm1, %v11210_v17  ;;  %v13653_v17 = vpack.c.bf16 %v11809_v38, %v11813_v58 }
 0x1d1   : > { %9331 = vmatprep.subr.bf16.mxu0 %v13647_v10 }
 0x1d2   : > { %v12021_v15 = vpop.f32.mrb[34].mxu0  ;;  %v8821_v13 = vpop.f32.mrb[34].mxu1  ;;  %9459 = vmatpush1.bf16.msra.mxu1 %v9458_v60 }
 0x1d3   : > { %v12023_v12 = vpop.f32.mrb[35].mxu0  ;;  %v1340_v16 = vpop.f32.mrb[35].mxu1  ;;  %9085 = vmatmul.mubr.msk.f32.gmra.mrb[140].mxu0 %vm473_vm1, %v11226_v19  ;;  %9460 = vmatprep.subr.bf16.mxu1 %v13647_v10 }
 0x1d4   : > { %v9461_v40 = vpack.c.bf16 %v8821_v13, %v1340_v16  ;;  %9333 = vmatpush1.bf16.msra.mxu0 %v13653_v17  ;;  %9087 = vmatprep.mubr.msk.f32.mxu0 %vm473_vm1, %v11229_v20  ;;  %v13654_v20 = vpack.c.bf16 %v11829_v41, %v11833_v53 }
 0x1d5   : > { %9334 = vmatprep.subr.bf16.mxu0 %v13647_v10 }
 0x1d6   : > { %v12036_v56 = vpop.f32.mrb[36].mxu0  ;;  %v8824_v60 = vpop.f32.mrb[36].mxu1  ;;  %9462 = vmatpush1.bf16.msra.mxu1 %v9461_v40 }
 0x1d7   : > { %v12038_v19 = vpop.f32.mrb[37].mxu0  ;;  %v1350_v14 = vpop.f32.mrb[37].mxu1  ;;  %9088 = vmatmul.mubr.msk.f32.gmra.mrb[142].mxu0 %vm473_vm1, %v11242_v21  ;;  %9463 = vmatprep.subr.bf16.mxu1 %v13647_v10 }
 0x1d8   : > { %v9464_v38 = vpack.c.bf16 %v8824_v60, %v1350_v14  ;;  %9336 = vmatpush1.bf16.msra.mxu0 %v13654_v20  ;;  %9090 = vmatprep.mubr.msk.f32.mxu0 %vm473_vm1, %v11245_v22  ;;  %v13655_v22 = vpack.c.bf16 %v11849_v52, %v11853_v18 }
 0x1d9   : > { %9337 = vmatprep.subr.bf16.mxu0 %v13647_v10 }
 0x1da   : > { %v12051_v4 = vpop.f32.mrb[38].mxu0  ;;  %v8827_v13 = vpop.f32.mrb[38].mxu1  ;;  %9465 = vmatpush1.bf16.msra.mxu1 %v9464_v38 }
 0x1db   : > { %v12053_v21 = vpop.f32.mrb[39].mxu0  ;;  %v1360_v16 = vpop.f32.mrb[39].mxu1  ;;  %9091 = vmatmul.mubr.msk.f32.gmra.mrb[144].mxu0 %vm473_vm1, %v11256_v23  ;;  %9466 = vmatprep.subr.bf16.mxu1 %v13647_v10 }
 0x1dc   : > { %v9467_v53 = vpack.c.bf16 %v8827_v13, %v1360_v16  ;;  %9339 = vmatpush1.bf16.msra.mxu0 %v13655_v22  ;;  %9093 = vmatprep.mubr.msk.f32.mxu0 %vm473_vm1, %v11259_v24  ;;  %v13656_v24 = vpack.c.bf16 %v11869_v1, %v11873_v63  ;;  %v2663_v63 = vld [vmem:[#allocation2 + $0xc0] sm:$0xff] }
 0x1dd   : > { %9340 = vmatprep.subr.bf16.mxu0 %v13647_v10 }
 0x1de   : > { %v12066_v40 = vpop.f32.mrb[40].mxu0  ;;  %v8830_v17 = vpop.f32.mrb[40].mxu1  ;;  %9468 = vmatpush1.bf16.msra.mxu1 %v9467_v53 }
 0x1df   : > { %v12068_v23 = vpop.f32.mrb[41].mxu0  ;;  %v1370_v60 = vpop.f32.mrb[41].mxu1  ;;  %9094 = vmatmul.mubr.msk.f32.gmra.mrb[146].mxu0 %vm473_vm1, %v11270_v25  ;;  %9469 = vmatprep.subr.bf16.mxu1 %v13647_v10 }
 0x1e0   : > { %v9470_v18 = vpack.c.bf16 %v8830_v17, %v1370_v60  ;;  %9342 = vmatpush1.bf16.msra.mxu0 %v13656_v24  ;;  %9096 = vmatprep.mubr.msk.f32.mxu0 %vm473_vm1, %v11273_v26  ;;  %v13657_v26 = vpack.c.bf16 %v11889_v0, %v11893_v55  ;;  %v2766_v55 = vld [vmem:[#allocation2 + $0x3f8] sm:$0xff] }
 0x1e1   : > { %9343 = vmatprep.subr.bf16.mxu0 %v13647_v10 }
 0x1e2   : > { %v12081_v14 = vpop.f32.mrb[42].mxu0  ;;  %v8833_v38 = vpop.f32.mrb[42].mxu1  ;;  %9471 = vmatpush1.bf16.msra.mxu1 %v9470_v18 }
 0x1e3   : > { %v12083_v25 = vpop.f32.mrb[43].mxu0  ;;  %v1380_v20 = vpop.f32.mrb[43].mxu1  ;;  %9097 = vmatmul.mubr.msk.f32.gmra.mrb[148].mxu0 %vm473_vm1, %v11284_v27  ;;  %9472 = vmatprep.subr.bf16.mxu1 %v13647_v10 }
 0x1e4   : > { %v9473_v1 = vpack.c.bf16 %v8833_v38, %v1380_v20  ;;  %9345 = vmatpush1.bf16.msra.mxu0 %v13657_v26  ;;  %9099 = vmatprep.mubr.msk.f32.mxu0 %vm473_vm1, %v11287_v28  ;;  %v13658_v28 = vpack.c.bf16 %v11907_v61, %v11911_v49 }
 0x1e5   : > { %9346 = vmatprep.subr.bf16.mxu0 %v13647_v10 }
 0x1e6   : > { %v12096_v13 = vpop.f32.mrb[44].mxu0  ;;  %v8836_v16 = vpop.f32.mrb[44].mxu1  ;;  %9474 = vmatpush1.bf16.msra.mxu1 %v9473_v1 }
 0x1e7   : > { %v12098_v27 = vpop.f32.mrb[45].mxu0  ;;  %v1390_v53 = vpop.f32.mrb[45].mxu1  ;;  %9100 = vmatmul.mubr.msk.f32.gmra.mrb[150].mxu0 %vm473_vm1, %v11298_v29  ;;  %9475 = vmatprep.subr.bf16.mxu1 %v13647_v10 }
 0x1e8   : > { %v9476_v0 = vpack.c.bf16 %v8836_v16, %v1390_v53  ;;  %9348 = vmatpush1.bf16.msra.mxu0 %v13658_v28  ;;  %9102 = vmatprep.mubr.msk.f32.mxu0 %vm473_vm1, %v11301_v30  ;;  %v13659_v30 = vpack.c.bf16 %v11927_v51, %v11931_v3  ;;  %v2640_v16 = vld [vmem:[#allocation2 + $0x8] sm:$0xff]  ;;  %v2645_v51 = vld [vmem:[#allocation2 + $0x30] sm:$0xff] }
 0x1e9   : > { %9349 = vmatprep.subr.bf16.mxu0 %v13647_v10 }
 0x1ea   : > { %v12111_v22 = vpop.f32.mrb[46].mxu0  ;;  %v8839_v17 = vpop.f32.mrb[46].mxu1  ;;  %9477 = vmatpush1.bf16.msra.mxu1 %v9476_v0 }
 0x1eb   : > { %v12113_v29 = vpop.f32.mrb[47].mxu0  ;;  %v1400_v60 = vpop.f32.mrb[47].mxu1  ;;  %9103 = vmatmul.mubr.msk.f32.gmra.mrb[152].mxu0 %vm473_vm1, %v11312_v31  ;;  %9478 = vmatprep.subr.bf16.mxu1 %v13647_v10 }
 0x1ec   : > { %v9479_v61 = vpack.c.bf16 %v8839_v17, %v1400_v60  ;;  %9351 = vmatpush1.bf16.msra.mxu0 %v13659_v30  ;;  %9105 = vmatprep.mubr.msk.f32.mxu0 %vm473_vm1, %v11315_v32  ;;  %v13660_v32 = vpack.c.bf16 %v11947_v2, %v11951_v6  ;;  %v2639_v17 = vld [vmem:[#allocation2] sm:$0xff]  ;;  %v2658_v60 = vld [vmem:[#allocation2 + $0x98] sm:$0xff] }
 0x1ed   : > { %9352 = vmatprep.subr.bf16.mxu0 %v13647_v10 }
 0x1ee   : > { %v12126_v18 = vpop.f32.mrb[48].mxu0  ;;  %v8842_v24 = vpop.f32.mrb[48].mxu1  ;;  %9480 = vmatpush1.bf16.msra.mxu1 %v9479_v61 }
 0x1ef   : > { %v12128_v31 = vpop.f32.mrb[49].mxu0  ;;  %v1410_v38 = vpop.f32.mrb[49].mxu1  ;;  %9106 = vmatmul.mubr.msk.f32.gmra.mrb[154].mxu0 %vm473_vm1, %v11326_v33  ;;  %9481 = vmatprep.subr.bf16.mxu1 %v13647_v10 }
 0x1f0   : > { %v9482_v3 = vpack.c.bf16 %v8842_v24, %v1410_v38  ;;  %9354 = vmatpush1.bf16.msra.mxu0 %v13660_v32  ;;  %9108 = vmatprep.mubr.msk.f32.mxu0 %vm473_vm1, %v11329_v34  ;;  %v13661_v34 = vpack.c.bf16 %v11967_v5, %v11971_v8 }
 0x1f1   : > { %9355 = vmatprep.subr.bf16.mxu0 %v13647_v10 }
 0x1f2   : > { %v12141_v20 = vpop.f32.mrb[50].mxu0  ;;  %v8845_v1 = vpop.f32.mrb[50].mxu1  ;;  %9483 = vmatpush1.bf16.msra.mxu1 %v9482_v3  ;;  %v13664_v3 = vld [vmem:[#allocation26_spill] sm:$0xff] }
 0x1f3   : > { %v12143_v33 = vpop.f32.mrb[51].mxu0  ;;  %v1420_v26 = vpop.f32.mrb[51].mxu1  ;;  %9109 = vmatmul.mubr.msk.f32.gmra.mrb[156].mxu0 %vm473_vm1, %v11340_v35  ;;  %9484 = vmatprep.subr.bf16.mxu1 %v13647_v10 }
 0x1f4   : > { %v9485_v6 = vpack.c.bf16 %v8845_v1, %v1420_v26  ;;  %9357 = vmatpush1.bf16.msra.mxu0 %v13661_v34  ;;  %9111 = vmatprep.mubr.msk.f32.mxu0 %vm473_vm1, %v11343_v36  ;;  %v13662_v36 = vpack.c.bf16 %v11987_v7, %v11991_v11  ;;  %v13663_v11 = vld [vmem:[#allocation25_spill] sm:$0xff]  ;;  %v2676_v26 = vld [vmem:[#allocation2 + $0x128] sm:$0xff] }
 0x1f5   : > { %9358 = vmatprep.subr.bf16.mxu0 %v13647_v10  ;;  %v13665_v32 = vpack.c.bf16 %v13663_v11, %v13664_v3  ;;  %v2657_v1 = vld [vmem:[#allocation2 + $0x90] sm:$0xff] }
 0x1f6   : > { %v12156_v53 = vpop.f32.mrb[52].mxu0  ;;  %v8848_v0 = vpop.f32.mrb[52].mxu1  ;;  %9486 = vmatpush1.bf16.msra.mxu1 %v9485_v6 }
 0x1f7   : > { %v12158_v35 = vpop.f32.mrb[53].mxu0  ;;  %v1430_v28 = vpop.f32.mrb[53].mxu1  ;;  %9112 = vmatmul.mubr.msk.f32.gmra.mrb[158].mxu0 %vm473_vm1, %v11354_v37  ;;  %9487 = vmatprep.subr.bf16.mxu1 %v13647_v10 }
 0x1f8   : > { %v9488_v8 = vpack.c.bf16 %v8848_v0, %v1430_v28  ;;  %9360 = vmatpush1.bf16.msra.mxu0 %v13662_v36  ;;  %3286 = vmatprep.mubr.f32.mxu0 %v2640_v16  ;;  %v13667_v36 = vld [vmem:[#allocation27_spill] sm:$0xff] }
 0x1f9   : > { %9361 = vmatprep.subr.bf16.mxu0 %v13647_v10 }
 0x1fa   : > { %v12169_v61 = vpop.f32.mrb[54].mxu0  ;;  %v8851_v30 = vpop.f32.mrb[54].mxu1  ;;  %9489 = vmatpush1.bf16.msra.mxu1 %v9488_v8 }
 0x1fb   : > { %v12171_v37 = vpop.f32.mrb[55].mxu0  ;;  %v1440_v24 = vpop.f32.mrb[55].mxu1  ;;  %3287 = vmatmul.mubr.f32.vlgmr.msra.gmra.mrb[160].mxu0 %v2639_v17  ;;  %9490 = vmatprep.subr.bf16.mxu1 %v13647_v10  ;;  %v13668_v17 = vld [vmem:[#allocation28_spill] sm:$0xff] }
 0x1fc   : > { %v9491_v7 = vpack.c.bf16 %v8851_v30, %v1440_v24  ;;  %9363 = vmatpush1.bf16.msra.mxu0 %v13665_v32  ;;  %3291 = vmatprep.mubr.f32.mxu0 %v2658_v60  ;;  %v13669_v60 = vpack.c.bf16 %v13667_v36, %v13668_v17  ;;  %v2675_v30 = vld [vmem:[#allocation2 + $0x120] sm:$0xff]  ;;  %v2694_v24 = vld [vmem:[#allocation2 + $0x1b8] sm:$0xff]  ;;  %v2693_v17 = vld [vmem:[#allocation2 + $0x1b0] sm:$0xff] }
 0x1fd   : > { %9364 = vmatprep.subr.bf16.mxu0 %v13647_v10 }
 0x1fe   : > { %v12180_v6 = vpop.f32.mrb[56].mxu0  ;;  %v8854_v34 = vpop.f32.mrb[56].mxu1  ;;  %9492 = vmatpush1.bf16.msra.mxu1 %v9491_v7 }
 0x1ff   : > { %v12182_v16 = vpop.f32.mrb[57].mxu0  ;;  %v1450_v0 = vpop.f32.mrb[57].mxu1  ;;  %3292 = vmatmul.mubr.f32.gmra.mrb[162].mxu0 %v2657_v1  ;;  %9493 = vmatprep.subr.bf16.mxu1 %v13647_v10  ;;  %v2730_v1 = vld [vmem:[#allocation2 + $0x2d8] sm:$0xff] }
 0x200   : > { %13666 = vst [vmem:[#allocation25_spill] sm:$0xff] %v12182_v16  ;;  %v9494_v8 = vpack.c.bf16 %v8854_v34, %v1450_v0  ;;  %9366 = vmatpush1.bf16.msra.mxu0 %v13669_v60  ;;  %3296 = vmatprep.mubr.f32.mxu0 %v2676_v26  ;;  %v13672_v0 = vld [vmem:[#allocation29_spill] sm:$0xff]  ;;  %v13673_v26 = vld [vmem:[#allocation30_spill] sm:$0xff]  ;;  %v2712_v60 = vld [vmem:[#allocation2 + $0x248] sm:$0xff] }
 0x201   : > { %9367 = vmatprep.subr.bf16.mxu0 %v13647_v10  ;;  %v13674_v36 = vpack.c.bf16 %v13672_v0, %v13673_v26  ;;  %v13677_v0 = vld [vmem:[#allocation31_spill] sm:$0xff] }
 0x202   : > { %v12191_v7 = vpop.f32.mrb[58].mxu0  ;;  %v8857_v11 = vpop.f32.mrb[58].mxu1  ;;  %9495 = vmatpush1.bf16.msra.mxu1 %v9494_v8  ;;  %v2772_v16 = vld [vmem:[#allocation2 + $0x428] sm:$0xff] }
 0x203   : > { %13670 = vst [vmem:[#allocation26_spill] sm:$0xff] %v12191_v7  ;;  %v12193_v3 = vpop.f32.mrb[59].mxu0  ;;  %v1460_v32 = vpop.f32.mrb[59].mxu1  ;;  %3297 = vmatmul.mubr.f32.gmra.mrb[164].mxu0 %v2675_v30  ;;  %9496 = vmatprep.subr.bf16.mxu1 %v13647_v10 }
 0x204   : > { %13671 = vst [vmem:[#allocation27_spill] sm:$0xff] %v12193_v3  ;;  %v9497_v34 = vpack.c.bf16 %v8857_v11, %v1460_v32  ;;  %9369 = vmatpush1.bf16.msra.mxu0 %v13674_v36  ;;  %3301 = vmatprep.mubr.f32.mxu0 %v2694_v24  ;;  %v13678_v24 = vld [vmem:[#allocation32_spill] sm:$0xff]  ;;  %v2711_v36 = vld [vmem:[#allocation2 + $0x240] sm:$0xff]  ;;  %v2754_v3 = vld [vmem:[#allocation2 + $0x398] sm:$0xff] }
 0x205   : > { %9370 = vmatprep.subr.bf16.mxu0 %v13647_v10  ;;  %v13679_v26 = vpack.c.bf16 %v13677_v0, %v13678_v24  ;;  %v13682_v0 = vld [vmem:[#allocation33_spill] sm:$0xff]  ;;  %v2748_v11 = vld [vmem:[#allocation2 + $0x368] sm:$0xff] }
 0x206   : > { %v12202_v8 = vpop.f32.mrb[60].mxu0  ;;  %v8860_v28 = vpop.f32.mrb[60].mxu1  ;;  %9498 = vmatpush1.bf16.msra.mxu1 %v9497_v34 }
 0x207   : > { %13675 = vst [vmem:[#allocation28_spill] sm:$0xff] %v12202_v8  ;;  %v12204_v30 = vpop.f32.mrb[61].mxu0  ;;  %v1470_v38 = vpop.f32.mrb[61].mxu1  ;;  %3302 = vmatmul.mubr.f32.gmra.mrb[166].mxu0 %v2693_v17  ;;  %9499 = vmatprep.subr.bf16.mxu1 %v13647_v10 }
 0x208   : > { %13676 = vst [vmem:[#allocation29_spill] sm:$0xff] %v12204_v30  ;;  %v9500_v32 = vpack.c.bf16 %v8860_v28, %v1470_v38  ;;  %9372 = vmatpush1.bf16.msra.mxu0 %v13679_v26  ;;  %3306 = vmatprep.mubr.f32.mxu0 %v2712_v60  ;;  %v13683_v60 = vld [vmem:[#allocation34_spill] sm:$0xff]  ;;  %v2729_v26 = vld [vmem:[#allocation2 + $0x2d0] sm:$0xff]  ;;  %v2664_v38 = vld [vmem:[#allocation2 + $0xc8] sm:$0xff] }
 0x209   : > { %9373 = vmatprep.subr.bf16.mxu0 %v13647_v10  ;;  %v13684_v24 = vpack.c.bf16 %v13682_v0, %v13683_v60  ;;  %v13685_v0 = vld [vmem:[#allocation35_spill] sm:$0xff]  ;;  %v13686_v60 = vld [vmem:[#allocation36_spill] sm:$0xff] }
 0x20a   : > { %v12213_v34 = vpop.f32.mrb[62].mxu0  ;;  %v8863_v5 = vpop.f32.mrb[62].mxu1  ;;  %9501 = vmatpush1.bf16.msra.mxu1 %v9500_v32  ;;  %v2736_v30 = vld [vmem:[#allocation2 + $0x308] sm:$0xff] }
 0x20b   : > { %13680 = vst [vmem:[#allocation30_spill] sm:$0xff] %v12213_v34  ;;  %v12215_v17 = vpop.f32.mrb[63].mxu0  ;;  %v1480_v2 = vpop.f32.mrb[63].mxu1  ;;  %3307 = vmatmul.mubr.f32.gmra.mrb[168].mxu0 %v2711_v36  ;;  %9502 = vmatprep.subr.bf16.mxu1 %v13647_v10 }
 0x20c   : > { %13681 = vst [vmem:[#allocation31_spill] sm:$0xff] %v12215_v17  ;;  %v9503_v28 = vpack.c.bf16 %v8863_v5, %v1480_v2  ;;  %9375 = vmatpush1.bf16.msra.mxu0 %v13684_v24  ;;  %3311 = vmatprep.mubr.f32.mxu0 %v2730_v1  ;;  %v13687_v1 = vpack.c.bf16 %v13685_v0, %v13686_v60  ;;  %v2747_v24 = vld [vmem:[#allocation2 + $0x360] sm:$0xff]  ;;  %v13688_v0 = vld [vmem:[#allocation37_spill] sm:$0xff] }
 0x20d   : > { %9376 = vmatprep.subr.bf16.mxu0 %v13647_v10  ;;  %v13689_v60 = vld [vmem:[#allocation38_spill] sm:$0xff] }
 0x20e   : > { %v8868_v32 = vpop.f32.mrb[64].mxu0  ;;  %9504 = vmatpush1.bf16.msra.mxu1 %v9503_v28  ;;  %v12224_v49 = vpop.f32.mrb[64].mxu1  ;;  %v2765_v28 = vld [vmem:[#allocation2 + $0x3f0] sm:$0xff]  ;;  %v2718_v17 = vld [vmem:[#allocation2 + $0x278] sm:$0xff] }
 0x20f   : > { %v1560_v36 = vpop.f32.mrb[65].mxu0  ;;  %3312 = vmatmul.mubr.f32.gmra.mrb[170].mxu0 %v2729_v26  ;;  %9505 = vmatprep.subr.bf16.mxu1 %v13647_v10  ;;  %v12227_v2 = vpop.f32.mrb[65].mxu1 }
 0x210   : > { %v9506_v5 = vpack.c.bf16 %v8868_v32, %v1560_v36  ;;  %9378 = vmatpush1.bf16.msra.mxu0 %v13687_v1  ;;  %3316 = vmatprep.mubr.f32.mxu0 %v2748_v11  ;;  %v2682_v36 = vld [vmem:[#allocation2 + $0x158] sm:$0xff]  ;;  %v13690_v1 = vpack.c.bf16 %v13688_v0, %v13689_v60 }
 0x211   : > { %3962 = vmatmul.mubr.f32.vlgmr.msra.gmra.mrb[128].mxu1 %v2645_v51  ;;  %9379 = vmatprep.subr.bf16.mxu0 %v13647_v10 }
 0x212   : > { %9507 = vmatpush1.bf16.msra.mxu1 %v9506_v5  ;;  %3966 = vmatprep.mubr.f32.mxu1 %v2664_v38  ;;  %v8871_v26 = vpop.f32.mrb[66].mxu0  ;;  %v12235_v52 = vpop.f32.mrb[66].mxu1  ;;  %v2784_v5 = vld [vmem:[#allocation2 + $0x488] sm:$0xff] }
 0x213   : > { %3317 = vmatmul.mubr.f32.gmra.mrb[172].mxu0 %v2747_v24  ;;  %v1570_v32 = vpop.f32.mrb[67].mxu0  ;;  %9508 = vmatprep.subr.bf16.mxu1 %v13647_v10  ;;  %v12238_v11 = vpop.f32.mrb[67].mxu1  ;;  %v2681_v24 = vld [vmem:[#allocation2 + $0x150] sm:$0xff] }
 0x214   : > { %9381 = vmatpush1.bf16.msra.mxu0 %v13690_v1  ;;  %v9509_v51 = vpack.c.bf16 %v8871_v26, %v1570_v32  ;;  %3321 = vmatprep.mubr.f32.mxu0 %v2766_v55  ;;  %v13691_v26 = vld [vmem:[#allocation39_spill] sm:$0xff]  ;;  %v13692_v32 = vld [vmem:[#allocation40_spill] sm:$0xff] }
 0x215   : > { %3967 = vmatmul.mubr.f32.gmra.mrb[130].mxu1 %v2663_v63  ;;  %9382 = vmatprep.subr.bf16.mxu0 %v13647_v10  ;;  %v13693_v60 = vpack.c.bf16 %v13691_v26, %v13692_v32  ;;  %v2783_v63 = vld [vmem:[#allocation2 + $0x480] sm:$0xff] }
 0x216   : > { %3971 = vmatprep.mubr.f32.mxu1 %v2682_v36  ;;  %9510 = vmatpush1.bf16.msra.mxu1 %v9509_v51  ;;  %v8874_v41 = vpop.f32.mrb[68].mxu0  ;;  %v12246_v58 = vpop.f32.mrb[68].mxu1  ;;  %v2699_v51 = vld [vmem:[#allocation2 + $0x1e0] sm:$0xff] }
 0x217   : > { %3322 = vmatmul.mubr.f32.gmra.mrb[174].mxu0 %v2765_v28  ;;  %v1580_v0 = vpop.f32.mrb[69].mxu0  ;;  %9511 = vmatprep.subr.bf16.mxu1 %v13647_v10  ;;  %v12249_v55 = vpop.f32.mrb[69].mxu1  ;;  %v2802_v28 = vld [vmem:[#allocation2 + $0x518] sm:$0xff] }
 0x218   : > { %9384 = vmatpush1.bf16.msra.mxu0 %v13693_v60  ;;  %3326 = vmatprep.mubr.f32.mxu0 %v2784_v5  ;;  %v9512_v1 = vpack.c.bf16 %v8874_v41, %v1580_v0  ;;  %v13694_v41 = vld [vmem:[#allocation41_spill] sm:$0xff]  ;;  %v13695_v0 = vld [vmem:[#allocation42_spill] sm:$0xff] }
 0x219   : > { %3972 = vmatmul.mubr.f32.gmra.mrb[132].mxu1 %v2681_v24  ;;  %9385 = vmatprep.subr.bf16.mxu0 %v13647_v10  ;;  %v13696_v32 = vpack.c.bf16 %v13694_v41, %v13695_v0  ;;  %v2801_v24 = vld [vmem:[#allocation2 + $0x510] sm:$0xff] }
 0x21a   : > { %3976 = vmatprep.mubr.f32.mxu1 %v2700_v59  ;;  %9513 = vmatpush1.bf16.msra.mxu1 %v9512_v1  ;;  %v8877_v38 = vpop.f32.mrb[70].mxu0  ;;  %v12257_v62 = vpop.f32.mrb[70].mxu1  ;;  %v2717_v1 = vld [vmem:[#allocation2 + $0x270] sm:$0xff] }
 0x21b   : > { %3327 = vmatmul.mubr.f32.gmra.mrb[176].mxu0 %v2783_v63  ;;  %v1590_v26 = vpop.f32.mrb[71].mxu0  ;;  %9514 = vmatprep.subr.bf16.mxu1 %v13647_v10  ;;  %v12260_v5 = vpop.f32.mrb[71].mxu1  ;;  %v2820_v63 = vld [vmem:[#allocation2 + $0x5a8] sm:$0xff] }
 0x21c   : > { %9387 = vmatpush1.bf16.msra.mxu0 %v13696_v32  ;;  %3331 = vmatprep.mubr.f32.mxu0 %v2802_v28  ;;  %v9515_v60 = vpack.c.bf16 %v8877_v38, %v1590_v26  ;;  %v13697_v38 = vld [vmem:[#allocation43_spill] sm:$0xff]  ;;  %v13698_v26 = vld [vmem:[#allocation44_spill] sm:$0xff] }
 0x21d   : > { %3977 = vmatmul.mubr.f32.gmra.mrb[134].mxu1 %v2699_v51  ;;  %9388 = vmatprep.subr.bf16.mxu0 %v13647_v10  ;;  %v13699_v0 = vpack.c.bf16 %v13697_v38, %v13698_v26  ;;  %v2819_v51 = vld [vmem:[#allocation2 + $0x5a0] sm:$0xff] }
 0x21e   : > { %3981 = vmatprep.mubr.f32.mxu1 %v2718_v17  ;;  %9516 = vmatpush1.bf16.msra.mxu1 %v9515_v60  ;;  %v8880_v36 = vpop.f32.mrb[72].mxu0  ;;  %v12268_v34 = vpop.f32.mrb[72].mxu1  ;;  %v2735_v60 = vld [vmem:[#allocation2 + $0x300] sm:$0xff] }
 0x21f   : > { %3332 = vmatmul.mubr.f32.gmra.mrb[178].mxu0 %v2801_v24  ;;  %v1600_v41 = vpop.f32.mrb[73].mxu0  ;;  %9517 = vmatprep.subr.bf16.mxu1 %v13647_v10  ;;  %v12271_v28 = vpop.f32.mrb[73].mxu1  ;;  %v2838_v24 = vld [vmem:[#allocation2 + $0x638] sm:$0xff] }
 0x220   : > { %9390 = vmatpush1.bf16.msra.mxu0 %v13699_v0  ;;  %3336 = vmatprep.mubr.f32.mxu0 %v2820_v63  ;;  %v9518_v32 = vpack.c.bf16 %v8880_v36, %v1600_v41  ;;  %v13700_v36 = vld [vmem:[#allocation45_spill] sm:$0xff]  ;;  %v13701_v41 = vld [vmem:[#allocation46_spill] sm:$0xff] }
 0x221   : > { %3982 = vmatmul.mubr.f32.gmra.mrb[136].mxu1 %v2717_v1  ;;  %9391 = vmatprep.subr.bf16.mxu0 %v13647_v10  ;;  %v13702_v26 = vpack.c.bf16 %v13700_v36, %v13701_v41  ;;  %v2837_v1 = vld [vmem:[#allocation2 + $0x630] sm:$0xff]  ;;  %v2874_v41 = vld [vmem:[#allocation2 + $0x758] sm:$0xff] }
 0x222   : > { %3986 = vmatprep.mubr.f32.mxu1 %v2736_v30  ;;  %9519 = vmatpush1.bf16.msra.mxu1 %v9518_v32  ;;  %v8883_v59 = vpop.f32.mrb[74].mxu0  ;;  %v12279_v8 = vpop.f32.mrb[74].mxu1  ;;  %v2753_v32 = vld [vmem:[#allocation2 + $0x390] sm:$0xff]  ;;  %v2790_v30 = vld [vmem:[#allocation2 + $0x4b8] sm:$0xff] }
 0x223   : > { %3337 = vmatmul.mubr.f32.gmra.mrb[180].mxu0 %v2819_v51  ;;  %v1610_v38 = vpop.f32.mrb[75].mxu0  ;;  %9520 = vmatprep.subr.bf16.mxu1 %v13647_v10  ;;  %v12282_v63 = vpop.f32.mrb[75].mxu1  ;;  %v2856_v51 = vld [vmem:[#allocation2 + $0x6c8] sm:$0xff] }
 0x224   : > { %9393 = vmatpush1.bf16.msra.mxu0 %v13702_v26  ;;  %3341 = vmatprep.mubr.f32.mxu0 %v2838_v24  ;;  %v9521_v0 = vpack.c.bf16 %v8883_v59, %v1610_v38  ;;  %v13703_v59 = vpack.c.bf16 %v11909_v46, %v11913_v45  ;;  %v2771_v26 = vld [vmem:[#allocation2 + $0x420] sm:$0xff] }
 0x225   : > { %3987 = vmatmul.mubr.f32.gmra.mrb[138].mxu1 %v2735_v60  ;;  %9394 = vmatprep.subr.bf16.mxu0 %v13647_v10  ;;  %v2855_v60 = vld [vmem:[#allocation2 + $0x6c0] sm:$0xff] }
 0x226   : > { %3991 = vmatprep.mubr.f32.mxu1 %v2754_v3  ;;  %9522 = vmatpush1.bf16.msra.mxu1 %v9521_v0  ;;  %v8886_v17 = vpop.f32.mrb[76].mxu0  ;;  %v12290_v7 = vpop.f32.mrb[76].mxu1  ;;  %v2808_v3 = vld [vmem:[#allocation2 + $0x548] sm:$0xff] }
 0x227   : > { %3342 = vmatmul.mubr.f32.gmra.mrb[182].mxu0 %v2837_v1  ;;  %v1620_v36 = vpop.f32.mrb[77].mxu0  ;;  %9523 = vmatprep.subr.bf16.mxu1 %v13647_v10  ;;  %v12293_v24 = vpop.f32.mrb[77].mxu1 }
 0x228   : > { %9396 = vmatpush1.bf16.msra.mxu0 %v13703_v59  ;;  %3346 = vmatprep.mubr.f32.mxu0 %v2856_v51  ;;  %v9524_v38 = vpack.c.bf16 %v8886_v17, %v1620_v36  ;;  %v13704_v17 = vpack.c.bf16 %v11929_v57, %v11933_v43  ;;  %v2873_v51 = vld [vmem:[#allocation2 + $0x750] sm:$0xff]  ;;  %v2892_v36 = vld [vmem:[#allocation2 + $0x7e8] sm:$0xff] }
 0x229   : > { %3992 = vmatmul.mubr.f32.gmra.mrb[140].mxu1 %v2753_v32  ;;  %9397 = vmatprep.subr.bf16.mxu0 %v13647_v10  ;;  %v2789_v59 = vld [vmem:[#allocation2 + $0x4b0] sm:$0xff] }
 0x22a   : > { %3996 = vmatprep.mubr.f32.mxu1 %v2772_v16  ;;  %9525 = vmatpush1.bf16.msra.mxu1 %v9524_v38  ;;  %v8889_v1 = vpop.f32.mrb[78].mxu0  ;;  %v12301_v0 = vpop.f32.mrb[78].mxu1  ;;  %v2826_v16 = vld [vmem:[#allocation2 + $0x5d8] sm:$0xff] }
 0x22b   : > { %3347 = vmatmul.mubr.f32.gmra.mrb[184].mxu0 %v2855_v60  ;;  %v1630_v45 = vpop.f32.mrb[79].mxu0  ;;  %9526 = vmatprep.subr.bf16.mxu1 %v13647_v10  ;;  %v12304_v46 = vpop.f32.mrb[79].mxu1 }
 0x22c   : > { %9399 = vmatpush1.bf16.msra.mxu0 %v13704_v17  ;;  %3351 = vmatprep.mubr.f32.mxu0 %v2874_v41  ;;  %v9527_v32 = vpack.c.bf16 %v8889_v1, %v1630_v45  ;;  %v13705_v41 = vpack.c.bf16 %v11949_v39, %v11953_v47  ;;  %v2910_v45 = vld [vmem:[#allocation2 + $0x878] sm:$0xff]  ;;  %v2807_v17 = vld [vmem:[#allocation2 + $0x540] sm:$0xff] }
 0x22d   : > { %3997 = vmatmul.mubr.f32.gmra.mrb[142].mxu1 %v2771_v26  ;;  %9400 = vmatprep.subr.bf16.mxu0 %v13647_v10  ;;  %v2891_v26 = vld [vmem:[#allocation2 + $0x7e0] sm:$0xff] }
 0x22e   : > { %4001 = vmatprep.mubr.f32.mxu1 %v2790_v30  ;;  %9528 = vmatpush1.bf16.msra.mxu1 %v9527_v32  ;;  %v8892_v60 = vpop.f32.mrb[80].mxu0  ;;  %v12312_v38 = vpop.f32.mrb[80].mxu1  ;;  %v2844_v30 = vld [vmem:[#allocation2 + $0x668] sm:$0xff] }
 0x22f   : > { %3352 = vmatmul.mubr.f32.gmra.mrb[186].mxu0 %v2873_v51  ;;  %v1640_v43 = vpop.f32.mrb[81].mxu0  ;;  %9529 = vmatprep.subr.bf16.mxu1 %v13647_v10  ;;  %v12315_v57 = vpop.f32.mrb[81].mxu1 }
 0x230   : > { %9402 = vmatpush1.bf16.msra.mxu0 %v13705_v41  ;;  %3356 = vmatprep.mubr.f32.mxu0 %v2892_v36  ;;  %v9530_v1 = vpack.c.bf16 %v8892_v60, %v1640_v43  ;;  %v13706_v36 = vpack.c.bf16 %v11969_v44, %v11973_v42  ;;  %v2928_v43 = vld [vmem:[#allocation2 + $0x908] sm:$0xff]  ;;  %v2825_v41 = vld [vmem:[#allocation2 + $0x5d0] sm:$0xff] }
 0x231   : > { %4002 = vmatmul.mubr.f32.gmra.mrb[144].mxu1 %v2789_v59  ;;  %9403 = vmatprep.subr.bf16.mxu0 %v13647_v10  ;;  %v2909_v59 = vld [vmem:[#allocation2 + $0x870] sm:$0xff] }
 0x232   : > { %4006 = vmatprep.mubr.f32.mxu1 %v2808_v3  ;;  %9531 = vmatpush1.bf16.msra.mxu1 %v9530_v1  ;;  %v8895_v51 = vpop.f32.mrb[82].mxu0  ;;  %v12323_v32 = vpop.f32.mrb[82].mxu1  ;;  %v2862_v3 = vld [vmem:[#allocation2 + $0x6f8] sm:$0xff] }
 0x233   : > { %3357 = vmatmul.mubr.f32.gmra.mrb[188].mxu0 %v2891_v26  ;;  %v1650_v47 = vpop.f32.mrb[83].mxu0  ;;  %9532 = vmatprep.subr.bf16.mxu1 %v13647_v10  ;;  %v12326_v39 = vpop.f32.mrb[83].mxu1 }
 0x234   : > { %9405 = vmatpush1.bf16.msra.mxu0 %v13706_v36  ;;  %3361 = vmatprep.mubr.f32.mxu0 %v2910_v45  ;;  %v9533_v60 = vpack.c.bf16 %v8895_v51, %v1650_v47  ;;  %v13708_v45 = vpack.c.bf16 %v11989_v50, %v11993_v48  ;;  %v2946_v47 = vld [vmem:[#allocation2 + $0x998] sm:$0xff]  ;;  %v2843_v36 = vld [vmem:[#allocation2 + $0x660] sm:$0xff] }
 0x235   : > { %4007 = vmatmul.mubr.f32.gmra.mrb[146].mxu1 %v2807_v17  ;;  %9406 = vmatprep.subr.bf16.mxu0 %v13647_v10  ;;  %v2927_v17 = vld [vmem:[#allocation2 + $0x900] sm:$0xff] }
 0x236   : > { %4011 = vmatprep.mubr.f32.mxu1 %v2826_v16  ;;  %9534 = vmatpush1.bf16.msra.mxu1 %v9533_v60  ;;  %v8898_v26 = vpop.f32.mrb[84].mxu0  ;;  %v12334_v1 = vpop.f32.mrb[84].mxu1 }
 0x237   : > { %3362 = vmatmul.mubr.f32.gmra.mrb[190].mxu0 %v2909_v59  ;;  %v1660_v42 = vpop.f32.mrb[85].mxu0  ;;  %9535 = vmatprep.subr.bf16.mxu1 %v13647_v10  ;;  %v12337_v44 = vpop.f32.mrb[85].mxu1 }
 0x238   : > { %13707 = vst [vmem:[#allocation32_spill] sm:$0xff] %v12337_v44  ;;  %9408 = vmatpush1.bf16.msra.mxu0 %v13708_v45  ;;  %3366 = vmatprep.mubr.f32.mxu0 %v2928_v43  ;;  %v9536_v51 = vpack.c.bf16 %v8898_v26, %v1660_v42  ;;  %v2945_v43 = vld [vmem:[#allocation2 + $0x990] sm:$0xff] }
 0x239   : > { %4012 = vmatmul.mubr.f32.gmra.mrb[148].mxu1 %v2825_v41  ;;  %9409 = vmatprep.subr.bf16.mxu0 %v13647_v10  ;;  %v2861_v42 = vld [vmem:[#allocation2 + $0x6f0] sm:$0xff] }
 0x23a   : > { %4016 = vmatprep.mubr.f32.mxu1 %v2844_v30  ;;  %9537 = vmatpush1.bf16.msra.mxu1 %v9536_v51  ;;  %v8901_v59 = vpop.f32.mrb[86].mxu0  ;;  %v12345_v60 = vpop.f32.mrb[86].mxu1  ;;  %v2964_v30 = vld [vmem:[#allocation2 + $0xa28] sm:$0xff] }
 0x23b   : > { %13709 = vst [vmem:[#allocation33_spill] sm:$0xff] %v12345_v60  ;;  %3367 = vmatmul.mubr.f32.gmra.mrb[192].mxu0 %v2927_v17  ;;  %v1670_v48 = vpop.f32.mrb[87].mxu0  ;;  %9538 = vmatprep.subr.bf16.mxu1 %v13647_v10  ;;  %v12348_v50 = vpop.f32.mrb[87].mxu1  ;;  %v2880_v17 = vld [vmem:[#allocation2 + $0x788] sm:$0xff] }
 0x23c   : > { %13710 = vst [vmem:[#allocation34_spill] sm:$0xff] %v12348_v50  ;;  %3371 = vmatprep.mubr.f32.mxu0 %v2946_v47  ;;  %v9539_v26 = vpack.c.bf16 %v8901_v59, %v1670_v48  ;;  %v2963_v47 = vld [vmem:[#allocation2 + $0xa20] sm:$0xff] }
 0x23d   : > { %4017 = vmatmul.mubr.f32.gmra.mrb[150].mxu1 %v2843_v36  ;;  %v2879_v48 = vld [vmem:[#allocation2 + $0x780] sm:$0xff] }
 0x23e   : > { %4021 = vmatprep.mubr.f32.mxu1 %v2862_v3  ;;  %9540 = vmatpush1.bf16.msra.mxu1 %v9539_v26  ;;  %v8904_v45 = vpop.f32.mrb[88].mxu0  ;;  %v12352_v51 = vpop.f32.mrb[88].mxu1  ;;  %v2982_v3 = vld [vmem:[#allocation2 + $0xab8] sm:$0xff] }
 0x23f   : > { %13711 = vst [vmem:[#allocation35_spill] sm:$0xff] %v12352_v51  ;;  %3372 = vmatmul.mubr.f32.gmra.mrb[194].mxu0 %v2945_v43  ;;  %v1680_v16 = vpop.f32.mrb[89].mxu0  ;;  %9541 = vmatprep.subr.bf16.mxu1 %v13647_v10  ;;  %v12355_v44 = vpop.f32.mrb[89].mxu1  ;;  %v2898_v43 = vld [vmem:[#allocation2 + $0x818] sm:$0xff] }
 0x240   : > { %13712 = vst [vmem:[#allocation36_spill] sm:$0xff] %v12355_v44  ;;  %3376 = vmatprep.mubr.f32.mxu0 %v2964_v30  ;;  %v9542_v59 = vpack.c.bf16 %v8904_v45, %v1680_v16  ;;  %v2981_v16 = vld [vmem:[#allocation2 + $0xab0] sm:$0xff]  ;;  %v3000_v45 = vld [vmem:[#allocation2 + $0xb48] sm:$0xff] }
 0x241   : > { %4022 = vmatmul.mubr.f32.gmra.mrb[152].mxu1 %v2861_v42 }
 0x242   : > { %4026 = vmatprep.mubr.f32.mxu1 %v2880_v17  ;;  %9543 = vmatpush1.bf16.msra.mxu1 %v9542_v59  ;;  %v8907_v26 = vpop.f32.mrb[90].mxu0  ;;  %v12359_v41 = vpop.f32.mrb[90].mxu1  ;;  %v2897_v17 = vld [vmem:[#allocation2 + $0x810] sm:$0xff] }
 0x243   : > { %13713 = vst [vmem:[#allocation37_spill] sm:$0xff] %v12359_v41  ;;  %3377 = vmatmul.mubr.f32.gmra.mrb[196].mxu0 %v2963_v47  ;;  %v1690_v50 = vpop.f32.mrb[91].mxu0  ;;  %9544 = vmatprep.subr.bf16.mxu1 %v13647_v10  ;;  %v12362_v60 = vpop.f32.mrb[91].mxu1  ;;  %v2916_v47 = vld [vmem:[#allocation2 + $0x8a8] sm:$0xff] }
 0x244   : > { %13714 = vst [vmem:[#allocation38_spill] sm:$0xff] %v12362_v60  ;;  %3381 = vmatprep.mubr.f32.mxu0 %v2982_v3  ;;  %v9545_v30 = vpack.c.bf16 %v8907_v26, %v1690_v50  ;;  %v2999_v50 = vld [vmem:[#allocation2 + $0xb40] sm:$0xff]  ;;  %v3018_v26 = vld [vmem:[#allocation2 + $0xbd8] sm:$0xff] }
 0x245   : > { %4027 = vmatmul.mubr.f32.gmra.mrb[154].mxu1 %v2879_v48 }
 0x246   : > { %4031 = vmatprep.mubr.f32.mxu1 %v2898_v43  ;;  %9546 = vmatpush1.bf16.msra.mxu1 %v9545_v30  ;;  %v8910_v59 = vpop.f32.mrb[92].mxu0  ;;  %v12366_v36 = vpop.f32.mrb[92].mxu1  ;;  %v2915_v43 = vld [vmem:[#allocation2 + $0x8a0] sm:$0xff] }
 0x247   : > { %3382 = vmatmul.mubr.f32.gmra.mrb[198].mxu0 %v2981_v16  ;;  %v1700_v44 = vpop.f32.mrb[93].mxu0  ;;  %9547 = vmatprep.subr.bf16.mxu1 %v13647_v10  ;;  %v12369_v51 = vpop.f32.mrb[93].mxu1  ;;  %v2934_v16 = vld [vmem:[#allocation2 + $0x938] sm:$0xff] }
 0x248   : > { %3386 = vmatprep.mubr.f32.mxu0 %v3000_v45  ;;  %v9548_v3 = vpack.c.bf16 %v8910_v59, %v1700_v44  ;;  %v3017_v44 = vld [vmem:[#allocation2 + $0xbd0] sm:$0xff]  ;;  %v3036_v59 = vld [vmem:[#allocation2 + $0xc68] sm:$0xff] }
 0x249   : > { %4032 = vmatmul.mubr.f32.gmra.mrb[156].mxu1 %v2897_v17 }
 0x24a   : > { %4036 = vmatprep.mubr.f32.mxu1 %v2916_v47  ;;  %9549 = vmatpush1.bf16.msra.mxu1 %v9548_v3  ;;  %v8913_v30 = vpop.f32.mrb[94].mxu0  ;;  %v12373_v42 = vpop.f32.mrb[94].mxu1  ;;  %v2933_v47 = vld [vmem:[#allocation2 + $0x930] sm:$0xff] }
 0x24b   : > { %13715 = vst [vmem:[#allocation39_spill] sm:$0xff] %v12373_v42  ;;  %3387 = vmatmul.mubr.f32.gmra.mrb[200].mxu0 %v2999_v50  ;;  %v1710_v60 = vpop.f32.mrb[95].mxu0  ;;  %9550 = vmatprep.subr.bf16.mxu1 %v13647_v10  ;;  %v12376_v41 = vpop.f32.mrb[95].mxu1  ;;  %v2952_v50 = vld [vmem:[#allocation2 + $0x9c8] sm:$0xff]  ;;  %v2969_v42 = vld [vmem:[#allocation2 + $0xa50] sm:$0xff] }
 0x24c   : > { %13716 = vst [vmem:[#allocation40_spill] sm:$0xff] %v12376_v41  ;;  %3391 = vmatprep.mubr.f32.mxu0 %v3018_v26  ;;  %v9551_v45 = vpack.c.bf16 %v8913_v30, %v1710_v60  ;;  %v3035_v26 = vld [vmem:[#allocation2 + $0xc60] sm:$0xff]  ;;  %v3054_v30 = vld [vmem:[#allocation2 + $0xcf8] sm:$0xff] }
 0x24d   : > { %4037 = vmatmul.mubr.f32.gmra.mrb[158].mxu1 %v2915_v43  ;;  %v2951_v43 = vld [vmem:[#allocation2 + $0x9c0] sm:$0xff] }
 0x24e   : > { %4041 = vmatprep.mubr.f32.mxu1 %v2934_v16  ;;  %9552 = vmatpush1.bf16.msra.mxu1 %v9551_v45  ;;  %v12380_v3 = vpop.f32.mrb[96].mxu1  ;;  %v2970_v45 = vld [vmem:[#allocation2 + $0xa58] sm:$0xff] }
 0x24f   : > { %13717 = vst [vmem:[#allocation41_spill] sm:$0xff] %v12380_v3  ;;  %3392 = vmatmul.mubr.f32.gmra.mrb[202].mxu0 %v3017_v44  ;;  %9553 = vmatprep.subr.bf16.mxu1 %v13647_v10  ;;  %v12383_v48 = vpop.f32.mrb[97].mxu1  ;;  %v3053_v44 = vld [vmem:[#allocation2 + $0xcf0] sm:$0xff]  ;;  %v2987_v3 = vld [vmem:[#allocation2 + $0xae0] sm:$0xff] }
 0x250   : > { %13718 = vst [vmem:[#allocation42_spill] sm:$0xff] %v12383_v48  ;;  %3396 = vmatprep.mubr.f32.mxu0 %v3036_v59  ;;  %v3072_v59 = vld [vmem:[#allocation2 + $0xd88] sm:$0xff] }
 0x251   : > { %4042 = vmatmul.mubr.f32.gmra.mrb[160].mxu1 %v2933_v47  ;;  %v2988_v47 = vld [vmem:[#allocation2 + $0xae8] sm:$0xff] }
 0x252   : > { %4046 = vmatprep.mubr.f32.mxu1 %v2952_v50  ;;  %v12387_v16 = vpop.f32.mrb[98].mxu1 }
 0x253   : > { %13719 = vst [vmem:[#allocation43_spill] sm:$0xff] %v12387_v16  ;;  %3397 = vmatmul.mubr.f32.gmra.mrb[204].mxu0 %v3035_v26  ;;  %v12389_v17 = vpop.f32.mrb[99].mxu1  ;;  %v3071_v26 = vld [vmem:[#allocation2 + $0xd80] sm:$0xff]  ;;  %v3005_v16 = vld [vmem:[#allocation2 + $0xb70] sm:$0xff] }
 0x254   : > { %13720 = vst [vmem:[#allocation44_spill] sm:$0xff] %v12389_v17  ;;  %3401 = vmatprep.mubr.f32.mxu0 %v3054_v30  ;;  %v3090_v30 = vld [vmem:[#allocation2 + $0xe18] sm:$0xff] }
 0x255   : > { %4047 = vmatmul.mubr.f32.gmra.mrb[162].mxu1 %v2951_v43  ;;  %v3006_v43 = vld [vmem:[#allocation2 + $0xb78] sm:$0xff] }
 0x256   : > { %4051 = vmatprep.mubr.f32.mxu1 %v2970_v45  ;;  %v12393_v60 = vpop.f32.mrb[100].mxu1 }
 0x257   : > { %13721 = vst [vmem:[#allocation45_spill] sm:$0xff] %v12393_v60  ;;  %3402 = vmatmul.mubr.f32.gmra.mrb[206].mxu0 %v3053_v44  ;;  %v12395_v50 = vpop.f32.mrb[101].mxu1  ;;  %v3089_v44 = vld [vmem:[#allocation2 + $0xe10] sm:$0xff]  ;;  %v3023_v60 = vld [vmem:[#allocation2 + $0xc00] sm:$0xff] }
 0x258   : > { %13722 = vst [vmem:[#allocation46_spill] sm:$0xff] %v12395_v50  ;;  %3406 = vmatprep.mubr.f32.mxu0 %v3072_v59  ;;  %v3108_v59 = vld [vmem:[#allocation2 + $0xea8] sm:$0xff] }
 0x259   : > { %4052 = vmatmul.mubr.f32.gmra.mrb[164].mxu1 %v2969_v42  ;;  %v3024_v42 = vld [vmem:[#allocation2 + $0xc08] sm:$0xff] }
 0x25a   : > { %4056 = vmatprep.mubr.f32.mxu1 %v2988_v47  ;;  %v12399_v41 = vpop.f32.mrb[102].mxu1 }
 0x25b   : > { %13723 = vst [vmem:[#allocation47_spill] sm:$0xff] %v12399_v41  ;;  %3407 = vmatmul.mubr.f32.gmra.mrb[208].mxu0 %v3071_v26  ;;  %v12401_v45 = vpop.f32.mrb[103].mxu1  ;;  %v3107_v26 = vld [vmem:[#allocation2 + $0xea0] sm:$0xff]  ;;  %v3041_v41 = vld [vmem:[#allocation2 + $0xc90] sm:$0xff] }
 0x25c   : > { %13724 = vst [vmem:[#allocation48_spill] sm:$0xff] %v12401_v45  ;;  %3411 = vmatprep.mubr.f32.mxu0 %v3090_v30  ;;  %v3126_v30 = vld [vmem:[#allocation2 + $0xf38] sm:$0xff] }
 0x25d   : > { %4057 = vmatmul.mubr.f32.gmra.mrb[166].mxu1 %v2987_v3  ;;  %v3042_v3 = vld [vmem:[#allocation2 + $0xc98] sm:$0xff] }
 0x25e   : > { %4061 = vmatprep.mubr.f32.mxu1 %v3006_v43  ;;  %v12405_v48 = vpop.f32.mrb[104].mxu1 }
 0x25f   : > { %13725 = vst [vmem:[#allocation49_spill] sm:$0xff] %v12405_v48  ;;  %3412 = vmatmul.mubr.f32.gmra.mrb[210].mxu0 %v3089_v44  ;;  %v12407_v47 = vpop.f32.mrb[105].mxu1  ;;  %v3125_v44 = vld [vmem:[#allocation2 + $0xf30] sm:$0xff]  ;;  %v3059_v48 = vld [vmem:[#allocation2 + $0xd20] sm:$0xff] }
 0x260   : > { %13726 = vst [vmem:[#allocation50_spill] sm:$0xff] %v12407_v47  ;;  %3416 = vmatprep.mubr.f32.mxu0 %v3108_v59  ;;  %v3144_v59 = vld [vmem:[#allocation2 + $0xfc8] sm:$0xff] }
 0x261   : > { %4062 = vmatmul.mubr.f32.gmra.mrb[168].mxu1 %v3005_v16  ;;  %v3060_v16 = vld [vmem:[#allocation2 + $0xd28] sm:$0xff] }
 0x262   : > { %4066 = vmatprep.mubr.f32.mxu1 %v3024_v42  ;;  %v12411_v17 = vpop.f32.mrb[106].mxu1 }
 0x263   : > { %13727 = vst [vmem:[#allocation51_spill] sm:$0xff] %v12411_v17  ;;  %3417 = vmatmul.mubr.f32.gmra.mrb[212].mxu0 %v3107_v26  ;;  %v12413_v43 = vpop.f32.mrb[107].mxu1  ;;  %v3143_v26 = vld [vmem:[#allocation2 + $0xfc0] sm:$0xff]  ;;  %v3077_v17 = vld [vmem:[#allocation2 + $0xdb0] sm:$0xff] }
 0x264   : > { %13728 = vst [vmem:[#allocation52_spill] sm:$0xff] %v12413_v43  ;;  %3421 = vmatprep.mubr.f32.mxu0 %v3126_v30  ;;  %v3162_v30 = vld [vmem:[#allocation2 + $0x1058] sm:$0xff] }
 0x265   : > { %4067 = vmatmul.mubr.f32.gmra.mrb[170].mxu1 %v3023_v60  ;;  %v3078_v60 = vld [vmem:[#allocation2 + $0xdb8] sm:$0xff] }
 0x266   : > { %4071 = vmatprep.mubr.f32.mxu1 %v3042_v3  ;;  %v12417_v50 = vpop.f32.mrb[108].mxu1 }
 0x267   : > { %13729 = vst [vmem:[#allocation53_spill] sm:$0xff] %v12417_v50  ;;  %3422 = vmatmul.mubr.f32.gmra.mrb[214].mxu0 %v3125_v44  ;;  %v12419_v42 = vpop.f32.mrb[109].mxu1  ;;  %v3161_v44 = vld [vmem:[#allocation2 + $0x1050] sm:$0xff]  ;;  %v3095_v50 = vld [vmem:[#allocation2 + $0xe40] sm:$0xff] }
 0x268   : > { %13730 = vst [vmem:[#allocation54_spill] sm:$0xff] %v12419_v42  ;;  %3426 = vmatprep.mubr.f32.mxu0 %v3144_v59  ;;  %v3180_v59 = vld [vmem:[#allocation2 + $0x10e8] sm:$0xff] }
 0x269   : > { %4072 = vmatmul.mubr.f32.gmra.mrb[172].mxu1 %v3041_v41  ;;  %v3096_v41 = vld [vmem:[#allocation2 + $0xe48] sm:$0xff] }
 0x26a   : > { %4076 = vmatprep.mubr.f32.mxu1 %v3060_v16  ;;  %v12423_v45 = vpop.f32.mrb[110].mxu1 }
 0x26b   : > { %13731 = vst [vmem:[#allocation55_spill] sm:$0xff] %v12423_v45  ;;  %3427 = vmatmul.mubr.f32.gmra.mrb[216].mxu0 %v3143_v26  ;;  %v12425_v3 = vpop.f32.mrb[111].mxu1  ;;  %v3179_v26 = vld [vmem:[#allocation2 + $0x10e0] sm:$0xff]  ;;  %v3113_v45 = vld [vmem:[#allocation2 + $0xed0] sm:$0xff] }
 0x26c   : > { %13732 = vst [vmem:[#allocation56_spill] sm:$0xff] %v12425_v3  ;;  %3431 = vmatprep.mubr.f32.mxu0 %v3162_v30  ;;  %v3198_v30 = vld [vmem:[#allocation2 + $0x1178] sm:$0xff] }
 0x26d   : > { %4077 = vmatmul.mubr.f32.gmra.mrb[174].mxu1 %v3059_v48  ;;  %v3114_v48 = vld [vmem:[#allocation2 + $0xed8] sm:$0xff] }
 0x26e   : > { %4081 = vmatprep.mubr.f32.mxu1 %v3078_v60  ;;  %v12429_v47 = vpop.f32.mrb[112].mxu1 }
 0x26f   : > { %13733 = vst [vmem:[#allocation57_spill] sm:$0xff] %v12429_v47  ;;  %3432 = vmatmul.mubr.f32.gmra.mrb[218].mxu0 %v3161_v44  ;;  %v12431_v16 = vpop.f32.mrb[113].mxu1  ;;  %v3197_v44 = vld [vmem:[#allocation2 + $0x1170] sm:$0xff] }
 0x270   : > { %13734 = vst [vmem:[#allocation58_spill] sm:$0xff] %v12431_v16  ;;  %3436 = vmatprep.mubr.f32.mxu0 %v3180_v59  ;;  %v2642_v59 = vld [vmem:[#allocation2 + $0x18] sm:$0xff]  ;;  %v3168_v16 = vld [vmem:[#allocation2 + $0x1088] sm:$0xff] }
 0x271   : > { %4082 = vmatmul.mubr.f32.gmra.mrb[176].mxu1 %v3077_v17  ;;  %v3132_v17 = vld [vmem:[#allocation2 + $0xf68] sm:$0xff] }
 0x272   : > { %4086 = vmatprep.mubr.f32.mxu1 %v3096_v41  ;;  %v12435_v43 = vpop.f32.mrb[114].mxu1 }
 0x273   : > { %3437 = vmatmul.mubr.f32.gmra.mrb[220].mxu0 %v3179_v26  ;;  %v12437_v60 = vpop.f32.mrb[115].mxu1  ;;  %v2641_v26 = vld [vmem:[#allocation2 + $0x10] sm:$0xff] }
 0x274   : > { %3441 = vmatprep.mubr.f32.mxu0 %v3198_v30  ;;  %v3131_v30 = vld [vmem:[#allocation2 + $0xf60] sm:$0xff] }
 0x275   : > { %4087 = vmatmul.mubr.f32.gmra.mrb[178].mxu1 %v3095_v50  ;;  %v3150_v50 = vld [vmem:[#allocation2 + $0xff8] sm:$0xff] }
 0x276   : > { %4091 = vmatprep.mubr.f32.mxu1 %v3114_v48  ;;  %v12441_v42 = vpop.f32.mrb[116].mxu1 }
 0x277   : > { %3442 = vmatmul.mubr.f32.gmra.mrb[222].mxu0 %v3197_v44  ;;  %v12443_v41 = vpop.f32.mrb[117].mxu1  ;;  %v13735_v44 = vpack.c.bf16 %v12007_v9, %v12009_v54  ;;  %v3167_v9 = vld [vmem:[#allocation2 + $0x1080] sm:$0xff]  ;;  %v13739_v54 = vpack.c.bf16 %v12051_v4, %v12053_v21  ;;  %v2678_v4 = vld [vmem:[#allocation2 + $0x138] sm:$0xff] }
 0x278   : > { %3511 = vmatprep.mubr.f32.mxu0 %v2642_v59  ;;  %v13738_v59 = vpack.c.bf16 %v12036_v56, %v12038_v19  ;;  %v3203_v19 = vld [vmem:[#allocation2 + $0x11a0] sm:$0xff]  ;;  %v2666_v56 = vld [vmem:[#allocation2 + $0xd8] sm:$0xff] }
 0x279   : > { %4092 = vmatmul.mubr.f32.gmra.mrb[180].mxu1 %v3113_v45  ;;  %v3149_v45 = vld [vmem:[#allocation2 + $0xff0] sm:$0xff] }
 0x27a   : > { %4096 = vmatprep.mubr.f32.mxu1 %v3132_v17  ;;  %v12447_v47 = vpop.f32.mrb[118].mxu1 }
 0x27b   : > { %3512 = vmatmul.mubr.f32.vlgmr.msra.gmra.mrb[160].mxu0 %v2641_v26  ;;  %v12449_v48 = vpop.f32.mrb[119].mxu1  ;;  %v13736_v26 = vpack.c.bf16 %v12021_v15, %v12023_v12  ;;  %v3185_v12 = vld [vmem:[#allocation2 + $0x1110] sm:$0xff] }
 0x27c   : > { %9411 = vmatpush1.bf16.msra.mxu0 %v13735_v44 }
 0x27d   : > { %4097 = vmatmul.mubr.f32.gmra.mrb[182].mxu1 %v3131_v30  ;;  %9412 = vmatprep.subr.bf16.mxu0 %v13647_v10 }
 0x27e   : > { %4101 = vmatprep.mubr.f32.mxu1 %v3150_v50  ;;  %v12457_v17 = vpop.f32.mrb[120].mxu1  ;;  %v3186_v50 = vld [vmem:[#allocation2 + $0x1118] sm:$0xff] }
 0x27f   : > { %v12459_v3 = vpop.f32.mrb[121].mxu1 }
 0x280   : > { %9414 = vmatpush1.bf16.msra.mxu0 %v13736_v26 }
 0x281   : > { %4102 = vmatmul.mubr.f32.gmra.mrb[184].mxu1 %v3149_v45  ;;  %9415 = vmatprep.subr.bf16.mxu0 %v13647_v10 }
 0x282   : > { %4106 = vmatprep.mubr.f32.mxu1 %v3168_v16  ;;  %v12467_v30 = vpop.f32.mrb[122].mxu1  ;;  %v3204_v16 = vld [vmem:[#allocation2 + $0x11a8] sm:$0xff] }
 0x283   : > { %v12469_v44 = vpop.f32.mrb[123].mxu1 }
 0x284   : > { %13737 = vst [vmem:[#allocation59_spill] sm:$0xff] %v12469_v44  ;;  %9417 = vmatpush1.bf16.msra.mxu0 %v13738_v59  ;;  %v13740_v44 = vpack.c.bf16 %v12066_v40, %v12068_v23  ;;  %v13741_v40 = vpack.c.bf16 %v12081_v14, %v12083_v25  ;;  %v13742_v23 = vpack.c.bf16 %v12224_v49, %v12227_v2  ;;  %v2677_v49 = vld [vmem:[#allocation2 + $0x130] sm:$0xff] }
 0x285   : > { %4107 = vmatmul.mubr.f32.gmra.mrb[186].mxu1 %v3167_v9  ;;  %9418 = vmatprep.subr.bf16.mxu0 %v13647_v10  ;;  %v12489_v9 = vpop.f32.mrb[96].mxu0  ;;  %v13743_v14 = vpack.c.bf16 %v12096_v13, %v12098_v27  ;;  %v13744_v2 = vpack.c.bf16 %v12235_v52, %v12238_v11  ;;  %v2702_v13 = vld [vmem:[#allocation2 + $0x1f8] sm:$0xff]  ;;  %v13745_v27 = vpack.c.bf16 %v12111_v22, %v12113_v29  ;;  %v2695_v52 = vld [vmem:[#allocation2 + $0x1c0] sm:$0xff] }
 0x286   : > { %4111 = vmatprep.mubr.f32.mxu1 %v3186_v50  ;;  %v12477_v45 = vpop.f32.mrb[124].mxu1  ;;  %v2648_v50 = vld [vmem:[#allocation2 + $0x48] sm:$0xff]  ;;  %v12499_v21 = vpop.f32.mrb[97].mxu0  ;;  %v13746_v11 = vpack.c.bf16 %v12246_v58, %v12249_v55  ;;  %v13747_v22 = vpack.c.bf16 %v12126_v18, %v12128_v31  ;;  %v2713_v58 = vld [vmem:[#allocation2 + $0x250] sm:$0xff]  ;;  %v13748_v55 = vpack.c.bf16 %v12257_v62, %v12260_v5  ;;  %v2738_v18 = vld [vmem:[#allocation2 + $0x318] sm:$0xff]  ;;  %v13749_v31 = vpack.c.bf16 %v12141_v20, %v12143_v33 }
 0x287   : > { %v12479_v26 = vpop.f32.mrb[125].mxu1  ;;  %v2731_v62 = vld [vmem:[#allocation2 + $0x2e0] sm:$0xff]  ;;  %v13750_v5 = vpack.c.bf16 %v12268_v34, %v12271_v28  ;;  %v13751_v20 = vpack.c.bf16 %v12156_v53, %v12158_v35  ;;  %v2749_v34 = vld [vmem:[#allocation2 + $0x370] sm:$0xff]  ;;  %v13752_v28 = vpack.c.bf16 %v12279_v8, %v12282_v63  ;;  %v2774_v53 = vld [vmem:[#allocation2 + $0x438] sm:$0xff]  ;;  %v13753_v35 = vpack.c.bf16 %v12169_v61, %v12171_v37 }
 0x288   : > { %9420 = vmatpush1.bf16.msra.mxu0 %v13739_v54  ;;  %v2647_v54 = vld [vmem:[#allocation2 + $0x40] sm:$0xff]  ;;  %v13754_v63 = vpack.c.bf16 %v12290_v7, %v12293_v24  ;;  %v13755_v61 = vld [vmem:[#allocation25_spill] sm:$0xff]  ;;  %v13757_v24 = vpack.c.bf16 %v12301_v0, %v12304_v46  ;;  %v13761_v46 = vpack.c.bf16 %v12312_v38, %v12315_v57  ;;  %v13765_v57 = vpack.c.bf16 %v12323_v32, %v12326_v39  ;;  %v13769_v32 = vld [vmem:[#allocation32_spill] sm:$0xff] }
 0x289   : > { %4112 = vmatmul.mubr.f32.gmra.mrb[188].mxu1 %v3185_v12  ;;  %9421 = vmatprep.subr.bf16.mxu0 %v13647_v10  ;;  %v9602_v12 = vpack.c.bf16 %v12489_v9, %v12499_v21  ;;  %v2767_v8 = vld [vmem:[#allocation2 + $0x400] sm:$0xff]  ;;  %v13756_v37 = vpack.c.bf16 %v12180_v6, %v13755_v61  ;;  %v2785_v7 = vld [vmem:[#allocation2 + $0x490] sm:$0xff]  ;;  %v2810_v6 = vld [vmem:[#allocation2 + $0x558] sm:$0xff]  ;;  %v13770_v39 = vpack.c.bf16 %v12334_v1, %v13769_v32 }
 0x28a   : > { %4116 = vmatprep.mubr.f32.mxu1 %v3204_v16  ;;  %v12487_v59 = vpop.f32.mrb[126].mxu1  ;;  %v2660_v16 = vld [vmem:[#allocation2 + $0xa8] sm:$0xff]  ;;  %v2803_v0 = vld [vmem:[#allocation2 + $0x520] sm:$0xff]  ;;  %v2821_v38 = vld [vmem:[#allocation2 + $0x5b0] sm:$0xff] }
 0x28b   : > { %v12491_v15 = vpop.f32.mrb[127].mxu1  ;;  %3516 = vmatprep.mubr.f32.mxu0 %v2660_v16  ;;  %v2684_v16 = vld [vmem:[#allocation2 + $0x168] sm:$0xff]  ;;  %v2845_v61 = vld [vmem:[#allocation2 + $0x670] sm:$0xff]  ;;  %v2863_v1 = vld [vmem:[#allocation2 + $0x700] sm:$0xff] }
 0x28c   : > { %9423 = vmatpush1.bf16.msra.mxu0 %v13740_v44  ;;  %v2665_v44 = vld [vmem:[#allocation2 + $0xd0] sm:$0xff]  ;;  %v2912_v32 = vld [vmem:[#allocation2 + $0x888] sm:$0xff]  ;;  %v2698_v9 = vld [vmem:[#allocation2 + $0x1d8] sm:$0xff] }
 0x28d   : > { %4117 = vmatmul.mubr.f32.gmra.mrb[190].mxu1 %v3203_v19  ;;  %9424 = vmatprep.subr.bf16.mxu0 %v13647_v10  ;;  %v2659_v19 = vld [vmem:[#allocation2 + $0xa0] sm:$0xff] }
 0x28e   : > { %4186 = vmatprep.mubr.f32.mxu1 %v2648_v50  ;;  %v12510_v50 = vpop.f32.mrb[98].mxu0  ;;  %3517 = vmatmul.mubr.f32.gmra.mrb[162].mxu0 %v2659_v19  ;;  %v2720_v19 = vld [vmem:[#allocation2 + $0x288] sm:$0xff]  ;;  %v2703_v21 = vld [vmem:[#allocation2 + $0x200] sm:$0xff] }
 0x28f   : > { %3521 = vmatprep.mubr.f32.mxu0 %v2678_v4  ;;  %v12517_v25 = vpop.f32.mrb[99].mxu0  ;;  %v2701_v4 = vld [vmem:[#allocation2 + $0x1f0] sm:$0xff] }
 0x290   : > { %9426 = vmatpush1.bf16.msra.mxu0 %v13741_v40  ;;  %v2696_v40 = vld [vmem:[#allocation2 + $0x1c8] sm:$0xff] }
 0x291   : > { %4187 = vmatmul.mubr.f32.vlgmr.msra.gmra.mrb[128].mxu1 %v2647_v54  ;;  %9427 = vmatprep.subr.bf16.mxu0 %v13647_v10  ;;  %v9605_v54 = vpack.c.bf16 %v12510_v50, %v12517_v25  ;;  %v2716_v50 = vld [vmem:[#allocation2 + $0x268] sm:$0xff]  ;;  %v2721_v25 = vld [vmem:[#allocation2 + $0x290] sm:$0xff] }
 0x292   : > { %9555 = vmatpush1.bf16.msra.mxu1 %v13742_v23  ;;  %4191 = vmatprep.mubr.f32.mxu1 %v2666_v56  ;;  %v2683_v56 = vld [vmem:[#allocation2 + $0x160] sm:$0xff]  ;;  %v12532_v23 = vpop.f32.mrb[100].mxu0 }
 0x293   : > { %9556 = vmatprep.subr.bf16.mxu1 %v13647_v10  ;;  %3522 = vmatmul.mubr.f32.gmra.mrb[164].mxu0 %v2677_v49  ;;  %v12539_v29 = vpop.f32.mrb[101].mxu0  ;;  %v2732_v49 = vld [vmem:[#allocation2 + $0x2e8] sm:$0xff] }
 0x294   : > { %9429 = vmatpush1.bf16.msra.mxu0 %v13743_v14  ;;  %3526 = vmatprep.mubr.f32.mxu0 %v2696_v40  ;;  %v9608_v14 = vpack.c.bf16 %v12532_v23, %v12539_v29  ;;  %v2750_v40 = vld [vmem:[#allocation2 + $0x378] sm:$0xff]  ;;  %v2739_v29 = vld [vmem:[#allocation2 + $0x320] sm:$0xff] }
 0x295   : > { %4192 = vmatmul.mubr.f32.gmra.mrb[130].mxu1 %v2665_v44  ;;  %9430 = vmatprep.subr.bf16.mxu0 %v13647_v10  ;;  %v2714_v44 = vld [vmem:[#allocation2 + $0x258] sm:$0xff] }
 0x296   : > { %9558 = vmatpush1.bf16.msra.mxu1 %v13744_v2  ;;  %4196 = vmatprep.mubr.f32.mxu1 %v2684_v16  ;;  %v2719_v16 = vld [vmem:[#allocation2 + $0x280] sm:$0xff]  ;;  %v2737_v2 = vld [vmem:[#allocation2 + $0x310] sm:$0xff]  ;;  %v2734_v23 = vld [vmem:[#allocation2 + $0x2f8] sm:$0xff] }
 0x297   : > { %9559 = vmatprep.subr.bf16.mxu1 %v13647_v10  ;;  %3527 = vmatmul.mubr.f32.gmra.mrb[166].mxu0 %v2695_v52 }
 0x298   : > { %9432 = vmatpush1.bf16.msra.mxu0 %v13745_v27  ;;  %3531 = vmatprep.mubr.f32.mxu0 %v2714_v44  ;;  %v2755_v27 = vld [vmem:[#allocation2 + $0x3a0] sm:$0xff] }
 0x299   : > { %4197 = vmatmul.mubr.f32.gmra.mrb[132].mxu1 %v2683_v56  ;;  %9433 = vmatprep.subr.bf16.mxu0 %v13647_v10  ;;  %v12554_v56 = vpop.f32.mrb[102].mxu0 }
 0x29a   : > { %9561 = vmatpush1.bf16.msra.mxu1 %v13746_v11  ;;  %4201 = vmatprep.mubr.f32.mxu1 %v2702_v13  ;;  %v2756_v13 = vld [vmem:[#allocation2 + $0x3a8] sm:$0xff]  ;;  %v12561_v33 = vpop.f32.mrb[103].mxu0 }
 0x29b   : > { %9562 = vmatprep.subr.bf16.mxu1 %v13647_v10  ;;  %3532 = vmatmul.mubr.f32.gmra.mrb[168].mxu0 %v2713_v58  ;;  %v9611_v52 = vpack.c.bf16 %v12554_v56, %v12561_v33  ;;  %v2768_v11 = vld [vmem:[#allocation2 + $0x408] sm:$0xff]  ;;  %v12576_v44 = vpop.f32.mrb[104].mxu0  ;;  %v2757_v33 = vld [vmem:[#allocation2 + $0x3b0] sm:$0xff] }
 0x29c   : > { %9435 = vmatpush1.bf16.msra.mxu0 %v13747_v22  ;;  %3536 = vmatprep.mubr.f32.mxu0 %v2732_v49  ;;  %v2792_v22 = vld [vmem:[#allocation2 + $0x4c8] sm:$0xff]  ;;  %v12583_v58 = vpop.f32.mrb[105].mxu0 }
 0x29d   : > { %4202 = vmatmul.mubr.f32.gmra.mrb[134].mxu1 %v2701_v4  ;;  %9436 = vmatprep.subr.bf16.mxu0 %v13647_v10  ;;  %v2773_v4 = vld [vmem:[#allocation2 + $0x430] sm:$0xff]  ;;  %v2804_v49 = vld [vmem:[#allocation2 + $0x528] sm:$0xff] }
 0x29e   : > { %9564 = vmatpush1.bf16.msra.mxu1 %v13748_v55  ;;  %4206 = vmatprep.mubr.f32.mxu1 %v2720_v19  ;;  %v2786_v19 = vld [vmem:[#allocation2 + $0x498] sm:$0xff]  ;;  %v2791_v55 = vld [vmem:[#allocation2 + $0x4c0] sm:$0xff]  ;;  %v2752_v56 = vld [vmem:[#allocation2 + $0x388] sm:$0xff] }
 0x29f   : > { %9565 = vmatprep.subr.bf16.mxu1 %v13647_v10  ;;  %3537 = vmatmul.mubr.f32.gmra.mrb[170].mxu0 %v2731_v62 }
 0x2a0   : > { %9438 = vmatpush1.bf16.msra.mxu0 %v13749_v31  ;;  %3541 = vmatprep.mubr.f32.mxu0 %v2750_v40  ;;  %v13759_v31 = vld [vmem:[#allocation27_spill] sm:$0xff]  ;;  %v2822_v40 = vld [vmem:[#allocation2 + $0x5b8] sm:$0xff] }
 0x2a1   : > { %4207 = vmatmul.mubr.f32.gmra.mrb[136].mxu1 %v2719_v16  ;;  %9439 = vmatprep.subr.bf16.mxu0 %v13647_v10  ;;  %v9614_v16 = vpack.c.bf16 %v12576_v44, %v12583_v58  ;;  %v2770_v44 = vld [vmem:[#allocation2 + $0x418] sm:$0xff]  ;;  %v2775_v58 = vld [vmem:[#allocation2 + $0x440] sm:$0xff] }
 0x2a2   : > { %9567 = vmatpush1.bf16.msra.mxu1 %v13750_v5  ;;  %4211 = vmatprep.mubr.f32.mxu1 %v2738_v18  ;;  %v13758_v18 = vld [vmem:[#allocation26_spill] sm:$0xff]  ;;  %v2809_v5 = vld [vmem:[#allocation2 + $0x550] sm:$0xff] }
 0x2a3   : > { %9568 = vmatprep.subr.bf16.mxu1 %v13647_v10  ;;  %3542 = vmatmul.mubr.f32.gmra.mrb[172].mxu0 %v2749_v34  ;;  %v13760_v62 = vpack.c.bf16 %v13758_v18, %v13759_v31  ;;  %v13763_v34 = vld [vmem:[#allocation29_spill] sm:$0xff]  ;;  %v13772_v18 = vld [vmem:[#allocation34_spill] sm:$0xff] }
 0x2a4   : > { %9441 = vmatpush1.bf16.msra.mxu0 %v13751_v20  ;;  %3546 = vmatprep.mubr.f32.mxu0 %v2768_v11  ;;  %v13762_v20 = vld [vmem:[#allocation28_spill] sm:$0xff]  ;;  %v2827_v11 = vld [vmem:[#allocation2 + $0x5e0] sm:$0xff] }
 0x2a5   : > { %4212 = vmatmul.mubr.f32.gmra.mrb[138].mxu1 %v2737_v2  ;;  %9442 = vmatprep.subr.bf16.mxu0 %v13647_v10  ;;  %v12598_v2 = vpop.f32.mrb[106].mxu0 }
 0x2a6   : > { %9570 = vmatpush1.bf16.msra.mxu1 %v13752_v28  ;;  %4216 = vmatprep.mubr.f32.mxu1 %v2756_v13  ;;  %v2828_v13 = vld [vmem:[#allocation2 + $0x5e8] sm:$0xff]  ;;  %v13764_v28 = vpack.c.bf16 %v13762_v20, %v13763_v34  ;;  %v2881_v34 = vld [vmem:[#allocation2 + $0x790] sm:$0xff] }
 0x2a7   : > { %9571 = vmatprep.subr.bf16.mxu1 %v13647_v10  ;;  %3547 = vmatmul.mubr.f32.gmra.mrb[174].mxu0 %v2767_v8  ;;  %v2846_v8 = vld [vmem:[#allocation2 + $0x678] sm:$0xff] }
 0x2a8   : > { %9444 = vmatpush1.bf16.msra.mxu0 %v13753_v35  ;;  %3551 = vmatprep.mubr.f32.mxu0 %v2786_v19  ;;  %v2840_v35 = vld [vmem:[#allocation2 + $0x648] sm:$0xff] }
 0x2a9   : > { %4217 = vmatmul.mubr.f32.gmra.mrb[140].mxu1 %v2755_v27  ;;  %9445 = vmatprep.subr.bf16.mxu0 %v13647_v10  ;;  %v12605_v27 = vpop.f32.mrb[107].mxu0 }
 0x2aa   : > { %9573 = vmatpush1.bf16.msra.mxu1 %v13754_v63  ;;  %4221 = vmatprep.mubr.f32.mxu1 %v2774_v53  ;;  %v13766_v63 = vld [vmem:[#allocation30_spill] sm:$0xff]  ;;  %v2668_v53 = vld [vmem:[#allocation2 + $0xe8] sm:$0xff] }
 0x2ab   : > { %9574 = vmatprep.subr.bf16.mxu1 %v13647_v10  ;;  %3552 = vmatmul.mubr.f32.gmra.mrb[176].mxu0 %v2785_v7  ;;  %v2858_v7 = vld [vmem:[#allocation2 + $0x6d8] sm:$0xff] }
 0x2ac   : > { %9447 = vmatpush1.bf16.msra.mxu0 %v13756_v37  ;;  %3556 = vmatprep.mubr.f32.mxu0 %v2804_v49  ;;  %v12619_v37 = vpop.f32.mrb[108].mxu0  ;;  %v2857_v49 = vld [vmem:[#allocation2 + $0x6d0] sm:$0xff] }
 0x2ad   : > { %4222 = vmatmul.mubr.f32.gmra.mrb[142].mxu1 %v2773_v4  ;;  %9448 = vmatprep.subr.bf16.mxu0 %v13647_v10  ;;  %v13767_v4 = vld [vmem:[#allocation31_spill] sm:$0xff] }
 0x2ae   : > { %9576 = vmatpush1.bf16.msra.mxu1 %v13757_v24  ;;  %4226 = vmatprep.mubr.f32.mxu1 %v2792_v22  ;;  %v13768_v19 = vpack.c.bf16 %v13766_v63, %v13767_v4  ;;  %v2839_v22 = vld [vmem:[#allocation2 + $0x640] sm:$0xff]  ;;  %v2864_v24 = vld [vmem:[#allocation2 + $0x708] sm:$0xff] }
 0x2af   : > { %9577 = vmatprep.subr.bf16.mxu1 %v13647_v10  ;;  %3557 = vmatmul.mubr.f32.gmra.mrb[178].mxu0 %v2803_v0  ;;  %v2876_v0 = vld [vmem:[#allocation2 + $0x768] sm:$0xff]  ;;  %v13778_v63 = vld [vmem:[#allocation38_spill] sm:$0xff] }
 0x2b0   : > { %9450 = vmatpush1.bf16.msra.mxu0 %v13760_v62  ;;  %3561 = vmatprep.mubr.f32.mxu0 %v2822_v40  ;;  %v13774_v40 = vld [vmem:[#allocation35_spill] sm:$0xff] }
 0x2b1   : > { %4227 = vmatmul.mubr.f32.gmra.mrb[144].mxu1 %v2791_v55  ;;  %9451 = vmatprep.subr.bf16.mxu0 %v13647_v10  ;;  %v12622_v55 = vpop.f32.mrb[109].mxu0  ;;  %v2644_v62 = vld [vmem:[#allocation2 + $0x28] sm:$0xff] }
 0x2b2   : > { %9579 = vmatpush1.bf16.msra.mxu1 %v13761_v46  ;;  %4231 = vmatprep.mubr.f32.mxu1 %v2810_v6  ;;  %v13771_v6 = vld [vmem:[#allocation33_spill] sm:$0xff] }
 0x2b3   : > { %9580 = vmatprep.subr.bf16.mxu1 %v13647_v10  ;;  %3562 = vmatmul.mubr.f32.gmra.mrb[180].mxu0 %v2821_v38  ;;  %v13773_v31 = vpack.c.bf16 %v13771_v6, %v13772_v18  ;;  %v2882_v46 = vld [vmem:[#allocation2 + $0x798] sm:$0xff]  ;;  %v2936_v18 = vld [vmem:[#allocation2 + $0x948] sm:$0xff] }
 0x2b4   : > { %9453 = vmatpush1.bf16.msra.mxu0 %v13764_v28  ;;  %3566 = vmatprep.mubr.f32.mxu0 %v2840_v35  ;;  %v12633_v28 = vpop.f32.mrb[110].mxu0  ;;  %v2894_v38 = vld [vmem:[#allocation2 + $0x7f8] sm:$0xff]  ;;  %v2893_v35 = vld [vmem:[#allocation2 + $0x7f0] sm:$0xff] }
 0x2b5   : > { %4232 = vmatmul.mubr.f32.gmra.mrb[146].mxu1 %v2809_v5  ;;  %9454 = vmatprep.subr.bf16.mxu0 %v13647_v10  ;;  %v2875_v5 = vld [vmem:[#allocation2 + $0x760] sm:$0xff]  ;;  %v2930_v6 = vld [vmem:[#allocation2 + $0x918] sm:$0xff] }
 0x2b6   : > { %9582 = vmatpush1.bf16.msra.mxu1 %v13765_v57  ;;  %4236 = vmatprep.mubr.f32.mxu1 %v2828_v13  ;;  %v13775_v13 = vld [vmem:[#allocation36_spill] sm:$0xff] }
 0x2b7   : > { %9583 = vmatprep.subr.bf16.mxu1 %v13647_v10  ;;  %3567 = vmatmul.mubr.f32.gmra.mrb[182].mxu0 %v2839_v22  ;;  %v13776_v20 = vpack.c.bf16 %v13774_v40, %v13775_v13  ;;  %v2900_v57 = vld [vmem:[#allocation2 + $0x828] sm:$0xff]  ;;  %v2954_v13 = vld [vmem:[#allocation2 + $0x9d8] sm:$0xff]  ;;  %v3205_v22 = vld [vmem:[#allocation2 + $0x11b0] sm:$0xff] }
 0x2b8   : > { %9456 = vmatpush1.bf16.msra.mxu0 %v13768_v19  ;;  %3571 = vmatprep.mubr.f32.mxu0 %v2858_v7  ;;  %v2899_v19 = vld [vmem:[#allocation2 + $0x820] sm:$0xff]  ;;  %v13780_v7 = vpack.c.bf16 %v12366_v36, %v12369_v51  ;;  %v2948_v40 = vld [vmem:[#allocation2 + $0x9a8] sm:$0xff] }
 0x2b9   : > { %4237 = vmatmul.mubr.f32.gmra.mrb[148].mxu1 %v2827_v11  ;;  %v12636_v11 = vpop.f32.mrb[111].mxu0  ;;  %v2935_v51 = vld [vmem:[#allocation2 + $0x940] sm:$0xff] }
 0x2ba   : > { %9585 = vmatpush1.bf16.msra.mxu1 %v13770_v39  ;;  %4241 = vmatprep.mubr.f32.mxu1 %v2846_v8  ;;  %v13777_v8 = vld [vmem:[#allocation37_spill] sm:$0xff] }
 0x2bb   : > { %9586 = vmatprep.subr.bf16.mxu1 %v13647_v10  ;;  %3572 = vmatmul.mubr.f32.gmra.mrb[184].mxu0 %v2857_v49  ;;  %v13779_v4 = vpack.c.bf16 %v13777_v8, %v13778_v63  ;;  %v2918_v39 = vld [vmem:[#allocation2 + $0x8b8] sm:$0xff]  ;;  %v12647_v49 = vpop.f32.mrb[112].mxu0  ;;  %v2965_v63 = vld [vmem:[#allocation2 + $0xa30] sm:$0xff] }
 0x2bc   : > { %3576 = vmatprep.mubr.f32.mxu0 %v2876_v0  ;;  %v13781_v0 = vld [vmem:[#allocation39_spill] sm:$0xff] }
 0x2bd   : > { %4242 = vmatmul.mubr.f32.gmra.mrb[150].mxu1 %v2845_v61  ;;  %v2911_v61 = vld [vmem:[#allocation2 + $0x880] sm:$0xff] }
 0x2be   : > { %9588 = vmatpush1.bf16.msra.mxu1 %v13773_v31  ;;  %4246 = vmatprep.mubr.f32.mxu1 %v2864_v24  ;;  %v2917_v24 = vld [vmem:[#allocation2 + $0x8b0] sm:$0xff]  ;;  %v12650_v31 = vpop.f32.mrb[113].mxu0 }
 0x2bf   : > { %9589 = vmatprep.subr.bf16.mxu1 %v13647_v10  ;;  %3577 = vmatmul.mubr.f32.gmra.mrb[186].mxu0 %v2875_v5 }
 0x2c0   : > { %3581 = vmatprep.mubr.f32.mxu0 %v2894_v38  ;;  %v12658_v38 = vpop.f32.mrb[114].mxu0 }
 0x2c1   : > { %4247 = vmatmul.mubr.f32.gmra.mrb[152].mxu1 %v2863_v1  ;;  %v2929_v1 = vld [vmem:[#allocation2 + $0x910] sm:$0xff]  ;;  %v12660_v8 = vpop.f32.mrb[115].mxu0 }
 0x2c2   : > { %9591 = vmatpush1.bf16.msra.mxu1 %v13776_v20  ;;  %4251 = vmatprep.mubr.f32.mxu1 %v2882_v46  ;;  %v13782_v46 = vld [vmem:[#allocation40_spill] sm:$0xff]  ;;  %v2947_v20 = vld [vmem:[#allocation2 + $0x9a0] sm:$0xff] }
 0x2c3   : > { %9592 = vmatprep.subr.bf16.mxu1 %v13647_v10  ;;  %3582 = vmatmul.mubr.f32.gmra.mrb[188].mxu0 %v2893_v35  ;;  %v13783_v5 = vpack.c.bf16 %v13781_v0, %v13782_v46  ;;  %v2972_v35 = vld [vmem:[#allocation2 + $0xa68] sm:$0xff]  ;;  %v3001_v0 = vld [vmem:[#allocation2 + $0xb50] sm:$0xff]  ;;  %v3007_v46 = vld [vmem:[#allocation2 + $0xb80] sm:$0xff] }
 0x2c4   : > { %3586 = vmatprep.mubr.f32.mxu0 %v2912_v32  ;;  %v2984_v32 = vld [vmem:[#allocation2 + $0xac8] sm:$0xff] }
 0x2c5   : > { %4252 = vmatmul.mubr.f32.gmra.mrb[154].mxu1 %v2881_v34  ;;  %v2953_v34 = vld [vmem:[#allocation2 + $0x9d0] sm:$0xff] }
 0x2c6   : > { %9594 = vmatpush1.bf16.msra.mxu1 %v13779_v4  ;;  %4256 = vmatprep.mubr.f32.mxu1 %v2900_v57  ;;  %v2966_v57 = vld [vmem:[#allocation2 + $0xa38] sm:$0xff]  ;;  %v2971_v4 = vld [vmem:[#allocation2 + $0xa60] sm:$0xff] }
 0x2c7   : > { %9595 = vmatprep.subr.bf16.mxu1 %v13647_v10  ;;  %3587 = vmatmul.mubr.f32.gmra.mrb[190].mxu0 %v2911_v61  ;;  %v2983_v61 = vld [vmem:[#allocation2 + $0xac0] sm:$0xff] }
 0x2c8   : > { %3591 = vmatprep.mubr.f32.mxu0 %v2930_v6  ;;  %v3002_v6 = vld [vmem:[#allocation2 + $0xb58] sm:$0xff] }
 0x2c9   : > { %4257 = vmatmul.mubr.f32.gmra.mrb[156].mxu1 %v2899_v19  ;;  %v3169_v19 = vld [vmem:[#allocation2 + $0x1090] sm:$0xff] }
 0x2ca   : > { %9597 = vmatpush1.bf16.msra.mxu1 %v13780_v7  ;;  %4261 = vmatprep.mubr.f32.mxu1 %v2918_v39  ;;  %v2990_v39 = vld [vmem:[#allocation2 + $0xaf8] sm:$0xff]  ;;  %v2989_v7 = vld [vmem:[#allocation2 + $0xaf0] sm:$0xff] }
 0x2cb   : > { %9598 = vmatprep.subr.bf16.mxu1 %v13647_v10  ;;  %3592 = vmatmul.mubr.f32.gmra.mrb[192].mxu0 %v2929_v1 }
 0x2cc   : > { %3596 = vmatprep.mubr.f32.mxu0 %v2948_v40  ;;  %v3026_v40 = vld [vmem:[#allocation2 + $0xc18] sm:$0xff] }
 0x2cd   : > { %4262 = vmatmul.mubr.f32.gmra.mrb[158].mxu1 %v2917_v24  ;;  %v12664_v24 = vpop.f32.mrb[116].mxu0 }
 0x2ce   : > { %9600 = vmatpush1.bf16.msra.mxu1 %v13783_v5  ;;  %4266 = vmatprep.mubr.f32.mxu1 %v2936_v18  ;;  %v3008_v18 = vld [vmem:[#allocation2 + $0xb88] sm:$0xff]  ;;  %v12666_v1 = vpop.f32.mrb[117].mxu0 }
 0x2cf   : > { %9601 = vmatprep.subr.bf16.mxu1 %v13647_v10  ;;  %3597 = vmatmul.mubr.f32.gmra.mrb[194].mxu0 %v2947_v20  ;;  %v3025_v20 = vld [vmem:[#allocation2 + $0xc10] sm:$0xff] }
 0x2d0   : > { %3601 = vmatprep.mubr.f32.mxu0 %v2966_v57  ;;  %v3038_v57 = vld [vmem:[#allocation2 + $0xc78] sm:$0xff] }
 0x2d1   : > { %4267 = vmatmul.mubr.f32.gmra.mrb[160].mxu1 %v2935_v51  ;;  %v3020_v51 = vld [vmem:[#allocation2 + $0xbe8] sm:$0xff] }
 0x2d2   : > { %4271 = vmatprep.mubr.f32.mxu1 %v2954_v13  ;;  %v3019_v13 = vld [vmem:[#allocation2 + $0xbe0] sm:$0xff] }
 0x2d3   : > { %3602 = vmatmul.mubr.f32.gmra.mrb[196].mxu0 %v2965_v63 }
 0x2d4   : > { %3606 = vmatprep.mubr.f32.mxu0 %v2984_v32  ;;  %v3043_v32 = vld [vmem:[#allocation2 + $0xca0] sm:$0xff] }
 0x2d5   : > { %4272 = vmatmul.mubr.f32.gmra.mrb[162].mxu1 %v2953_v34  ;;  %v12670_v34 = vpop.f32.mrb[118].mxu0 }
 0x2d6   : > { %4276 = vmatprep.mubr.f32.mxu1 %v2972_v35  ;;  %v3044_v35 = vld [vmem:[#allocation2 + $0xca8] sm:$0xff]  ;;  %v12672_v63 = vpop.f32.mrb[119].mxu0 }
 0x2d7   : > { %3607 = vmatmul.mubr.f32.gmra.mrb[198].mxu0 %v2983_v61  ;;  %v3056_v61 = vld [vmem:[#allocation2 + $0xd08] sm:$0xff] }
 0x2d8   : > { %3611 = vmatprep.mubr.f32.mxu0 %v3002_v6  ;;  %v3055_v6 = vld [vmem:[#allocation2 + $0xd00] sm:$0xff] }
 0x2d9   : > { %4277 = vmatmul.mubr.f32.gmra.mrb[164].mxu1 %v2971_v4  ;;  %v3037_v4 = vld [vmem:[#allocation2 + $0xc70] sm:$0xff] }
 0x2da   : > { %4281 = vmatprep.mubr.f32.mxu1 %v2990_v39  ;;  %v3133_v39 = vld [vmem:[#allocation2 + $0xf70] sm:$0xff] }
 0x2db   : > { %3612 = vmatmul.mubr.f32.gmra.mrb[200].mxu0 %v3001_v0  ;;  %v12676_v0 = vpop.f32.mrb[120].mxu0 }
 0x2dc   : > { %3616 = vmatprep.mubr.f32.mxu0 %v3020_v51  ;;  %v3080_v51 = vld [vmem:[#allocation2 + $0xdc8] sm:$0xff] }
 0x2dd   : > { %4282 = vmatmul.mubr.f32.gmra.mrb[166].mxu1 %v2989_v7  ;;  %v3062_v7 = vld [vmem:[#allocation2 + $0xd38] sm:$0xff] }
 0x2de   : > { %4286 = vmatprep.mubr.f32.mxu1 %v3008_v18  ;;  %v3061_v18 = vld [vmem:[#allocation2 + $0xd30] sm:$0xff] }
 0x2df   : > { %3617 = vmatmul.mubr.f32.gmra.mrb[202].mxu0 %v3019_v13  ;;  %v3073_v13 = vld [vmem:[#allocation2 + $0xd90] sm:$0xff] }
 0x2e0   : > { %3621 = vmatprep.mubr.f32.mxu0 %v3038_v57  ;;  %v3115_v57 = vld [vmem:[#allocation2 + $0xee0] sm:$0xff] }
 0x2e1   : > { %4287 = vmatmul.mubr.f32.gmra.mrb[168].mxu1 %v3007_v46  ;;  %v3074_v46 = vld [vmem:[#allocation2 + $0xd98] sm:$0xff] }
 0x2e2   : > { %4291 = vmatprep.mubr.f32.mxu1 %v3026_v40  ;;  %v12678_v40 = vpop.f32.mrb[121].mxu0 }
 0x2e3   : > { %3622 = vmatmul.mubr.f32.gmra.mrb[204].mxu0 %v3037_v4  ;;  %v3098_v4 = vld [vmem:[#allocation2 + $0xe58] sm:$0xff] }
 0x2e4   : > { %3626 = vmatprep.mubr.f32.mxu0 %v3056_v61  ;;  %v3097_v61 = vld [vmem:[#allocation2 + $0xe50] sm:$0xff] }
 0x2e5   : > { %4292 = vmatmul.mubr.f32.gmra.mrb[170].mxu1 %v3025_v20  ;;  %v3079_v20 = vld [vmem:[#allocation2 + $0xdc0] sm:$0xff] }
 0x2e6   : > { %4296 = vmatprep.mubr.f32.mxu1 %v3044_v35  ;;  %v3092_v35 = vld [vmem:[#allocation2 + $0xe28] sm:$0xff] }
 0x2e7   : > { %3627 = vmatmul.mubr.f32.gmra.mrb[206].mxu0 %v3055_v6  ;;  %v3110_v6 = vld [vmem:[#allocation2 + $0xeb8] sm:$0xff] }
 0x2e8   : > { %3631 = vmatprep.mubr.f32.mxu0 %v3074_v46 }
 0x2e9   : > { %4297 = vmatmul.mubr.f32.gmra.mrb[172].mxu1 %v3043_v32  ;;  %v3091_v32 = vld [vmem:[#allocation2 + $0xe20] sm:$0xff] }
 0x2ea   : > { %4301 = vmatprep.mubr.f32.mxu1 %v3062_v7  ;;  %v12682_v7 = vpop.f32.mrb[122].mxu0 }
 0x2eb   : > { %3632 = vmatmul.mubr.f32.gmra.mrb[208].mxu0 %v3073_v13  ;;  %v12684_v46 = vpop.f32.mrb[123].mxu0  ;;  %v3151_v13 = vld [vmem:[#allocation2 + $0x1000] sm:$0xff] }
 0x2ec   : > { %3636 = vmatprep.mubr.f32.mxu0 %v3092_v35  ;;  %v3128_v35 = vld [vmem:[#allocation2 + $0xf48] sm:$0xff]  ;;  %v12688_v5 = vpop.f32.mrb[124].mxu0 }
 0x2ed   : > { %4302 = vmatmul.mubr.f32.gmra.mrb[174].mxu1 %v3061_v18  ;;  %v3116_v18 = vld [vmem:[#allocation2 + $0xee8] sm:$0xff] }
 0x2ee   : > { %4306 = vmatprep.mubr.f32.mxu1 %v3080_v51  ;;  %v3109_v51 = vld [vmem:[#allocation2 + $0xeb0] sm:$0xff] }
 0x2ef   : > { %3637 = vmatmul.mubr.f32.gmra.mrb[210].mxu0 %v3091_v32  ;;  %v3146_v32 = vld [vmem:[#allocation2 + $0xfd8] sm:$0xff] }
 0x2f0   : > { %3641 = vmatprep.mubr.f32.mxu0 %v3110_v6  ;;  %v12690_v6 = vpop.f32.mrb[125].mxu0 }
 0x2f1   : > { %4307 = vmatmul.mubr.f32.gmra.mrb[176].mxu1 %v3079_v20  ;;  %v3134_v20 = vld [vmem:[#allocation2 + $0xf78] sm:$0xff]  ;;  %v12694_v36 = vpop.f32.mrb[126].mxu0 }
 0x2f2   : > { %4311 = vmatprep.mubr.f32.mxu1 %v3098_v4  ;;  %v3127_v4 = vld [vmem:[#allocation2 + $0xf40] sm:$0xff] }
 0x2f3   : > { %3642 = vmatmul.mubr.f32.gmra.mrb[212].mxu0 %v3109_v51  ;;  %v3187_v51 = vld [vmem:[#allocation2 + $0x1120] sm:$0xff] }
 0x2f4   : > { %3646 = vmatprep.mubr.f32.mxu0 %v3128_v35  ;;  %v3164_v35 = vld [vmem:[#allocation2 + $0x1068] sm:$0xff] }
 0x2f5   : > { %4312 = vmatmul.mubr.f32.gmra.mrb[178].mxu1 %v3097_v61  ;;  %v3152_v61 = vld [vmem:[#allocation2 + $0x1008] sm:$0xff] }
 0x2f6   : > { %4316 = vmatprep.mubr.f32.mxu1 %v3116_v18  ;;  %v3145_v18 = vld [vmem:[#allocation2 + $0xfd0] sm:$0xff] }
 0x2f7   : > { %3647 = vmatmul.mubr.f32.gmra.mrb[214].mxu0 %v3127_v4  ;;  %v3182_v4 = vld [vmem:[#allocation2 + $0x10f8] sm:$0xff] }
 0x2f8   : > { %3651 = vmatprep.mubr.f32.mxu0 %v3146_v32  ;;  %v12696_v32 = vpop.f32.mrb[127].mxu0 }
 0x2f9   : > { %4317 = vmatmul.mubr.f32.gmra.mrb[180].mxu1 %v3115_v57  ;;  %v3170_v57 = vld [vmem:[#allocation2 + $0x1098] sm:$0xff] }
 0x2fa   : > { %4321 = vmatprep.mubr.f32.mxu1 %v3134_v20  ;;  %v3163_v20 = vld [vmem:[#allocation2 + $0x1060] sm:$0xff] }
 0x2fb   : > { %3652 = vmatmul.mubr.f32.gmra.mrb[216].mxu0 %v3145_v18  ;;  %v9647_v18 = vpack.c.bf16 %v12694_v36, %v12696_v32  ;;  %v2973_v36 = vld [vmem:[#allocation2 + $0xa70] sm:$0xff]  ;;  %v2986_v32 = vld [vmem:[#allocation2 + $0xad8] sm:$0xff] }
 0x2fc   : > { %3656 = vmatprep.mubr.f32.mxu0 %v3164_v35  ;;  %v3200_v35 = vld [vmem:[#allocation2 + $0x1188] sm:$0xff] }
 0x2fd   : > { %4322 = vmatmul.mubr.f32.gmra.mrb[182].mxu1 %v3133_v39  ;;  %v3188_v39 = vld [vmem:[#allocation2 + $0x1128] sm:$0xff] }
 0x2fe   : > { %4326 = vmatprep.mubr.f32.mxu1 %v3152_v61  ;;  %v3181_v61 = vld [vmem:[#allocation2 + $0x10f0] sm:$0xff] }
 0x2ff   : > { %3657 = vmatmul.mubr.f32.gmra.mrb[218].mxu0 %v3163_v20  ;;  %v2650_v20 = vld [vmem:[#allocation2 + $0x58] sm:$0xff] }
 0x300   : > { %3661 = vmatprep.mubr.f32.mxu0 %v3182_v4  ;;  %v2649_v4 = vld [vmem:[#allocation2 + $0x50] sm:$0xff] }
 0x301   : > { %4327 = vmatmul.mubr.f32.gmra.mrb[184].mxu1 %v3151_v13  ;;  %v3206_v13 = vld [vmem:[#allocation2 + $0x11b8] sm:$0xff] }
 0x302   : > { %4331 = vmatprep.mubr.f32.mxu1 %v3170_v57  ;;  %v3199_v57 = vld [vmem:[#allocation2 + $0x1180] sm:$0xff] }
 0x303   : > { %3662 = vmatmul.mubr.f32.gmra.mrb[220].mxu0 %v3181_v61  ;;  %v2661_v61 = vld [vmem:[#allocation2 + $0xb0] sm:$0xff] }
 0x304   : > { %3666 = vmatprep.mubr.f32.mxu0 %v3200_v35  ;;  %v2686_v35 = vld [vmem:[#allocation2 + $0x178] sm:$0xff] }
 0x305   : > { %4332 = vmatmul.mubr.f32.gmra.mrb[186].mxu1 %v3169_v19  ;;  %v2643_v19 = vld [vmem:[#allocation2 + $0x20] sm:$0xff] }
 0x306   : > { %4336 = vmatprep.mubr.f32.mxu1 %v3188_v39  ;;  %v2662_v39 = vld [vmem:[#allocation2 + $0xb8] sm:$0xff] }
 0x307   : > { %3667 = vmatmul.mubr.f32.gmra.mrb[222].mxu0 %v3199_v57  ;;  %v2704_v57 = vld [vmem:[#allocation2 + $0x208] sm:$0xff] }
 0x308   : > { %3736 = vmatprep.mubr.f32.mxu0 %v2644_v62  ;;  %v2680_v62 = vld [vmem:[#allocation2 + $0x148] sm:$0xff] }
 0x309   : > { %4337 = vmatmul.mubr.f32.gmra.mrb[188].mxu1 %v3187_v51  ;;  %v2667_v51 = vld [vmem:[#allocation2 + $0xe0] sm:$0xff] }
 0x30a   : > { %4341 = vmatprep.mubr.f32.mxu1 %v3206_v13  ;;  %v2679_v13 = vld [vmem:[#allocation2 + $0x140] sm:$0xff] }
 0x30b   : > { %3737 = vmatmul.mubr.f32.vlgmr.msra.gmra.mrb[160].mxu0 %v2643_v19  ;;  %v2758_v19 = vld [vmem:[#allocation2 + $0x3b8] sm:$0xff] }
 0x30c   : > { %3741 = vmatprep.mubr.f32.mxu0 %v2662_v39  ;;  %v2776_v39 = vld [vmem:[#allocation2 + $0x448] sm:$0xff] }
 0x30d   : > { %4342 = vmatmul.mubr.f32.gmra.mrb[190].mxu1 %v3205_v22  ;;  %v2685_v22 = vld [vmem:[#allocation2 + $0x170] sm:$0xff] }
 0x30e   : > { %4411 = vmatprep.mubr.f32.mxu1 %v2650_v20  ;;  %v2740_v20 = vld [vmem:[#allocation2 + $0x328] sm:$0xff] }
 0x30f   : > { %3742 = vmatmul.mubr.f32.gmra.mrb[162].mxu0 %v2661_v61  ;;  %v2794_v61 = vld [vmem:[#allocation2 + $0x4d8] sm:$0xff] }
 0x310   : > { %3746 = vmatprep.mubr.f32.mxu0 %v2680_v62  ;;  %v2787_v62 = vld [vmem:[#allocation2 + $0x4a0] sm:$0xff] }
 0x311   : > { %4412 = vmatmul.mubr.f32.vlgmr.msra.gmra.mrb[128].mxu1 %v2649_v4  ;;  %v2751_v4 = vld [vmem:[#allocation2 + $0x380] sm:$0xff] }
 0x312   : > { %9603 = vmatpush1.bf16.msra.mxu1 %v9602_v12  ;;  %4416 = vmatprep.mubr.f32.mxu1 %v2668_v53  ;;  %v2697_v12 = vld [vmem:[#allocation2 + $0x1d0] sm:$0xff]  ;;  %v2722_v53 = vld [vmem:[#allocation2 + $0x298] sm:$0xff] }
 0x313   : > { %9604 = vmatprep.subr.bf16.mxu1 %v13647_v10  ;;  %3747 = vmatmul.mubr.f32.gmra.mrb[164].mxu0 %v2679_v13  ;;  %v13787_v13 = vpack.c.bf16 %v12647_v49, %v12650_v31  ;;  %v2842_v49 = vld [vmem:[#allocation2 + $0x658] sm:$0xff]  ;;  %v2847_v31 = vld [vmem:[#allocation2 + $0x680] sm:$0xff] }
 0x314   : > { %3751 = vmatprep.mubr.f32.mxu0 %v2698_v9  ;;  %v2830_v9 = vld [vmem:[#allocation2 + $0x5f8] sm:$0xff] }
 0x315   : > { %4417 = vmatmul.mubr.f32.gmra.mrb[130].mxu1 %v2667_v51  ;;  %v2769_v51 = vld [vmem:[#allocation2 + $0x410] sm:$0xff] }
 0x316   : > { %4421 = vmatprep.mubr.f32.mxu1 %v2686_v35  ;;  %9606 = vmatpush1.bf16.msra.mxu1 %v9605_v54  ;;  %v2715_v54 = vld [vmem:[#allocation2 + $0x260] sm:$0xff]  ;;  %v13786_v35 = vpack.c.bf16 %v12633_v28, %v12636_v11  ;;  %v2824_v28 = vld [vmem:[#allocation2 + $0x5c8] sm:$0xff]  ;;  %v2829_v11 = vld [vmem:[#allocation2 + $0x5f0] sm:$0xff] }
 0x317   : > { %9607 = vmatprep.subr.bf16.mxu1 %v13647_v10  ;;  %3752 = vmatmul.mubr.f32.gmra.mrb[166].mxu0 %v2697_v12  ;;  %v2823_v12 = vld [vmem:[#allocation2 + $0x5c0] sm:$0xff] }
 0x318   : > { %3756 = vmatprep.mubr.f32.mxu0 %v2716_v50  ;;  %v13789_v50 = vpack.c.bf16 %v12664_v24, %v12666_v1  ;;  %v2878_v24 = vld [vmem:[#allocation2 + $0x778] sm:$0xff]  ;;  %v2883_v1 = vld [vmem:[#allocation2 + $0x7a0] sm:$0xff] }
 0x319   : > { %4422 = vmatmul.mubr.f32.gmra.mrb[132].mxu1 %v2685_v22  ;;  %v2812_v22 = vld [vmem:[#allocation2 + $0x568] sm:$0xff] }
 0x31a   : > { %4426 = vmatprep.mubr.f32.mxu1 %v2704_v57  ;;  %9609 = vmatpush1.bf16.msra.mxu1 %v9608_v14  ;;  %v2733_v14 = vld [vmem:[#allocation2 + $0x2f0] sm:$0xff] }
 0x31b   : > { %9610 = vmatprep.subr.bf16.mxu1 %v13647_v10  ;;  %3757 = vmatmul.mubr.f32.gmra.mrb[168].mxu0 %v2715_v54  ;;  %v2805_v57 = vld [vmem:[#allocation2 + $0x530] sm:$0xff]  ;;  %v2866_v54 = vld [vmem:[#allocation2 + $0x718] sm:$0xff] }
 0x31c   : > { %3761 = vmatprep.mubr.f32.mxu0 %v2734_v23  ;;  %v2859_v23 = vld [vmem:[#allocation2 + $0x6e0] sm:$0xff] }
 0x31d   : > { %4427 = vmatmul.mubr.f32.gmra.mrb[134].mxu1 %v2703_v21  ;;  %v13788_v21 = vpack.c.bf16 %v12658_v38, %v12660_v8  ;;  %v2860_v38 = vld [vmem:[#allocation2 + $0x6e8] sm:$0xff]  ;;  %v2865_v8 = vld [vmem:[#allocation2 + $0x710] sm:$0xff] }
 0x31e   : > { %4431 = vmatprep.mubr.f32.mxu1 %v2722_v53  ;;  %9612 = vmatpush1.bf16.msra.mxu1 %v9611_v52  ;;  %v13784_v52 = vpack.c.bf16 %v12598_v2, %v12605_v27  ;;  %v2788_v2 = vld [vmem:[#allocation2 + $0x4a8] sm:$0xff]  ;;  %v2793_v27 = vld [vmem:[#allocation2 + $0x4d0] sm:$0xff] }
 0x31f   : > { %9613 = vmatprep.subr.bf16.mxu1 %v13647_v10  ;;  %3762 = vmatmul.mubr.f32.gmra.mrb[170].mxu0 %v2733_v14  ;;  %v2848_v53 = vld [vmem:[#allocation2 + $0x688] sm:$0xff]  ;;  %v13791_v14 = vpack.c.bf16 %v12676_v0, %v12678_v40  ;;  %v2914_v0 = vld [vmem:[#allocation2 + $0x898] sm:$0xff]  ;;  %v2919_v40 = vld [vmem:[#allocation2 + $0x8c0] sm:$0xff] }
 0x320   : > { %3766 = vmatprep.mubr.f32.mxu0 %v2752_v56  ;;  %v2902_v56 = vld [vmem:[#allocation2 + $0x838] sm:$0xff] }
 0x321   : > { %4432 = vmatmul.mubr.f32.gmra.mrb[136].mxu1 %v2721_v25  ;;  %v2841_v25 = vld [vmem:[#allocation2 + $0x650] sm:$0xff] }
 0x322   : > { %4436 = vmatprep.mubr.f32.mxu1 %v2740_v20  ;;  %9615 = vmatpush1.bf16.msra.mxu1 %v9614_v16  ;;  %v13785_v16 = vpack.c.bf16 %v12619_v37, %v12622_v55  ;;  %v2806_v37 = vld [vmem:[#allocation2 + $0x538] sm:$0xff]  ;;  %v2811_v55 = vld [vmem:[#allocation2 + $0x560] sm:$0xff]  ;;  %v13790_v20 = vpack.c.bf16 %v12670_v34, %v12672_v63  ;;  %v2896_v34 = vld [vmem:[#allocation2 + $0x808] sm:$0xff] }
 0x323   : > { %9616 = vmatprep.subr.bf16.mxu1 %v13647_v10  ;;  %3767 = vmatmul.mubr.f32.gmra.mrb[172].mxu0 %v2751_v4  ;;  %v2901_v63 = vld [vmem:[#allocation2 + $0x830] sm:$0xff]  ;;  %v2920_v4 = vld [vmem:[#allocation2 + $0x8c8] sm:$0xff] }
 0x324   : > { %3771 = vmatprep.mubr.f32.mxu0 %v2770_v44  ;;  %v2913_v44 = vld [vmem:[#allocation2 + $0x890] sm:$0xff] }
 0x325   : > { %4437 = vmatmul.mubr.f32.gmra.mrb[138].mxu1 %v2739_v29  ;;  %v2884_v29 = vld [vmem:[#allocation2 + $0x7a8] sm:$0xff] }
 0x326   : > { %4441 = vmatprep.mubr.f32.mxu1 %v2758_v19  ;;  %9618 = vmatpush1.bf16.msra.mxu1 %v13784_v52  ;;  %v2877_v19 = vld [vmem:[#allocation2 + $0x770] sm:$0xff]  ;;  %v2895_v52 = vld [vmem:[#allocation2 + $0x800] sm:$0xff] }
 0x327   : > { %9619 = vmatprep.subr.bf16.mxu1 %v13647_v10  ;;  %3772 = vmatmul.mubr.f32.gmra.mrb[174].mxu0 %v2769_v51  ;;  %v2950_v51 = vld [vmem:[#allocation2 + $0x9b8] sm:$0xff] }
 0x328   : > { %3776 = vmatprep.mubr.f32.mxu0 %v2788_v2  ;;  %v2968_v2 = vld [vmem:[#allocation2 + $0xa48] sm:$0xff] }
 0x329   : > { %4442 = vmatmul.mubr.f32.gmra.mrb[140].mxu1 %v2757_v33  ;;  %v13792_v33 = vpack.c.bf16 %v12682_v7, %v12684_v46  ;;  %v2932_v7 = vld [vmem:[#allocation2 + $0x928] sm:$0xff]  ;;  %v2937_v46 = vld [vmem:[#allocation2 + $0x950] sm:$0xff] }
 0x32a   : > { %4446 = vmatprep.mubr.f32.mxu1 %v2776_v39  ;;  %9621 = vmatpush1.bf16.msra.mxu1 %v13785_v16  ;;  %v13793_v39 = vpack.c.bf16 %v12688_v5, %v12690_v6  ;;  %v2931_v16 = vld [vmem:[#allocation2 + $0x920] sm:$0xff]  ;;  %v2949_v5 = vld [vmem:[#allocation2 + $0x9b0] sm:$0xff] }
 0x32b   : > { %9622 = vmatprep.subr.bf16.mxu1 %v13647_v10  ;;  %3777 = vmatmul.mubr.f32.gmra.mrb[176].mxu0 %v2787_v62  ;;  %v2955_v6 = vld [vmem:[#allocation2 + $0x9e0] sm:$0xff]  ;;  %v2985_v62 = vld [vmem:[#allocation2 + $0xad0] sm:$0xff] }
 0x32c   : > { %3781 = vmatprep.mubr.f32.mxu0 %v2806_v37  ;;  %v3004_v37 = vld [vmem:[#allocation2 + $0xb68] sm:$0xff] }
 0x32d   : > { %4447 = vmatmul.mubr.f32.gmra.mrb[142].mxu1 %v2775_v58  ;;  %v2938_v58 = vld [vmem:[#allocation2 + $0x958] sm:$0xff] }
 0x32e   : > { %4451 = vmatprep.mubr.f32.mxu1 %v2794_v61  ;;  %9624 = vmatpush1.bf16.msra.mxu1 %v13786_v35  ;;  %v2956_v61 = vld [vmem:[#allocation2 + $0x9e8] sm:$0xff]  ;;  %v2967_v35 = vld [vmem:[#allocation2 + $0xa40] sm:$0xff] }
 0x32f   : > { %9625 = vmatprep.subr.bf16.mxu1 %v13647_v10  ;;  %3782 = vmatmul.mubr.f32.gmra.mrb[178].mxu0 %v2805_v57  ;;  %v3009_v57 = vld [vmem:[#allocation2 + $0xb90] sm:$0xff] }
 0x330   : > { %3786 = vmatprep.mubr.f32.mxu0 %v2824_v28  ;;  %v3028_v28 = vld [vmem:[#allocation2 + $0xc28] sm:$0xff] }
 0x331   : > { %4452 = vmatmul.mubr.f32.gmra.mrb[144].mxu1 %v2793_v27  ;;  %v2974_v27 = vld [vmem:[#allocation2 + $0xa78] sm:$0xff] }
 0x332   : > { %4456 = vmatprep.mubr.f32.mxu1 %v2812_v22  ;;  %9627 = vmatpush1.bf16.msra.mxu1 %v13787_v13  ;;  %v2991_v22 = vld [vmem:[#allocation2 + $0xb00] sm:$0xff] }
 0x333   : > { %9628 = vmatprep.subr.bf16.mxu1 %v13647_v10  ;;  %3787 = vmatmul.mubr.f32.gmra.mrb[180].mxu0 %v2823_v12  ;;  %v3003_v13 = vld [vmem:[#allocation2 + $0xb60] sm:$0xff]  ;;  %v3040_v12 = vld [vmem:[#allocation2 + $0xc88] sm:$0xff] }
 0x334   : > { %3791 = vmatprep.mubr.f32.mxu0 %v2842_v49  ;;  %v3039_v49 = vld [vmem:[#allocation2 + $0xc80] sm:$0xff] }
 0x335   : > { %4457 = vmatmul.mubr.f32.gmra.mrb[146].mxu1 %v2811_v55  ;;  %v3010_v55 = vld [vmem:[#allocation2 + $0xb98] sm:$0xff] }
 0x336   : > { %4461 = vmatprep.mubr.f32.mxu1 %v2830_v9  ;;  %9630 = vmatpush1.bf16.msra.mxu1 %v13788_v21  ;;  %v3022_v9 = vld [vmem:[#allocation2 + $0xbf8] sm:$0xff]  ;;  %v3027_v21 = vld [vmem:[#allocation2 + $0xc20] sm:$0xff] }
 0x337   : > { %9631 = vmatprep.subr.bf16.mxu1 %v13647_v10  ;;  %3792 = vmatmul.mubr.f32.gmra.mrb[182].mxu0 %v2841_v25  ;;  %v3064_v25 = vld [vmem:[#allocation2 + $0xd48] sm:$0xff] }
 0x338   : > { %3796 = vmatprep.mubr.f32.mxu0 %v2860_v38  ;;  %v3063_v38 = vld [vmem:[#allocation2 + $0xd40] sm:$0xff] }
 0x339   : > { %4462 = vmatmul.mubr.f32.gmra.mrb[148].mxu1 %v2829_v11  ;;  %v3021_v11 = vld [vmem:[#allocation2 + $0xbf0] sm:$0xff] }
 0x33a   : > { %4466 = vmatprep.mubr.f32.mxu1 %v2848_v53  ;;  %9633 = vmatpush1.bf16.msra.mxu1 %v13789_v50  ;;  %v3046_v53 = vld [vmem:[#allocation2 + $0xcb8] sm:$0xff] }
 0x33b   : > { %9634 = vmatprep.subr.bf16.mxu1 %v13647_v10  ;;  %3797 = vmatmul.mubr.f32.gmra.mrb[184].mxu0 %v2859_v23  ;;  %v3058_v50 = vld [vmem:[#allocation2 + $0xd18] sm:$0xff]  ;;  %v3075_v23 = vld [vmem:[#allocation2 + $0xda0] sm:$0xff] }
 0x33c   : > { %3801 = vmatprep.mubr.f32.mxu0 %v2878_v24  ;;  %v3094_v24 = vld [vmem:[#allocation2 + $0xe38] sm:$0xff] }
 0x33d   : > { %4467 = vmatmul.mubr.f32.gmra.mrb[150].mxu1 %v2847_v31  ;;  %v3045_v31 = vld [vmem:[#allocation2 + $0xcb0] sm:$0xff] }
 0x33e   : > { %4471 = vmatprep.mubr.f32.mxu1 %v2866_v54  ;;  %9636 = vmatpush1.bf16.msra.mxu1 %v13790_v20  ;;  %v3057_v54 = vld [vmem:[#allocation2 + $0xd10] sm:$0xff]  ;;  %v3082_v20 = vld [vmem:[#allocation2 + $0xdd8] sm:$0xff] }
 0x33f   : > { %9637 = vmatprep.subr.bf16.mxu1 %v13647_v10  ;;  %3802 = vmatmul.mubr.f32.gmra.mrb[186].mxu0 %v2877_v19  ;;  %v3099_v19 = vld [vmem:[#allocation2 + $0xe60] sm:$0xff] }
 0x340   : > { %3806 = vmatprep.mubr.f32.mxu0 %v2896_v34  ;;  %v3118_v34 = vld [vmem:[#allocation2 + $0xef8] sm:$0xff] }
 0x341   : > { %4472 = vmatmul.mubr.f32.gmra.mrb[152].mxu1 %v2865_v8  ;;  %v3076_v8 = vld [vmem:[#allocation2 + $0xda8] sm:$0xff] }
 0x342   : > { %4476 = vmatprep.mubr.f32.mxu1 %v2884_v29  ;;  %9639 = vmatpush1.bf16.msra.mxu1 %v13791_v14  ;;  %v3081_v29 = vld [vmem:[#allocation2 + $0xdd0] sm:$0xff] }
 0x343   : > { %9640 = vmatprep.subr.bf16.mxu1 %v13647_v10  ;;  %3807 = vmatmul.mubr.f32.gmra.mrb[188].mxu0 %v2895_v52  ;;  %v3093_v14 = vld [vmem:[#allocation2 + $0xe30] sm:$0xff]  ;;  %v3130_v52 = vld [vmem:[#allocation2 + $0xf58] sm:$0xff] }
 0x344   : > { %3811 = vmatprep.mubr.f32.mxu0 %v2914_v0  ;;  %v3129_v0 = vld [vmem:[#allocation2 + $0xf50] sm:$0xff] }
 0x345   : > { %4477 = vmatmul.mubr.f32.gmra.mrb[154].mxu1 %v2883_v1  ;;  %v3100_v1 = vld [vmem:[#allocation2 + $0xe68] sm:$0xff] }
 0x346   : > { %4481 = vmatprep.mubr.f32.mxu1 %v2902_v56  ;;  %9642 = vmatpush1.bf16.msra.mxu1 %v13792_v33  ;;  %v3112_v56 = vld [vmem:[#allocation2 + $0xec8] sm:$0xff]  ;;  %v3117_v33 = vld [vmem:[#allocation2 + $0xef0] sm:$0xff] }
 0x347   : > { %9643 = vmatprep.subr.bf16.mxu1 %v13647_v10  ;;  %3812 = vmatmul.mubr.f32.gmra.mrb[190].mxu0 %v2913_v44  ;;  %v3154_v44 = vld [vmem:[#allocation2 + $0x1018] sm:$0xff] }
 0x348   : > { %3816 = vmatprep.mubr.f32.mxu0 %v2932_v7  ;;  %v3153_v7 = vld [vmem:[#allocation2 + $0x1010] sm:$0xff] }
 0x349   : > { %4482 = vmatmul.mubr.f32.gmra.mrb[156].mxu1 %v2901_v63  ;;  %v3111_v63 = vld [vmem:[#allocation2 + $0xec0] sm:$0xff] }
 0x34a   : > { %4486 = vmatprep.mubr.f32.mxu1 %v2920_v4  ;;  %9645 = vmatpush1.bf16.msra.mxu1 %v13793_v39  ;;  %v3136_v4 = vld [vmem:[#allocation2 + $0xf88] sm:$0xff] }
 0x34b   : > { %9646 = vmatprep.subr.bf16.mxu1 %v13647_v10  ;;  %3817 = vmatmul.mubr.f32.gmra.mrb[192].mxu0 %v2931_v16  ;;  %v3148_v39 = vld [vmem:[#allocation2 + $0xfe8] sm:$0xff] }
 0x34c   : > { %3821 = vmatprep.mubr.f32.mxu0 %v2950_v51  ;;  %v3172_v16 = vld [vmem:[#allocation2 + $0x10a8] sm:$0xff]  ;;  %v3165_v51 = vld [vmem:[#allocation2 + $0x1070] sm:$0xff] }
 0x34d   : > { %4487 = vmatmul.mubr.f32.gmra.mrb[158].mxu1 %v2919_v40  ;;  %v3135_v40 = vld [vmem:[#allocation2 + $0xf80] sm:$0xff] }
 0x34e   : > { %4491 = vmatprep.mubr.f32.mxu1 %v2938_v58  ;;  %9648 = vmatpush1.bf16.msra.mxu1 %v9647_v18  ;;  %v2992_v18 = vld [vmem:[#allocation2 + $0xb08] sm:$0xff]  ;;  %v3147_v58 = vld [vmem:[#allocation2 + $0xfe0] sm:$0xff] }
 0x34f   : > { %9649 = vmatprep.subr.bf16.mxu1 %v13647_v10  ;;  %3822 = vmatmul.mubr.f32.gmra.mrb[194].mxu0 %v2949_v5  ;;  %v3184_v5 = vld [vmem:[#allocation2 + $0x1108] sm:$0xff] }
 0x350   : > { %3826 = vmatprep.mubr.f32.mxu0 %v2968_v2  ;;  %v3183_v2 = vld [vmem:[#allocation2 + $0x1100] sm:$0xff] }
 0x351   : > { %4492 = vmatmul.mubr.f32.gmra.mrb[160].mxu1 %v2937_v46  ;;  %v3166_v46 = vld [vmem:[#allocation2 + $0x1078] sm:$0xff] }
 0x352   : > { %4496 = vmatprep.mubr.f32.mxu1 %v2956_v61  ;;  %v3171_v61 = vld [vmem:[#allocation2 + $0x10a0] sm:$0xff] }
 0x353   : > { %3827 = vmatmul.mubr.f32.gmra.mrb[196].mxu0 %v2967_v35  ;;  %v3202_v35 = vld [vmem:[#allocation2 + $0x1198] sm:$0xff] }
 0x354   : > { %3831 = vmatprep.mubr.f32.mxu0 %v2986_v32  ;;  %v3201_v32 = vld [vmem:[#allocation2 + $0x1190] sm:$0xff] }
 0x355   : > { %4497 = vmatmul.mubr.f32.gmra.mrb[162].mxu1 %v2955_v6  ;;  %v3190_v6 = vld [vmem:[#allocation2 + $0x1138] sm:$0xff] }
 0x356   : > { %4501 = vmatprep.mubr.f32.mxu1 %v2974_v27  ;;  %v3189_v27 = vld [vmem:[#allocation2 + $0x1130] sm:$0xff] }
 0x357   : > { %3832 = vmatmul.mubr.f32.gmra.mrb[198].mxu0 %v2985_v62  ;;  %v12764_v62 = vpop.f32.mrb[128].mxu0 }
 0x358   : > { %3836 = vmatprep.mubr.f32.mxu0 %v3004_v37  ;;  %v12766_v37 = vpop.f32.mrb[129].mxu0 }
 0x359   : > { %4502 = vmatmul.mubr.f32.gmra.mrb[164].mxu1 %v2973_v36  ;;  %v3208_v36 = vld [vmem:[#allocation2 + $0x11c8] sm:$0xff] }
 0x35a   : > { %4506 = vmatprep.mubr.f32.mxu1 %v2992_v18  ;;  %v3207_v18 = vld [vmem:[#allocation2 + $0x11c0] sm:$0xff] }
 0x35b   : > { %3837 = vmatmul.mubr.f32.gmra.mrb[200].mxu0 %v3003_v13  ;;  %v9698_v13 = vpack.c.bf16 %v12764_v62, %v12766_v37  ;;  %v2707_v37 = vld [vmem:[#allocation2 + $0x220] sm:$0xff] }
 0x35c   : > { %3841 = vmatprep.mubr.f32.mxu0 %v3022_v9  ;;  %v13794_v9 = vld [vmem:[#allocation41_spill] sm:$0xff] }
 0x35d   : > { %4507 = vmatmul.mubr.f32.gmra.mrb[166].mxu1 %v2991_v22  ;;  %v2652_v22 = vld [vmem:[#allocation2 + $0x68] sm:$0xff] }
 0x35e   : > { %4511 = vmatprep.mubr.f32.mxu1 %v3010_v55  ;;  %v2651_v55 = vld [vmem:[#allocation2 + $0x60] sm:$0xff] }
 0x35f   : > { %3842 = vmatmul.mubr.f32.gmra.mrb[202].mxu0 %v3021_v11 }
 0x360   : > { %3846 = vmatprep.mubr.f32.mxu0 %v3040_v12  ;;  %v12773_v12 = vpop.f32.mrb[130].mxu0 }
 0x361   : > { %4512 = vmatmul.mubr.f32.gmra.mrb[168].mxu1 %v3009_v57  ;;  %v2670_v57 = vld [vmem:[#allocation2 + $0xf8] sm:$0xff] }
 0x362   : > { %4516 = vmatprep.mubr.f32.mxu1 %v3028_v28  ;;  %v13795_v28 = vld [vmem:[#allocation42_spill] sm:$0xff] }
 0x363   : > { %3847 = vmatmul.mubr.f32.gmra.mrb[204].mxu0 %v3039_v49  ;;  %v13796_v11 = vpack.c.bf16 %v13794_v9, %v13795_v28  ;;  %v12776_v49 = vpop.f32.mrb[131].mxu0  ;;  %v13816_v9 = vld [vmem:[#allocation56_spill] sm:$0xff] }
 0x364   : > { %3851 = vmatprep.mubr.f32.mxu0 %v3058_v50  ;;  %v13798_v50 = vld [vmem:[#allocation44_spill] sm:$0xff] }
 0x365   : > { %4517 = vmatmul.mubr.f32.gmra.mrb[170].mxu1 %v3027_v21  ;;  %v2669_v21 = vld [vmem:[#allocation2 + $0xf0] sm:$0xff] }
 0x366   : > { %4521 = vmatprep.mubr.f32.mxu1 %v3046_v53  ;;  %v2688_v53 = vld [vmem:[#allocation2 + $0x188] sm:$0xff] }
 0x367   : > { %3852 = vmatmul.mubr.f32.gmra.mrb[206].mxu0 %v3057_v54  ;;  %v2687_v54 = vld [vmem:[#allocation2 + $0x180] sm:$0xff] }
 0x368   : > { %3856 = vmatprep.mubr.f32.mxu0 %v3076_v8  ;;  %v2706_v8 = vld [vmem:[#allocation2 + $0x218] sm:$0xff] }
 0x369   : > { %4522 = vmatmul.mubr.f32.gmra.mrb[172].mxu1 %v3045_v31  ;;  %v13797_v31 = vld [vmem:[#allocation43_spill] sm:$0xff] }
 0x36a   : > { %4526 = vmatprep.mubr.f32.mxu1 %v3064_v25  ;;  %v13799_v25 = vpack.c.bf16 %v13797_v31, %v13798_v50  ;;  %v13818_v31 = vld [vmem:[#allocation57_spill] sm:$0xff]  ;;  %v13819_v50 = vld [vmem:[#allocation58_spill] sm:$0xff] }
 0x36b   : > { %3857 = vmatmul.mubr.f32.gmra.mrb[208].mxu0 %v3075_v23  ;;  %v13801_v23 = vld [vmem:[#allocation46_spill] sm:$0xff] }
 0x36c   : > { %3861 = vmatprep.mubr.f32.mxu0 %v3094_v24  ;;  %v2705_v24 = vld [vmem:[#allocation2 + $0x210] sm:$0xff] }
 0x36d   : > { %4527 = vmatmul.mubr.f32.gmra.mrb[174].mxu1 %v3063_v38  ;;  %v9701_v38 = vpack.c.bf16 %v12773_v12, %v12776_v49  ;;  %v2725_v49 = vld [vmem:[#allocation2 + $0x2b0] sm:$0xff] }
 0x36e   : > { %4531 = vmatprep.mubr.f32.mxu1 %v3082_v20  ;;  %v13800_v20 = vld [vmem:[#allocation45_spill] sm:$0xff] }
 0x36f   : > { %3862 = vmatmul.mubr.f32.gmra.mrb[210].mxu0 %v3093_v14  ;;  %v2724_v14 = vld [vmem:[#allocation2 + $0x2a8] sm:$0xff] }
 0x370   : > { %3866 = vmatprep.mubr.f32.mxu0 %v3112_v56  ;;  %v13803_v56 = vld [vmem:[#allocation47_spill] sm:$0xff] }
 0x371   : > { %4532 = vmatmul.mubr.f32.gmra.mrb[176].mxu1 %v3081_v29  ;;  %v13802_v29 = vpack.c.bf16 %v13800_v20, %v13801_v23  ;;  %v2832_v20 = vld [vmem:[#allocation2 + $0x608] sm:$0xff] }
 0x372   : > { %4536 = vmatprep.mubr.f32.mxu1 %v3100_v1  ;;  %v12787_v1 = vpop.f32.mrb[132].mxu0 }
 0x373   : > { %3867 = vmatmul.mubr.f32.gmra.mrb[212].mxu0 %v3111_v63 }
 0x374   : > { %3871 = vmatprep.mubr.f32.mxu0 %v3130_v52 }
 0x375   : > { %4537 = vmatmul.mubr.f32.gmra.mrb[178].mxu1 %v3099_v19  ;;  %v12790_v19 = vpop.f32.mrb[133].mxu0 }
 0x376   : > { %4541 = vmatprep.mubr.f32.mxu1 %v3118_v34  ;;  %v13804_v34 = vld [vmem:[#allocation48_spill] sm:$0xff]  ;;  %v9704_v52 = vpack.c.bf16 %v12787_v1, %v12790_v19  ;;  %v2743_v19 = vld [vmem:[#allocation2 + $0x340] sm:$0xff] }
 0x377   : > { %3872 = vmatmul.mubr.f32.gmra.mrb[214].mxu0 %v3129_v0  ;;  %v13805_v63 = vpack.c.bf16 %v13803_v56, %v13804_v34  ;;  %v13806_v0 = vld [vmem:[#allocation49_spill] sm:$0xff] }
 0x378   : > { %3876 = vmatprep.mubr.f32.mxu0 %v3148_v39  ;;  %v2850_v34 = vld [vmem:[#allocation2 + $0x698] sm:$0xff] }
 0x379   : > { %4542 = vmatmul.mubr.f32.gmra.mrb[180].mxu1 %v3117_v33  ;;  %v2723_v33 = vld [vmem:[#allocation2 + $0x2a0] sm:$0xff] }
 0x37a   : > { %4546 = vmatprep.mubr.f32.mxu1 %v3136_v4  ;;  %v2742_v4 = vld [vmem:[#allocation2 + $0x338] sm:$0xff] }
 0x37b   : > { %3877 = vmatmul.mubr.f32.gmra.mrb[216].mxu0 %v3147_v58  ;;  %v12801_v58 = vpop.f32.mrb[134].mxu0 }
 0x37c   : > { %3881 = vmatprep.mubr.f32.mxu0 %v3166_v46  ;;  %v12804_v46 = vpop.f32.mrb[135].mxu0 }
 0x37d   : > { %4547 = vmatmul.mubr.f32.gmra.mrb[182].mxu1 %v3135_v40  ;;  %v13807_v40 = vld [vmem:[#allocation50_spill] sm:$0xff] }
 0x37e   : > { %4551 = vmatprep.mubr.f32.mxu1 %v3154_v44  ;;  %v13808_v39 = vpack.c.bf16 %v13806_v0, %v13807_v40  ;;  %v2741_v44 = vld [vmem:[#allocation2 + $0x330] sm:$0xff]  ;;  %v2868_v0 = vld [vmem:[#allocation2 + $0x728] sm:$0xff] }
 0x37f   : > { %3882 = vmatmul.mubr.f32.gmra.mrb[218].mxu0 %v3165_v51  ;;  %v13810_v51 = vld [vmem:[#allocation52_spill] sm:$0xff] }
 0x380   : > { %3886 = vmatprep.mubr.f32.mxu0 %v3184_v5  ;;  %v2759_v5 = vld [vmem:[#allocation2 + $0x3c0] sm:$0xff] }
 0x381   : > { %4552 = vmatmul.mubr.f32.gmra.mrb[184].mxu1 %v3153_v7  ;;  %v2760_v7 = vld [vmem:[#allocation2 + $0x3c8] sm:$0xff] }
 0x382   : > { %4556 = vmatprep.mubr.f32.mxu1 %v3172_v16  ;;  %v13809_v16 = vld [vmem:[#allocation51_spill] sm:$0xff] }
 0x383   : > { %3887 = vmatmul.mubr.f32.gmra.mrb[220].mxu0 %v3183_v2  ;;  %v2778_v2 = vld [vmem:[#allocation2 + $0x458] sm:$0xff] }
 0x384   : > { %3891 = vmatprep.mubr.f32.mxu0 %v3202_v35  ;;  %v13813_v35 = vld [vmem:[#allocation54_spill] sm:$0xff] }
 0x385   : > { %4557 = vmatmul.mubr.f32.gmra.mrb[186].mxu1 %v3171_v61  ;;  %v13811_v61 = vpack.c.bf16 %v13809_v16, %v13810_v51  ;;  %v13824_v51 = vpack.c.bf16 %v12457_v17, %v12459_v3  ;;  %v2903_v3 = vld [vmem:[#allocation2 + $0x840] sm:$0xff] }
 0x386   : > { %4561 = vmatprep.mubr.f32.mxu1 %v3190_v6  ;;  %v9707_v6 = vpack.c.bf16 %v12801_v58, %v12804_v46  ;;  %v2761_v46 = vld [vmem:[#allocation2 + $0x3d0] sm:$0xff] }
 0x387   : > { %3892 = vmatmul.mubr.f32.gmra.mrb[222].mxu0 %v3201_v32  ;;  %v2777_v32 = vld [vmem:[#allocation2 + $0x450] sm:$0xff] }
 0x389   : > { %4562 = vmatmul.mubr.f32.gmra.mrb[188].mxu1 %v3189_v27  ;;  %v13812_v27 = vld [vmem:[#allocation53_spill] sm:$0xff] }
 0x38a   : > { %4566 = vmatprep.mubr.f32.mxu1 %v3208_v36  ;;  %v13814_v36 = vpack.c.bf16 %v13812_v27, %v13813_v35  ;;  %v13825_v27 = vld [vmem:[#allocation59_spill] sm:$0xff] }
 0x38b   : > { %v13826_v35 = vpack.c.bf16 %v12467_v30, %v13825_v27  ;;  %v2921_v30 = vld [vmem:[#allocation2 + $0x8d0] sm:$0xff]  ;;  %v3011_v27 = vld [vmem:[#allocation2 + $0xba0] sm:$0xff] }
 0x38d   : > { %4567 = vmatmul.mubr.f32.gmra.mrb[190].mxu1 %v3207_v18  ;;  %v12815_v18 = vpop.f32.mrb[136].mxu0 }
 0x38e   : > { %4636 = vmatprep.mubr.f32.mxu1 %v2652_v22  ;;  %v2796_v22 = vld [vmem:[#allocation2 + $0x4e8] sm:$0xff] }
 0x391   : > { %4637 = vmatmul.mubr.f32.vlgmr.msra.gmra.mrb[128].mxu1 %v2651_v55  ;;  %v12818_v55 = vpop.f32.mrb[137].mxu0 }
 0x392   : > { %9651 = vmatpush1.bf16.msra.mxu1 %v13796_v11  ;;  %4641 = vmatprep.mubr.f32.mxu1 %v2670_v57  ;;  %v13815_v57 = vld [vmem:[#allocation55_spill] sm:$0xff] }
 0x393   : > { %9652 = vmatprep.subr.bf16.mxu1 %v13647_v10  ;;  %v13817_v28 = vpack.c.bf16 %v13815_v57, %v13816_v9  ;;  %v2795_v11 = vld [vmem:[#allocation2 + $0x4e0] sm:$0xff]  ;;  %v13827_v57 = vpack.c.bf16 %v12477_v45, %v12479_v26 }
 0x394   : > { %v2939_v45 = vld [vmem:[#allocation2 + $0x960] sm:$0xff] }
 0x395   : > { %4642 = vmatmul.mubr.f32.gmra.mrb[130].mxu1 %v2669_v21  ;;  %v9710_v21 = vpack.c.bf16 %v12815_v18, %v12818_v55  ;;  %v2779_v55 = vld [vmem:[#allocation2 + $0x460] sm:$0xff] }
 0x396   : > { %9654 = vmatpush1.bf16.msra.mxu1 %v13799_v25  ;;  %4646 = vmatprep.mubr.f32.mxu1 %v2688_v53  ;;  %v2814_v53 = vld [vmem:[#allocation2 + $0x578] sm:$0xff]  ;;  %v13820_v25 = vpack.c.bf16 %v13818_v31, %v13819_v50  ;;  %v13828_v31 = vpack.c.bf16 %v12487_v59, %v12491_v15  ;;  %v2976_v59 = vld [vmem:[#allocation2 + $0xa88] sm:$0xff] }
 0x397   : > { %9655 = vmatprep.subr.bf16.mxu1 %v13647_v10 }
 0x399   : > { %4647 = vmatmul.mubr.f32.gmra.mrb[132].mxu1 %v2687_v54  ;;  %v2813_v54 = vld [vmem:[#allocation2 + $0x570] sm:$0xff] }
 0x39a   : > { %9657 = vmatpush1.bf16.msra.mxu1 %v13802_v29  ;;  %4651 = vmatprep.mubr.f32.mxu1 %v2706_v8  ;;  %v12829_v8 = vpop.f32.mrb[138].mxu0  ;;  %v13821_v29 = vpack.c.bf16 %v12435_v43, %v12437_v60  ;;  %v2849_v43 = vld [vmem:[#allocation2 + $0x690] sm:$0xff] }
 0x39b   : > { %9658 = vmatprep.subr.bf16.mxu1 %v13647_v10  ;;  %v12832_v23 = vpop.f32.mrb[139].mxu0 }
 0x39c   : > { %v12839_v56 = vpop.f32.mrb[140].mxu0 }
 0x39d   : > { %4652 = vmatmul.mubr.f32.gmra.mrb[134].mxu1 %v2705_v24  ;;  %v2831_v24 = vld [vmem:[#allocation2 + $0x600] sm:$0xff] }
 0x39e   : > { %9660 = vmatpush1.bf16.msra.mxu1 %v13805_v63  ;;  %4656 = vmatprep.mubr.f32.mxu1 %v2724_v14  ;;  %v9713_v14 = vpack.c.bf16 %v12829_v8, %v12832_v23  ;;  %v12842_v63 = vpop.f32.mrb[141].mxu0  ;;  %v2797_v23 = vld [vmem:[#allocation2 + $0x4f0] sm:$0xff] }
 0x39f   : > { %9661 = vmatprep.subr.bf16.mxu1 %v13647_v10  ;;  %v9716_v60 = vpack.c.bf16 %v12839_v56, %v12842_v63  ;;  %v2815_v63 = vld [vmem:[#allocation2 + $0x580] sm:$0xff] }
 0x3a1   : > { %4657 = vmatmul.mubr.f32.gmra.mrb[136].mxu1 %v2723_v33  ;;  %v13822_v33 = vpack.c.bf16 %v12441_v42, %v12443_v41  ;;  %v2867_v42 = vld [vmem:[#allocation2 + $0x720] sm:$0xff] }
 0x3a2   : > { %9663 = vmatpush1.bf16.msra.mxu1 %v13808_v39  ;;  %4661 = vmatprep.mubr.f32.mxu1 %v2742_v4  ;;  %v12849_v4 = vpop.f32.mrb[142].mxu0  ;;  %v13823_v39 = vpack.c.bf16 %v12447_v47, %v12449_v48  ;;  %v2885_v47 = vld [vmem:[#allocation2 + $0x7b0] sm:$0xff] }
 0x3a3   : > { %9664 = vmatprep.subr.bf16.mxu1 %v13647_v10  ;;  %v12852_v40 = vpop.f32.mrb[143].mxu0 }
 0x3a4   : > { %v9719_v41 = vpack.c.bf16 %v12849_v4, %v12852_v40  ;;  %v2833_v40 = vld [vmem:[#allocation2 + $0x610] sm:$0xff] }
 0x3a5   : > { %4662 = vmatmul.mubr.f32.gmra.mrb[138].mxu1 %v2741_v44  ;;  %v12859_v44 = vpop.f32.mrb[144].mxu0 }
 0x3a6   : > { %9666 = vmatpush1.bf16.msra.mxu1 %v13811_v61  ;;  %4666 = vmatprep.mubr.f32.mxu1 %v2760_v7  ;;  %v2886_v7 = vld [vmem:[#allocation2 + $0x7b8] sm:$0xff]  ;;  %v12862_v16 = vpop.f32.mrb[145].mxu0 }
 0x3a7   : > { %9667 = vmatprep.subr.bf16.mxu1 %v13647_v10  ;;  %v9722_v48 = vpack.c.bf16 %v12859_v44, %v12862_v16  ;;  %v12869_v61 = vpop.f32.mrb[146].mxu0  ;;  %v2851_v16 = vld [vmem:[#allocation2 + $0x6a0] sm:$0xff] }
 0x3a9   : > { %4667 = vmatmul.mubr.f32.gmra.mrb[140].mxu1 %v2759_v5  ;;  %v2904_v5 = vld [vmem:[#allocation2 + $0x848] sm:$0xff] }
 0x3aa   : > { %9669 = vmatpush1.bf16.msra.mxu1 %v13814_v36  ;;  %4671 = vmatprep.mubr.f32.mxu1 %v2778_v2  ;;  %v12872_v2 = vpop.f32.mrb[147].mxu0 }
 0x3ab   : > { %9670 = vmatprep.subr.bf16.mxu1 %v13647_v10  ;;  %v12879_v36 = vpop.f32.mrb[148].mxu0 }
 0x3ad   : > { %4672 = vmatmul.mubr.f32.gmra.mrb[142].mxu1 %v2777_v32  ;;  %v2922_v32 = vld [vmem:[#allocation2 + $0x8d8] sm:$0xff] }
 0x3ae   : > { %9672 = vmatpush1.bf16.msra.mxu1 %v13817_v28  ;;  %4676 = vmatprep.mubr.f32.mxu1 %v2796_v22  ;;  %v12882_v22 = vpop.f32.mrb[149].mxu0 }
 0x3af   : > { %9673 = vmatprep.subr.bf16.mxu1 %v13647_v10  ;;  %v12889_v28 = vpop.f32.mrb[150].mxu0 }
 0x3b1   : > { %4677 = vmatmul.mubr.f32.gmra.mrb[144].mxu1 %v2795_v11  ;;  %v2940_v11 = vld [vmem:[#allocation2 + $0x968] sm:$0xff] }
 0x3b2   : > { %9675 = vmatpush1.bf16.msra.mxu1 %v13820_v25  ;;  %4681 = vmatprep.mubr.f32.mxu1 %v2814_v53  ;;  %v12892_v53 = vpop.f32.mrb[151].mxu0  ;;  %v2958_v25 = vld [vmem:[#allocation2 + $0x9f8] sm:$0xff] }
 0x3b3   : > { %9676 = vmatprep.subr.bf16.mxu1 %v13647_v10  ;;  %v12899_v50 = vpop.f32.mrb[152].mxu0 }
 0x3b5   : > { %4682 = vmatmul.mubr.f32.gmra.mrb[146].mxu1 %v2813_v54  ;;  %v12902_v54 = vpop.f32.mrb[153].mxu0 }
 0x3b6   : > { %9678 = vmatpush1.bf16.msra.mxu1 %v13821_v29  ;;  %4686 = vmatprep.mubr.f32.mxu1 %v2832_v20  ;;  %v2957_v20 = vld [vmem:[#allocation2 + $0x9f0] sm:$0xff]  ;;  %v12906_v15 = vpop.f32.mrb[154].mxu0 }
 0x3b7   : > { %9679 = vmatprep.subr.bf16.mxu1 %v13647_v10 }
 0x3b9   : > { %4687 = vmatmul.mubr.f32.gmra.mrb[148].mxu1 %v2831_v24  ;;  %v12908_v24 = vpop.f32.mrb[155].mxu0 }
 0x3ba   : > { %9681 = vmatpush1.bf16.msra.mxu1 %v13822_v33  ;;  %4691 = vmatprep.mubr.f32.mxu1 %v2850_v34  ;;  %v2975_v34 = vld [vmem:[#allocation2 + $0xa80] sm:$0xff] }
 0x3bb   : > { %9682 = vmatprep.subr.bf16.mxu1 %v13647_v10 }
 0x3bd   : > { %4692 = vmatmul.mubr.f32.gmra.mrb[150].mxu1 %v2849_v43  ;;  %v12912_v43 = vpop.f32.mrb[156].mxu0 }
 0x3be   : > { %9684 = vmatpush1.bf16.msra.mxu1 %v13823_v39  ;;  %4696 = vmatprep.mubr.f32.mxu1 %v2868_v0  ;;  %v2994_v0 = vld [vmem:[#allocation2 + $0xb18] sm:$0xff]  ;;  %v12914_v39 = vpop.f32.mrb[157].mxu0 }
 0x3bf   : > { %9685 = vmatprep.subr.bf16.mxu1 %v13647_v10 }
 0x3c1   : > { %4697 = vmatmul.mubr.f32.gmra.mrb[152].mxu1 %v2867_v42  ;;  %v2993_v42 = vld [vmem:[#allocation2 + $0xb10] sm:$0xff] }
 0x3c2   : > { %9687 = vmatpush1.bf16.msra.mxu1 %v13824_v51  ;;  %4701 = vmatprep.mubr.f32.mxu1 %v2886_v7  ;;  %v12918_v51 = vpop.f32.mrb[158].mxu0 }
 0x3c3   : > { %9688 = vmatprep.subr.bf16.mxu1 %v13647_v10 }
 0x3c5   : > { %4702 = vmatmul.mubr.f32.gmra.mrb[154].mxu1 %v2885_v47  ;;  %v3012_v47 = vld [vmem:[#allocation2 + $0xba8] sm:$0xff] }
 0x3c6   : > { %9690 = vmatpush1.bf16.msra.mxu1 %v13826_v35  ;;  %4706 = vmatprep.mubr.f32.mxu1 %v2904_v5  ;;  %v12920_v5 = vpop.f32.mrb[159].mxu0 }
 0x3c7   : > { %9691 = vmatprep.subr.bf16.mxu1 %v13647_v10 }
 0x3c9   : > { %4707 = vmatmul.mubr.f32.gmra.mrb[156].mxu1 %v2903_v3  ;;  %v3030_v3 = vld [vmem:[#allocation2 + $0xc38] sm:$0xff] }
 0x3ca   : > { %9693 = vmatpush1.bf16.msra.mxu1 %v13827_v57  ;;  %4711 = vmatprep.mubr.f32.mxu1 %v2922_v32  ;;  %v3029_v32 = vld [vmem:[#allocation2 + $0xc30] sm:$0xff] }
 0x3cb   : > { %9694 = vmatprep.subr.bf16.mxu1 %v13647_v10 }
 0x3cd   : > { %4712 = vmatmul.mubr.f32.gmra.mrb[158].mxu1 %v2921_v30  ;;  %v3048_v30 = vld [vmem:[#allocation2 + $0xcc8] sm:$0xff] }
 0x3ce   : > { %9696 = vmatpush1.bf16.msra.mxu1 %v13828_v31  ;;  %4716 = vmatprep.mubr.f32.mxu1 %v2940_v11  ;;  %v3047_v31 = vld [vmem:[#allocation2 + $0xcc0] sm:$0xff] }
 0x3cf   : > { %9697 = vmatprep.subr.bf16.mxu1 %v13647_v10 }
 0x3d1   : > { %4717 = vmatmul.mubr.f32.gmra.mrb[160].mxu1 %v2939_v45 }
 0x3d2   : > { %4721 = vmatprep.mubr.f32.mxu1 %v2958_v25  ;;  %v3066_v25 = vld [vmem:[#allocation2 + $0xd58] sm:$0xff] }
 0x3d5   : > { %4722 = vmatmul.mubr.f32.gmra.mrb[162].mxu1 %v2957_v20 }
 0x3d6   : > { %4726 = vmatprep.mubr.f32.mxu1 %v2976_v59  ;;  %v3065_v59 = vld [vmem:[#allocation2 + $0xd50] sm:$0xff] }
 0x3d9   : > { %4727 = vmatmul.mubr.f32.gmra.mrb[164].mxu1 %v2975_v34 }
 0x3da   : > { %4731 = vmatprep.mubr.f32.mxu1 %v2994_v0  ;;  %v3084_v0 = vld [vmem:[#allocation2 + $0xde8] sm:$0xff] }
 0x3dd   : > { %4732 = vmatmul.mubr.f32.gmra.mrb[166].mxu1 %v2993_v42 }
 0x3de   : > { %4736 = vmatprep.mubr.f32.mxu1 %v3012_v47  ;;  %v12924_v57 = vpop.f32.mrb[160].mxu0  ;;  %v3083_v47 = vld [vmem:[#allocation2 + $0xde0] sm:$0xff] }
 0x3df   : > { %v3740_v11 = vpop.f32.mrb[161].mxu0 }
 0x3e1   : > { %4737 = vmatmul.mubr.f32.gmra.mrb[168].mxu1 %v3011_v27 }
 0x3e2   : > { %4741 = vmatprep.mubr.f32.mxu1 %v3030_v3  ;;  %v12926_v45 = vpop.f32.mrb[162].mxu0  ;;  %v3102_v3 = vld [vmem:[#allocation2 + $0xe78] sm:$0xff] }
 0x3e3   : > { %v3745_v20 = vpop.f32.mrb[163].mxu0 }
 0x3e4   : > { %v3120_v20 = vld [vmem:[#allocation2 + $0xf08] sm:$0xff] }
 0x3e5   : > { %4742 = vmatmul.mubr.f32.gmra.mrb[170].mxu1 %v3029_v32 }
 0x3e6   : > { %4746 = vmatprep.mubr.f32.mxu1 %v3048_v30  ;;  %v12928_v34 = vpop.f32.mrb[164].mxu0  ;;  %v3101_v30 = vld [vmem:[#allocation2 + $0xe70] sm:$0xff] }
 0x3e7   : > { %v3750_v42 = vpop.f32.mrb[165].mxu0 }
 0x3e8   : > { %v3138_v42 = vld [vmem:[#allocation2 + $0xf98] sm:$0xff] }
 0x3e9   : > { %4747 = vmatmul.mubr.f32.gmra.mrb[172].mxu1 %v3047_v31 }
 0x3ea   : > { %4751 = vmatprep.mubr.f32.mxu1 %v3066_v25  ;;  %v12930_v27 = vpop.f32.mrb[166].mxu0  ;;  %v3119_v25 = vld [vmem:[#allocation2 + $0xf00] sm:$0xff] }
 0x3eb   : > { %v3755_v32 = vpop.f32.mrb[167].mxu0 }
 0x3ec   : > { %v3156_v32 = vld [vmem:[#allocation2 + $0x1028] sm:$0xff] }
 0x3ed   : > { %4752 = vmatmul.mubr.f32.gmra.mrb[174].mxu1 %v3065_v59 }
 0x3ee   : > { %4756 = vmatprep.mubr.f32.mxu1 %v3084_v0  ;;  %v12932_v11 = vpop.f32.mrb[168].mxu0  ;;  %v3137_v0 = vld [vmem:[#allocation2 + $0xf90] sm:$0xff] }
 0x3ef   : > { %v3760_v31 = vpop.f32.mrb[169].mxu0 }
 0x3f0   : > { %v3174_v31 = vld [vmem:[#allocation2 + $0x10b8] sm:$0xff] }
 0x3f1   : > { %4757 = vmatmul.mubr.f32.gmra.mrb[176].mxu1 %v3083_v47 }
 0x3f2   : > { %4761 = vmatprep.mubr.f32.mxu1 %v3102_v3  ;;  %v12934_v35 = vpop.f32.mrb[170].mxu0  ;;  %v3155_v3 = vld [vmem:[#allocation2 + $0x1020] sm:$0xff] }
 0x3f3   : > { %v3765_v59 = vpop.f32.mrb[171].mxu0 }
 0x3f4   : > { %v3192_v59 = vld [vmem:[#allocation2 + $0x1148] sm:$0xff] }
 0x3f5   : > { %4762 = vmatmul.mubr.f32.gmra.mrb[178].mxu1 %v3101_v30 }
 0x3f6   : > { %4766 = vmatprep.mubr.f32.mxu1 %v3120_v20  ;;  %v12936_v7 = vpop.f32.mrb[172].mxu0  ;;  %v3173_v20 = vld [vmem:[#allocation2 + $0x10b0] sm:$0xff] }
 0x3f7   : > { %v3770_v47 = vpop.f32.mrb[173].mxu0 }
 0x3f8   : > { %v3210_v47 = vld [vmem:[#allocation2 + $0x11d8] sm:$0xff] }
 0x3f9   : > { %4767 = vmatmul.mubr.f32.gmra.mrb[180].mxu1 %v3119_v25 }
 0x3fa   : > { %4771 = vmatprep.mubr.f32.mxu1 %v3138_v42  ;;  %v12938_v33 = vpop.f32.mrb[174].mxu0  ;;  %v3191_v42 = vld [vmem:[#allocation2 + $0x1140] sm:$0xff] }
 0x3fb   : > { %v3775_v30 = vpop.f32.mrb[175].mxu0 }
 0x3fc   : > { %v2654_v30 = vld [vmem:[#allocation2 + $0x78] sm:$0xff] }
 0x3fd   : > { %4772 = vmatmul.mubr.f32.gmra.mrb[182].mxu1 %v3137_v0 }
 0x3fe   : > { %4776 = vmatprep.mubr.f32.mxu1 %v3156_v32  ;;  %v12940_v29 = vpop.f32.mrb[176].mxu0  ;;  %v3209_v32 = vld [vmem:[#allocation2 + $0x11d0] sm:$0xff] }
 0x3ff   : > { %v3780_v25 = vpop.f32.mrb[177].mxu0 }
 0x400   : > { %v2672_v25 = vld [vmem:[#allocation2 + $0x108] sm:$0xff] }
 0x401   : > { %4777 = vmatmul.mubr.f32.gmra.mrb[184].mxu1 %v3155_v3 }
 0x402   : > { %4781 = vmatprep.mubr.f32.mxu1 %v3174_v31  ;;  %v12942_v26 = vpop.f32.mrb[178].mxu0  ;;  %v2653_v31 = vld [vmem:[#allocation2 + $0x70] sm:$0xff] }
 0x403   : > { %v3785_v0 = vpop.f32.mrb[179].mxu0 }
 0x405   : > { %4782 = vmatmul.mubr.f32.gmra.mrb[186].mxu1 %v3173_v20 }
 0x406   : > { %4786 = vmatprep.mubr.f32.mxu1 %v3192_v59  ;;  %v12944_v9 = vpop.f32.mrb[180].mxu0  ;;  %v2671_v59 = vld [vmem:[#allocation2 + $0x100] sm:$0xff] }
 0x407   : > { %v3790_v3 = vpop.f32.mrb[181].mxu0 }
 0x408   : > { %v2708_v3 = vld [vmem:[#allocation2 + $0x228] sm:$0xff] }
 0x409   : > { %4787 = vmatmul.mubr.f32.gmra.mrb[188].mxu1 %v3191_v42 }
 0x40a   : > { %4791 = vmatprep.mubr.f32.mxu1 %v3210_v47  ;;  %v12946_v17 = vpop.f32.mrb[182].mxu0  ;;  %v2690_v47 = vld [vmem:[#allocation2 + $0x198] sm:$0xff] }
 0x40b   : > { %v3795_v20 = vpop.f32.mrb[183].mxu0 }
 0x40c   : > { %v2762_v20 = vld [vmem:[#allocation2 + $0x3d8] sm:$0xff] }
 0x40d   : > { %4792 = vmatmul.mubr.f32.gmra.mrb[190].mxu1 %v3209_v32  ;;  %v2689_v32 = vld [vmem:[#allocation2 + $0x190] sm:$0xff] }
 0x40e   : > { %4861 = vmatprep.mubr.f32.mxu1 %v2654_v30  ;;  %v12951_v42 = vpop.f32.mrb[184].mxu0 }
 0x40f   : > { %v3800_v0 = vpop.f32.mrb[185].mxu0 }
 0x410   : > { %v2816_v0 = vld [vmem:[#allocation2 + $0x588] sm:$0xff] }
 0x411   : > { %4862 = vmatmul.mubr.f32.vlgmr.msra.gmra.mrb[128].mxu1 %v2653_v31  ;;  %v2726_v31 = vld [vmem:[#allocation2 + $0x2b8] sm:$0xff] }
 0x412   : > { %9699 = vmatpush1.bf16.msra.mxu1 %v9698_v13  ;;  %4866 = vmatprep.mubr.f32.mxu1 %v2672_v25  ;;  %v12957_v30 = vpop.f32.mrb[186].mxu0  ;;  %v2744_v25 = vld [vmem:[#allocation2 + $0x348] sm:$0xff] }
 0x413   : > { %9700 = vmatprep.subr.bf16.mxu1 %v13647_v10  ;;  %v3805_v62 = vpop.f32.mrb[187].mxu0 }
 0x414   : > { %v2852_v62 = vld [vmem:[#allocation2 + $0x6a8] sm:$0xff] }
 0x415   : > { %4867 = vmatmul.mubr.f32.gmra.mrb[130].mxu1 %v2671_v59  ;;  %v2780_v59 = vld [vmem:[#allocation2 + $0x468] sm:$0xff] }
 0x416   : > { %4871 = vmatprep.mubr.f32.mxu1 %v2690_v47  ;;  %9702 = vmatpush1.bf16.msra.mxu1 %v9701_v38  ;;  %v12963_v13 = vpop.f32.mrb[188].mxu0  ;;  %v2798_v47 = vld [vmem:[#allocation2 + $0x4f8] sm:$0xff] }
 0x417   : > { %9703 = vmatprep.subr.bf16.mxu1 %v13647_v10  ;;  %v3810_v12 = vpop.f32.mrb[189].mxu0 }
 0x418   : > { %v13831_v12 = vpack.c.bf16 %v12889_v28, %v12892_v53  ;;  %v2905_v53 = vld [vmem:[#allocation2 + $0x850] sm:$0xff] }
 0x419   : > { %4872 = vmatmul.mubr.f32.gmra.mrb[132].mxu1 %v2689_v32  ;;  %v2834_v32 = vld [vmem:[#allocation2 + $0x618] sm:$0xff] }
 0x41a   : > { %4876 = vmatprep.mubr.f32.mxu1 %v2708_v3  ;;  %9705 = vmatpush1.bf16.msra.mxu1 %v9704_v52  ;;  %v12969_v38 = vpop.f32.mrb[190].mxu0 }
 0x41b   : > { %9706 = vmatprep.subr.bf16.mxu1 %v13647_v10  ;;  %v3815_v1 = vpop.f32.mrb[191].mxu0 }
 0x41c   : > { %v13832_v1 = vpack.c.bf16 %v12899_v50, %v12902_v54  ;;  %v2923_v54 = vld [vmem:[#allocation2 + $0x8e0] sm:$0xff] }
 0x41d   : > { %4877 = vmatmul.mubr.f32.gmra.mrb[134].mxu1 %v2707_v37 }
 0x41e   : > { %4881 = vmatprep.mubr.f32.mxu1 %v2726_v31  ;;  %9708 = vmatpush1.bf16.msra.mxu1 %v9707_v6  ;;  %v12975_v52 = vpop.f32.mrb[192].mxu0  ;;  %v2870_v31 = vld [vmem:[#allocation2 + $0x738] sm:$0xff] }
 0x41f   : > { %9709 = vmatprep.subr.bf16.mxu1 %v13647_v10  ;;  %v3820_v58 = vpop.f32.mrb[193].mxu0 }
 0x420   : > { %v13833_v58 = vpack.c.bf16 %v12906_v15, %v12908_v24  ;;  %v2941_v24 = vld [vmem:[#allocation2 + $0x970] sm:$0xff] }
 0x421   : > { %4882 = vmatmul.mubr.f32.gmra.mrb[136].mxu1 %v2725_v49 }
 0x422   : > { %4886 = vmatprep.mubr.f32.mxu1 %v2744_v25  ;;  %9711 = vmatpush1.bf16.msra.mxu1 %v9710_v21  ;;  %v12981_v6 = vpop.f32.mrb[194].mxu0  ;;  %v2888_v25 = vld [vmem:[#allocation2 + $0x7c8] sm:$0xff] }
 0x423   : > { %9712 = vmatprep.subr.bf16.mxu1 %v13647_v10  ;;  %v3825_v18 = vpop.f32.mrb[195].mxu0 }
 0x424   : > { %v13834_v18 = vpack.c.bf16 %v12912_v43, %v12914_v39  ;;  %v2959_v43 = vld [vmem:[#allocation2 + $0xa00] sm:$0xff] }
 0x425   : > { %4887 = vmatmul.mubr.f32.gmra.mrb[138].mxu1 %v2743_v19 }
 0x426   : > { %4891 = vmatprep.mubr.f32.mxu1 %v2762_v20  ;;  %9714 = vmatpush1.bf16.msra.mxu1 %v9713_v14  ;;  %v12987_v21 = vpop.f32.mrb[196].mxu0  ;;  %v2906_v20 = vld [vmem:[#allocation2 + $0x858] sm:$0xff] }
 0x427   : > { %9715 = vmatprep.subr.bf16.mxu1 %v13647_v10  ;;  %v3830_v8 = vpop.f32.mrb[197].mxu0 }
 0x428   : > { %v13835_v8 = vpack.c.bf16 %v12918_v51, %v12920_v5  ;;  %v2995_v51 = vld [vmem:[#allocation2 + $0xb20] sm:$0xff] }
 0x429   : > { %4892 = vmatmul.mubr.f32.gmra.mrb[140].mxu1 %v2761_v46 }
 0x42a   : > { %4896 = vmatprep.mubr.f32.mxu1 %v2780_v59  ;;  %9717 = vmatpush1.bf16.msra.mxu1 %v9716_v60  ;;  %v12993_v14 = vpop.f32.mrb[198].mxu0  ;;  %v2924_v59 = vld [vmem:[#allocation2 + $0x8e8] sm:$0xff] }
 0x42b   : > { %9718 = vmatprep.subr.bf16.mxu1 %v13647_v10  ;;  %v3835_v56 = vpop.f32.mrb[199].mxu0 }
 0x42d   : > { %4897 = vmatmul.mubr.f32.gmra.mrb[142].mxu1 %v2779_v55 }
 0x42e   : > { %4901 = vmatprep.mubr.f32.mxu1 %v2798_v47  ;;  %9720 = vmatpush1.bf16.msra.mxu1 %v9719_v41  ;;  %v12999_v60 = vpop.f32.mrb[200].mxu0  ;;  %v13829_v41 = vpack.c.bf16 %v12869_v61, %v12872_v2  ;;  %v2869_v2 = vld [vmem:[#allocation2 + $0x730] sm:$0xff]  ;;  %v2942_v47 = vld [vmem:[#allocation2 + $0x978] sm:$0xff] }
 0x42f   : > { %9721 = vmatprep.subr.bf16.mxu1 %v13647_v10  ;;  %v3840_v4 = vpop.f32.mrb[201].mxu0 }
 0x430   : > { %v2977_v4 = vld [vmem:[#allocation2 + $0xa90] sm:$0xff] }
 0x431   : > { %4902 = vmatmul.mubr.f32.gmra.mrb[144].mxu1 %v2797_v23 }
 0x432   : > { %4906 = vmatprep.mubr.f32.mxu1 %v2816_v0  ;;  %9723 = vmatpush1.bf16.msra.mxu1 %v9722_v48  ;;  %v13005_v3 = vpop.f32.mrb[202].mxu0  ;;  %v13830_v48 = vpack.c.bf16 %v12879_v36, %v12882_v22  ;;  %v2887_v22 = vld [vmem:[#allocation2 + $0x7c0] sm:$0xff]  ;;  %v2960_v0 = vld [vmem:[#allocation2 + $0xa08] sm:$0xff] }
 0x433   : > { %9724 = vmatprep.subr.bf16.mxu1 %v13647_v10  ;;  %v3845_v44 = vpop.f32.mrb[203].mxu0 }
 0x434   : > { %v3014_v44 = vld [vmem:[#allocation2 + $0xbb8] sm:$0xff] }
 0x435   : > { %4907 = vmatmul.mubr.f32.gmra.mrb[146].mxu1 %v2815_v63  ;;  %v2978_v63 = vld [vmem:[#allocation2 + $0xa98] sm:$0xff] }
 0x436   : > { %4911 = vmatprep.mubr.f32.mxu1 %v2834_v32  ;;  %9726 = vmatpush1.bf16.msra.mxu1 %v13829_v41  ;;  %v13011_v37 = vpop.f32.mrb[204].mxu0  ;;  %v2996_v41 = vld [vmem:[#allocation2 + $0xb28] sm:$0xff] }
 0x437   : > { %9727 = vmatprep.subr.bf16.mxu1 %v13647_v10  ;;  %v3850_v61 = vpop.f32.mrb[205].mxu0 }
 0x438   : > { %v3032_v61 = vld [vmem:[#allocation2 + $0xc48] sm:$0xff] }
 0x439   : > { %4912 = vmatmul.mubr.f32.gmra.mrb[148].mxu1 %v2833_v40 }
 0x43a   : > { %4916 = vmatprep.mubr.f32.mxu1 %v2852_v62  ;;  %9729 = vmatpush1.bf16.msra.mxu1 %v13830_v48  ;;  %v13017_v49 = vpop.f32.mrb[206].mxu0  ;;  %v3013_v48 = vld [vmem:[#allocation2 + $0xbb0] sm:$0xff] }
 0x43b   : > { %9730 = vmatprep.subr.bf16.mxu1 %v13647_v10  ;;  %v3855_v36 = vpop.f32.mrb[207].mxu0 }
 0x43c   : > { %v3049_v36 = vld [vmem:[#allocation2 + $0xcd0] sm:$0xff] }
 0x43d   : > { %4917 = vmatmul.mubr.f32.gmra.mrb[150].mxu1 %v2851_v16 }
 0x43e   : > { %4921 = vmatprep.mubr.f32.mxu1 %v2870_v31  ;;  %9732 = vmatpush1.bf16.msra.mxu1 %v13831_v12  ;;  %v13023_v19 = vpop.f32.mrb[208].mxu0  ;;  %v3031_v12 = vld [vmem:[#allocation2 + $0xc40] sm:$0xff] }
 0x43f   : > { %9733 = vmatprep.subr.bf16.mxu1 %v13647_v10  ;;  %v3860_v28 = vpop.f32.mrb[209].mxu0 }
 0x440   : > { %v3085_v28 = vld [vmem:[#allocation2 + $0xdf0] sm:$0xff] }
 0x441   : > { %4922 = vmatmul.mubr.f32.gmra.mrb[152].mxu1 %v2869_v2 }
 0x442   : > { %4926 = vmatprep.mubr.f32.mxu1 %v2888_v25  ;;  %9735 = vmatpush1.bf16.msra.mxu1 %v13832_v1  ;;  %v13029_v46 = vpop.f32.mrb[210].mxu0  ;;  %v3050_v25 = vld [vmem:[#allocation2 + $0xcd8] sm:$0xff]  ;;  %v3067_v1 = vld [vmem:[#allocation2 + $0xd60] sm:$0xff] }
 0x443   : > { %9736 = vmatprep.subr.bf16.mxu1 %v13647_v10  ;;  %v3865_v50 = vpop.f32.mrb[211].mxu0 }
 0x444   : > { %v3121_v50 = vld [vmem:[#allocation2 + $0xf10] sm:$0xff] }
 0x445   : > { %4927 = vmatmul.mubr.f32.gmra.mrb[154].mxu1 %v2887_v22  ;;  %v3068_v22 = vld [vmem:[#allocation2 + $0xd68] sm:$0xff] }
 0x446   : > { %4931 = vmatprep.mubr.f32.mxu1 %v2906_v20  ;;  %9738 = vmatpush1.bf16.msra.mxu1 %v13833_v58  ;;  %v13035_v55 = vpop.f32.mrb[212].mxu0  ;;  %v3086_v20 = vld [vmem:[#allocation2 + $0xdf8] sm:$0xff]  ;;  %v3103_v58 = vld [vmem:[#allocation2 + $0xe80] sm:$0xff] }
 0x447   : > { %9739 = vmatprep.subr.bf16.mxu1 %v13647_v10  ;;  %v3870_v15 = vpop.f32.mrb[213].mxu0 }
 0x448   : > { %v3157_v15 = vld [vmem:[#allocation2 + $0x1030] sm:$0xff] }
 0x449   : > { %4932 = vmatmul.mubr.f32.gmra.mrb[156].mxu1 %v2905_v53  ;;  %v3104_v53 = vld [vmem:[#allocation2 + $0xe88] sm:$0xff] }
 0x44a   : > { %4936 = vmatprep.mubr.f32.mxu1 %v2924_v59  ;;  %9741 = vmatpush1.bf16.msra.mxu1 %v13834_v18  ;;  %v13041_v23 = vpop.f32.mrb[214].mxu0  ;;  %v3122_v59 = vld [vmem:[#allocation2 + $0xf18] sm:$0xff]  ;;  %v3139_v18 = vld [vmem:[#allocation2 + $0xfa0] sm:$0xff] }
 0x44b   : > { %9742 = vmatprep.subr.bf16.mxu1 %v13647_v10  ;;  %v3875_v56 = vpop.f32.mrb[215].mxu0 }
 0x44c   : > { %v3193_v56 = vld [vmem:[#allocation2 + $0x1150] sm:$0xff] }
 0x44d   : > { %4937 = vmatmul.mubr.f32.gmra.mrb[158].mxu1 %v2923_v54  ;;  %v3140_v54 = vld [vmem:[#allocation2 + $0xfa8] sm:$0xff] }
 0x44e   : > { %4941 = vmatprep.mubr.f32.mxu1 %v2942_v47  ;;  %9744 = vmatpush1.bf16.msra.mxu1 %v13835_v8  ;;  %v13043_v39 = vpop.f32.mrb[216].mxu0  ;;  %v3158_v47 = vld [vmem:[#allocation2 + $0x1038] sm:$0xff]  ;;  %v3175_v8 = vld [vmem:[#allocation2 + $0x10c0] sm:$0xff] }
 0x44f   : > { %v3880_v32 = vpop.f32.mrb[217].mxu0 }
 0x450   : > { %v2656_v32 = vld [vmem:[#allocation2 + $0x88] sm:$0xff] }
 0x451   : > { %4942 = vmatmul.mubr.f32.gmra.mrb[160].mxu1 %v2941_v24  ;;  %v3176_v24 = vld [vmem:[#allocation2 + $0x10c8] sm:$0xff] }
 0x452   : > { %4946 = vmatprep.mubr.f32.mxu1 %v2960_v0  ;;  %v13045_v40 = vpop.f32.mrb[218].mxu0  ;;  %v3194_v0 = vld [vmem:[#allocation2 + $0x1158] sm:$0xff] }
 0x453   : > { %v3885_v62 = vpop.f32.mrb[219].mxu0 }
 0x454   : > { %v2673_v62 = vld [vmem:[#allocation2 + $0x110] sm:$0xff] }
 0x455   : > { %4947 = vmatmul.mubr.f32.gmra.mrb[162].mxu1 %v2959_v43  ;;  %v3212_v43 = vld [vmem:[#allocation2 + $0x11e8] sm:$0xff] }
 0x456   : > { %4951 = vmatprep.mubr.f32.mxu1 %v2978_v63  ;;  %v13047_v5 = vpop.f32.mrb[220].mxu0  ;;  %v3211_v63 = vld [vmem:[#allocation2 + $0x11e0] sm:$0xff] }
 0x457   : > { %v3890_v16 = vpop.f32.mrb[221].mxu0 }
 0x458   : > { %v2710_v16 = vld [vmem:[#allocation2 + $0x238] sm:$0xff] }
 0x459   : > { %4952 = vmatmul.mubr.f32.gmra.mrb[164].mxu1 %v2977_v4  ;;  %v2655_v4 = vld [vmem:[#allocation2 + $0x80] sm:$0xff] }
 0x45a   : > { %4956 = vmatprep.mubr.f32.mxu1 %v2996_v41  ;;  %v13049_v31 = vpop.f32.mrb[222].mxu0  ;;  %v2674_v41 = vld [vmem:[#allocation2 + $0x118] sm:$0xff] }
 0x45b   : > { %v3895_v2 = vpop.f32.mrb[223].mxu0 }
 0x45c   : > { %v2727_v2 = vld [vmem:[#allocation2 + $0x2c0] sm:$0xff] }
 0x45d   : > { %4957 = vmatmul.mubr.f32.gmra.mrb[166].mxu1 %v2995_v51  ;;  %v2692_v51 = vld [vmem:[#allocation2 + $0x1a8] sm:$0xff] }
 0x45e   : > { %4961 = vmatprep.mubr.f32.mxu1 %v3014_v44  ;;  %v2691_v44 = vld [vmem:[#allocation2 + $0x1a0] sm:$0xff] }
 0x461   : > { %4962 = vmatmul.mubr.f32.gmra.mrb[168].mxu1 %v3013_v48  ;;  %v2709_v48 = vld [vmem:[#allocation2 + $0x230] sm:$0xff] }
 0x462   : > { %4966 = vmatprep.mubr.f32.mxu1 %v3032_v61  ;;  %v2728_v61 = vld [vmem:[#allocation2 + $0x2c8] sm:$0xff] }
 0x465   : > { %4967 = vmatmul.mubr.f32.gmra.mrb[170].mxu1 %v3031_v12  ;;  %v2746_v12 = vld [vmem:[#allocation2 + $0x358] sm:$0xff] }
 0x466   : > { %4971 = vmatprep.mubr.f32.mxu1 %v3050_v25  ;;  %v2745_v25 = vld [vmem:[#allocation2 + $0x350] sm:$0xff] }
 0x469   : > { %4972 = vmatmul.mubr.f32.gmra.mrb[172].mxu1 %v3049_v36  ;;  %v2764_v36 = vld [vmem:[#allocation2 + $0x3e8] sm:$0xff] }
 0x46a   : > { %4976 = vmatprep.mubr.f32.mxu1 %v3068_v22  ;;  %v2763_v22 = vld [vmem:[#allocation2 + $0x3e0] sm:$0xff] }
 0x46d   : > { %4977 = vmatmul.mubr.f32.gmra.mrb[174].mxu1 %v3067_v1  ;;  %v2782_v1 = vld [vmem:[#allocation2 + $0x478] sm:$0xff] }
 0x46e   : > { %4981 = vmatprep.mubr.f32.mxu1 %v3086_v20  ;;  %v2781_v20 = vld [vmem:[#allocation2 + $0x470] sm:$0xff] }
 0x471   : > { %4982 = vmatmul.mubr.f32.gmra.mrb[176].mxu1 %v3085_v28  ;;  %v2800_v28 = vld [vmem:[#allocation2 + $0x508] sm:$0xff] }
 0x472   : > { %4986 = vmatprep.mubr.f32.mxu1 %v3104_v53  ;;  %v2799_v53 = vld [vmem:[#allocation2 + $0x500] sm:$0xff] }
 0x475   : > { %4987 = vmatmul.mubr.f32.gmra.mrb[178].mxu1 %v3103_v58  ;;  %v2818_v58 = vld [vmem:[#allocation2 + $0x598] sm:$0xff] }
 0x476   : > { %4991 = vmatprep.mubr.f32.mxu1 %v3122_v59  ;;  %v2817_v59 = vld [vmem:[#allocation2 + $0x590] sm:$0xff] }
 0x479   : > { %4992 = vmatmul.mubr.f32.gmra.mrb[180].mxu1 %v3121_v50  ;;  %v2836_v50 = vld [vmem:[#allocation2 + $0x628] sm:$0xff] }
 0x47a   : > { %4996 = vmatprep.mubr.f32.mxu1 %v3140_v54  ;;  %v2835_v54 = vld [vmem:[#allocation2 + $0x620] sm:$0xff] }
 0x47d   : > { %4997 = vmatmul.mubr.f32.gmra.mrb[182].mxu1 %v3139_v18  ;;  %v2854_v18 = vld [vmem:[#allocation2 + $0x6b8] sm:$0xff] }
 0x47e   : > { %5001 = vmatprep.mubr.f32.mxu1 %v3158_v47  ;;  %v2853_v47 = vld [vmem:[#allocation2 + $0x6b0] sm:$0xff] }
 0x481   : > { %5002 = vmatmul.mubr.f32.gmra.mrb[184].mxu1 %v3157_v15  ;;  %v2872_v15 = vld [vmem:[#allocation2 + $0x748] sm:$0xff] }
 0x482   : > { %5006 = vmatprep.mubr.f32.mxu1 %v3176_v24  ;;  %v2871_v24 = vld [vmem:[#allocation2 + $0x740] sm:$0xff] }
 0x485   : > { %5007 = vmatmul.mubr.f32.gmra.mrb[186].mxu1 %v3175_v8  ;;  %v2890_v8 = vld [vmem:[#allocation2 + $0x7d8] sm:$0xff] }
 0x486   : > { %5011 = vmatprep.mubr.f32.mxu1 %v3194_v0  ;;  %v2889_v0 = vld [vmem:[#allocation2 + $0x7d0] sm:$0xff] }
 0x489   : > { %5012 = vmatmul.mubr.f32.gmra.mrb[188].mxu1 %v3193_v56  ;;  %v2908_v56 = vld [vmem:[#allocation2 + $0x868] sm:$0xff] }
 0x48a   : > { %5016 = vmatprep.mubr.f32.mxu1 %v3212_v43  ;;  %v2907_v43 = vld [vmem:[#allocation2 + $0x860] sm:$0xff] }
 0x48d   : > { %5017 = vmatmul.mubr.f32.gmra.mrb[190].mxu1 %v3211_v63  ;;  %v2926_v63 = vld [vmem:[#allocation2 + $0x8f8] sm:$0xff] }
 0x48e   : > { %5086 = vmatprep.mubr.f32.mxu1 %v2656_v32  ;;  %v2925_v32 = vld [vmem:[#allocation2 + $0x8f0] sm:$0xff] }
 0x491   : > { %5087 = vmatmul.mubr.f32.vlgmr.msra.gmra.mrb[128].mxu1 %v2655_v4  ;;  %v2944_v4 = vld [vmem:[#allocation2 + $0x988] sm:$0xff] }
 0x492   : > { %5091 = vmatprep.mubr.f32.mxu1 %v2674_v41  ;;  %v2943_v41 = vld [vmem:[#allocation2 + $0x980] sm:$0xff] }
 0x495   : > { %5092 = vmatmul.mubr.f32.gmra.mrb[130].mxu1 %v2673_v62  ;;  %v2962_v62 = vld [vmem:[#allocation2 + $0xa18] sm:$0xff] }
 0x496   : > { %5096 = vmatprep.mubr.f32.mxu1 %v2692_v51  ;;  %v2961_v51 = vld [vmem:[#allocation2 + $0xa10] sm:$0xff] }
 0x499   : > { %5097 = vmatmul.mubr.f32.gmra.mrb[132].mxu1 %v2691_v44  ;;  %v2980_v44 = vld [vmem:[#allocation2 + $0xaa8] sm:$0xff] }
 0x49a   : > { %5101 = vmatprep.mubr.f32.mxu1 %v2710_v16  ;;  %v2979_v16 = vld [vmem:[#allocation2 + $0xaa0] sm:$0xff] }
 0x49d   : > { %5102 = vmatmul.mubr.f32.gmra.mrb[134].mxu1 %v2709_v48  ;;  %v2998_v48 = vld [vmem:[#allocation2 + $0xb38] sm:$0xff] }
 0x49e   : > { %5106 = vmatprep.mubr.f32.mxu1 %v2728_v61  ;;  %v2997_v61 = vld [vmem:[#allocation2 + $0xb30] sm:$0xff] }
 0x4a1   : > { %5107 = vmatmul.mubr.f32.gmra.mrb[136].mxu1 %v2727_v2  ;;  %v3016_v2 = vld [vmem:[#allocation2 + $0xbc8] sm:$0xff] }
 0x4a2   : > { %5111 = vmatprep.mubr.f32.mxu1 %v2746_v12  ;;  %v3015_v12 = vld [vmem:[#allocation2 + $0xbc0] sm:$0xff] }
 0x4a5   : > { %5112 = vmatmul.mubr.f32.gmra.mrb[138].mxu1 %v2745_v25  ;;  %v3034_v25 = vld [vmem:[#allocation2 + $0xc58] sm:$0xff] }
 0x4a6   : > { %5116 = vmatprep.mubr.f32.mxu1 %v2764_v36  ;;  %v3033_v36 = vld [vmem:[#allocation2 + $0xc50] sm:$0xff] }
 0x4a9   : > { %5117 = vmatmul.mubr.f32.gmra.mrb[140].mxu1 %v2763_v22  ;;  %v3052_v22 = vld [vmem:[#allocation2 + $0xce8] sm:$0xff] }
 0x4aa   : > { %5121 = vmatprep.mubr.f32.mxu1 %v2782_v1  ;;  %v3051_v1 = vld [vmem:[#allocation2 + $0xce0] sm:$0xff] }
 0x4ad   : > { %5122 = vmatmul.mubr.f32.gmra.mrb[142].mxu1 %v2781_v20  ;;  %v3070_v20 = vld [vmem:[#allocation2 + $0xd78] sm:$0xff] }
 0x4ae   : > { %5126 = vmatprep.mubr.f32.mxu1 %v2800_v28  ;;  %v5303_v28 = vld [vmem:[%s13530_s5] sm:$0xf] }
 0x4af   : > { %9114 = vmatprep.subr.msk.mxu0 %vm5329_vm2, %v5303_v28 }
 0x4b0   : > { %9115 = vmatpush3.msk.msra.mxu0 %vm5329_vm2, %v5303_v28 }
 0x4b1   : > { %5127 = vmatmul.mubr.f32.gmra.mrb[144].mxu1 %v2799_v53  ;;  %v3069_v53 = vld [vmem:[#allocation2 + $0xd70] sm:$0xff] }
 0x4b2   : > { %5131 = vmatprep.mubr.f32.mxu1 %v2818_v58  ;;  %v3088_v58 = vld [vmem:[#allocation2 + $0xe08] sm:$0xff] }
 0x4b5   : > { %5132 = vmatmul.mubr.f32.gmra.mrb[146].mxu1 %v2817_v59  ;;  %v3087_v59 = vld [vmem:[#allocation2 + $0xe00] sm:$0xff] }
 0x4b6   : > { %5136 = vmatprep.mubr.f32.mxu1 %v2836_v50  ;;  %v3106_v50 = vld [vmem:[#allocation2 + $0xe98] sm:$0xff] }
 0x4b9   : > { %5137 = vmatmul.mubr.f32.gmra.mrb[148].mxu1 %v2835_v54  ;;  %v3105_v54 = vld [vmem:[#allocation2 + $0xe90] sm:$0xff] }
 0x4ba   : > { %5141 = vmatprep.mubr.f32.mxu1 %v2854_v18  ;;  %v3124_v18 = vld [vmem:[#allocation2 + $0xf28] sm:$0xff] }
 0x4bd   : > { %5142 = vmatmul.mubr.f32.gmra.mrb[150].mxu1 %v2853_v47  ;;  %v3123_v47 = vld [vmem:[#allocation2 + $0xf20] sm:$0xff] }
 0x4be   : > { %5146 = vmatprep.mubr.f32.mxu1 %v2872_v15  ;;  %v3142_v15 = vld [vmem:[#allocation2 + $0xfb8] sm:$0xff] }
 0x4c1   : > { %5147 = vmatmul.mubr.f32.gmra.mrb[152].mxu1 %v2871_v24  ;;  %v3141_v24 = vld [vmem:[#allocation2 + $0xfb0] sm:$0xff] }
 0x4c2   : > { %5151 = vmatprep.mubr.f32.mxu1 %v2890_v8  ;;  %v3160_v8 = vld [vmem:[#allocation2 + $0x1048] sm:$0xff] }
 0x4c5   : > { %5152 = vmatmul.mubr.f32.gmra.mrb[154].mxu1 %v2889_v0  ;;  %v3159_v0 = vld [vmem:[#allocation2 + $0x1040] sm:$0xff] }
 0x4c6   : > { %5156 = vmatprep.mubr.f32.mxu1 %v2908_v56  ;;  %v3178_v56 = vld [vmem:[#allocation2 + $0x10d8] sm:$0xff] }
 0x4c9   : > { %5157 = vmatmul.mubr.f32.gmra.mrb[156].mxu1 %v2907_v43  ;;  %v3177_v43 = vld [vmem:[#allocation2 + $0x10d0] sm:$0xff] }
 0x4ca   : > { %5161 = vmatprep.mubr.f32.mxu1 %v2926_v63  ;;  %v3196_v63 = vld [vmem:[#allocation2 + $0x1168] sm:$0xff] }
 0x4cd   : > { %5162 = vmatmul.mubr.f32.gmra.mrb[158].mxu1 %v2925_v32  ;;  %v3195_v32 = vld [vmem:[#allocation2 + $0x1160] sm:$0xff] }
 0x4ce   : > { %5166 = vmatprep.mubr.f32.mxu1 %v2944_v4  ;;  %v3214_v4 = vld [vmem:[#allocation2 + $0x11f8] sm:$0xff] }
 0x4d1   : > { %5167 = vmatmul.mubr.f32.gmra.mrb[160].mxu1 %v2943_v41  ;;  %v3213_v41 = vld [vmem:[#allocation2 + $0x11f0] sm:$0xff] }
 0x4d2   : > { %5171 = vmatprep.mubr.f32.mxu1 %v2962_v62  ;;  %v13056_v62 = vld [vmem:[#allocation8] ss:$0 sm:$0xff] }
 0x4d3   : > { %v9858_v28 = vadd.f32 %v13056_v62, %v12930_v27  ;;  %v9862_v27 = vadd.f32 %v13056_v62, %v12934_v35 }
 0x4d5   : > { %5172 = vmatmul.mubr.f32.gmra.mrb[162].mxu1 %v2961_v51  ;;  %v9852_v51 = vadd.f32 %v13056_v62, %v12924_v57  ;;  %v13069_v57 = vld [vmem:[%s13530_s5 + $0x4] sm:$0xf] }
 0x4d6   : > { %5176 = vmatprep.mubr.f32.mxu1 %v2980_v44  ;;  %9128 = vmatprep.subr.msk.mxu0 %vm5329_vm2, %v13069_v57 }
 0x4d9   : > { %5177 = vmatmul.mubr.f32.gmra.mrb[164].mxu1 %v2979_v16 }
 0x4da   : > { %5181 = vmatprep.mubr.f32.mxu1 %v2998_v48 }
 0x4dd   : > { %5182 = vmatmul.mubr.f32.gmra.mrb[166].mxu1 %v2997_v61  ;;  %v9854_v61 = vadd.f32 %v13056_v62, %v12926_v45 }
 0x4de   : > { %5186 = vmatprep.mubr.f32.mxu1 %v3016_v2 }
 0x4e1   : > { %5187 = vmatmul.mubr.f32.gmra.mrb[168].mxu1 %v3015_v12 }
 0x4e2   : > { %5191 = vmatprep.mubr.f32.mxu1 %v3034_v25 }
 0x4e5   : > { %5192 = vmatmul.mubr.f32.gmra.mrb[170].mxu1 %v3033_v36  ;;  %v9856_v36 = vadd.f32 %v13056_v62, %v12928_v34  ;;  %v9860_v34 = vadd.f32 %v13056_v62, %v12932_v11 }
 0x4e6   : > { %5196 = vmatprep.mubr.f32.mxu1 %v3052_v22 }
 0x4e9   : > { %5197 = vmatmul.mubr.f32.gmra.mrb[172].mxu1 %v3051_v1 }
 0x4ea   : > { %5201 = vmatprep.mubr.f32.mxu1 %v3070_v20 }
 0x4ed   : > { %5202 = vmatmul.mubr.f32.gmra.mrb[174].mxu1 %v3069_v53 }
 0x4ee   : > { %5206 = vmatprep.mubr.f32.mxu1 %v3088_v58 }
 0x4f1   : > { %5207 = vmatmul.mubr.f32.gmra.mrb[176].mxu1 %v3087_v59 }
 0x4f2   : > { %5211 = vmatprep.mubr.f32.mxu1 %v3106_v50 }
 0x4f5   : > { %5212 = vmatmul.mubr.f32.gmra.mrb[178].mxu1 %v3105_v54 }
 0x4f6   : > { %5216 = vmatprep.mubr.f32.mxu1 %v3124_v18 }
 0x4f9   : > { %5217 = vmatmul.mubr.f32.gmra.mrb[180].mxu1 %v3123_v47 }
 0x4fa   : > { %5221 = vmatprep.mubr.f32.mxu1 %v3142_v15 }
 0x4fd   : > { %5222 = vmatmul.mubr.f32.gmra.mrb[182].mxu1 %v3141_v24  ;;  %v9864_v24 = vadd.f32 %v13056_v62, %v12936_v7 }
 0x4fe   : > { %5226 = vmatprep.mubr.f32.mxu1 %v3160_v8 }
 0x501   : > { %5227 = vmatmul.mubr.f32.gmra.mrb[184].mxu1 %v3159_v0 }
 0x502   : > { %5231 = vmatprep.mubr.f32.mxu1 %v3178_v56 }
 0x505   : > { %5232 = vmatmul.mubr.f32.gmra.mrb[186].mxu1 %v3177_v43  ;;  %v9866_v43 = vadd.f32 %v13056_v62, %v12938_v33  ;;  %v9872_v33 = vadd.f32 %v13056_v62, %v12944_v9 }
 0x506   : > { %5236 = vmatprep.mubr.f32.mxu1 %v3196_v63 }
 0x509   : > { %5237 = vmatmul.mubr.f32.gmra.mrb[188].mxu1 %v3195_v32 }
 0x50a   : > { %5241 = vmatprep.mubr.f32.mxu1 %v3214_v4  ;;  %v9868_v4 = vadd.f32 %v13056_v62, %v12940_v29  ;;  %v9874_v29 = vadd.f32 %v13056_v62, %v12946_v17 }
 0x50d   : > { %5242 = vmatmul.mubr.f32.gmra.mrb[190].mxu1 %v3213_v41 }
 0x564   : > { %v5088_v44 = vpop.f32.mrb[128].mxu1 }
 0x565   : > { %v9853_v16 = vadd.f32 %v9852_v51, %v5088_v44  ;;  %v5090_v48 = vpop.f32.mrb[129].mxu1  ;;  %v9870_v44 = vadd.f32 %v13056_v62, %v12942_v26 }
 0x567   : > { %10471 = vtanh.f32 %v9853_v16 }
 0x568   : > { %v5093_v2 = vpop.f32.mrb[130].mxu1 }
 0x569   : > { %v9855_v12 = vadd.f32 %v9854_v61, %v5093_v2  ;;  %v5095_v25 = vpop.f32.mrb[131].mxu1 }
 0x56c   : > { %v5098_v22 = vpop.f32.mrb[132].mxu1 }
 0x56d   : > { %v9857_v1 = vadd.f32 %v9856_v36, %v5098_v22  ;;  %v5100_v20 = vpop.f32.mrb[133].mxu1 }
 0x570   : > { %v5103_v53 = vpop.f32.mrb[134].mxu1 }
 0x571   : > { %v9859_v58 = vadd.f32 %v9858_v28, %v5103_v53  ;;  %v5105_v45 = vpop.f32.mrb[135].mxu1  ;;  %v13089_v16 = vpop.eup %10471 }
 0x574   : > { %v5108_v59 = vpop.f32.mrb[136].mxu1 }
 0x575   : > { %v9861_v50 = vadd.f32 %v9860_v34, %v5108_v59  ;;  %v5110_v54 = vpop.f32.mrb[137].mxu1 }
 0x578   : > { %v5113_v18 = vpop.f32.mrb[138].mxu1 }
 0x579   : > { %v9863_v47 = vadd.f32 %v9862_v27, %v5113_v18  ;;  %v5115_v15 = vpop.f32.mrb[139].mxu1 }
 0x57c   : > { %v5118_v8 = vpop.f32.mrb[140].mxu1 }
 0x57d   : > { %v9865_v0 = vadd.f32 %v9864_v24, %v5118_v8  ;;  %v5120_v56 = vpop.f32.mrb[141].mxu1 }
 0x580   : > { %v5123_v63 = vpop.f32.mrb[142].mxu1 }
 0x581   : > { %v9867_v11 = vadd.f32 %v9866_v43, %v5123_v63  ;;  %v5125_v32 = vpop.f32.mrb[143].mxu1 }
 0x584   : > { %v5128_v41 = vpop.f32.mrb[144].mxu1 }
 0x585   : > { %v9869_v35 = vadd.f32 %v9868_v4, %v5128_v41  ;;  %v5130_v51 = vpop.f32.mrb[145].mxu1 }
 0x587   : > { %10473 = vtanh.f32 %v9869_v35 }
 0x588   : > { %v5133_v7 = vpop.f32.mrb[146].mxu1  ;;  %10475 = vtanh.f32 %v9855_v12  ;;  %v9876_v12 = vadd.f32 %v13056_v62, %v12951_v42 }
 0x589   : > { %v9871_v48 = vadd.f32 %v9870_v44, %v5133_v7  ;;  %v5135_v61 = vpop.f32.mrb[147].mxu1 }
 0x58b   : > { %10477 = vtanh.f32 %v9871_v48 }
 0x58c   : > { %v5138_v2 = vpop.f32.mrb[148].mxu1  ;;  %10479 = vtanh.f32 %v9857_v1 }
 0x58d   : > { %v9873_v25 = vadd.f32 %v9872_v33, %v5138_v2  ;;  %v5140_v36 = vpop.f32.mrb[149].mxu1 }
 0x58f   : > { %10481 = vtanh.f32 %v9873_v25 }
 0x590   : > { %v5143_v26 = vpop.f32.mrb[150].mxu1  ;;  %10483 = vtanh.f32 %v9859_v58  ;;  %v9878_v58 = vadd.f32 %v13056_v62, %v12957_v30 }
 0x591   : > { %v13091_v22 = vpop.eup %10473  ;;  %v9875_v20 = vadd.f32 %v9874_v29, %v5143_v26  ;;  %v5145_v28 = vpop.f32.mrb[151].mxu1 }
 0x592   : > { %v5279_v9 = vmax.f32 %v13089_v16, %v13091_v22  ;;  %v13097_v1 = vpop.eup %10475  ;;  %v9888_v28 = vadd.f32 %v13056_v62, %v12987_v21 }
 0x593   : > { %10485 = vtanh.f32 %v9875_v20 }
 0x594   : > { %v5148_v53 = vpop.f32.mrb[152].mxu1  ;;  %10487 = vtanh.f32 %v9861_v50  ;;  %v9880_v50 = vadd.f32 %v13056_v62, %v12963_v13 }
 0x595   : > { %v13099_v17 = vpop.eup %10477  ;;  %v9877_v45 = vadd.f32 %v9876_v12, %v5148_v53  ;;  %v5150_v34 = vpop.f32.mrb[153].mxu1 }
 0x596   : > { %v5280_v59 = vmax.f32 %v13097_v1, %v13099_v17  ;;  %v13105_v54 = vpop.eup %10479 }
 0x597   : > { %10489 = vtanh.f32 %v9877_v45 }
 0x598   : > { %v5153_v27 = vpop.f32.mrb[154].mxu1  ;;  %10491 = vtanh.f32 %v9863_v47  ;;  %v9882_v47 = vadd.f32 %v13056_v62, %v12969_v38 }
 0x599   : > { %v13107_v42 = vpop.eup %10481  ;;  %v9879_v18 = vadd.f32 %v9878_v58, %v5153_v27  ;;  %v5155_v15 = vpop.f32.mrb[155].mxu1  ;;  %v9890_v27 = vadd.f32 %v13056_v62, %v12993_v14 }
 0x59a   : > { %v5281_v24 = vmax.f32 %v13105_v54, %v13107_v42  ;;  %v13113_v8 = vpop.eup %10483 }
 0x59b   : > { %10493 = vtanh.f32 %v9879_v18 }
 0x59c   : > { %v5158_v56 = vpop.f32.mrb[156].mxu1  ;;  %10495 = vtanh.f32 %v9865_v0  ;;  %v9884_v0 = vadd.f32 %v13056_v62, %v12975_v52 }
 0x59d   : > { %v13115_v30 = vpop.eup %10485  ;;  %v9881_v43 = vadd.f32 %v9880_v50, %v5158_v56  ;;  %v5160_v63 = vpop.f32.mrb[157].mxu1  ;;  %v9892_v56 = vadd.f32 %v13056_v62, %v12999_v60 }
 0x59e   : > { %v5282_v32 = vmax.f32 %v13113_v8, %v13115_v30  ;;  %v13121_v4 = vpop.eup %10487 }
 0x59f   : > { %10497 = vtanh.f32 %v9881_v43 }
 0x5a0   : > { %v5163_v41 = vpop.f32.mrb[158].mxu1  ;;  %10499 = vtanh.f32 %v9867_v11  ;;  %v9886_v11 = vadd.f32 %v13056_v62, %v12981_v6 }
 0x5a1   : > { %v13123_v13 = vpop.eup %10489  ;;  %v9883_v35 = vadd.f32 %v9882_v47, %v5163_v41  ;;  %v5165_v51 = vpop.f32.mrb[159].mxu1  ;;  %v9894_v47 = vadd.f32 %v13056_v62, %v13005_v3  ;;  %v9900_v3 = vadd.f32 %v13056_v62, %v13023_v19  ;;  %v9906_v19 = vadd.f32 %v13056_v62, %v13041_v23 }
 0x5a2   : > { %v5283_v44 = vmax.f32 %v13121_v4, %v13123_v13  ;;  %v13129_v7 = vpop.eup %10491 }
 0x5a3   : > { %10501 = vtanh.f32 %v9883_v35 }
 0x5a4   : > { %v5168_v48 = vpop.f32.mrb[160].mxu1 }
 0x5a5   : > { %v13131_v38 = vpop.eup %10493  ;;  %v9885_v61 = vadd.f32 %v9884_v0, %v5168_v48  ;;  %v5170_v33 = vpop.f32.mrb[161].mxu1  ;;  %v9896_v0 = vadd.f32 %v13056_v62, %v13011_v37  ;;  %v9902_v37 = vadd.f32 %v13056_v62, %v13029_v46 }
 0x5a6   : > { %v5284_v2 = vmax.f32 %v13129_v7, %v13131_v38  ;;  %v13137_v25 = vpop.eup %10495  ;;  %v8026_v38 = vld [vmem:[%s13530_s5 + $0xc] sm:$0xf] }
 0x5a7   : > { %10503 = vtanh.f32 %v9885_v61 }
 0x5a8   : > { %v5173_v36 = vpop.f32.mrb[162].mxu1 }
 0x5a9   : > { %v13139_v29 = vpop.eup %10497  ;;  %v9887_v52 = vadd.f32 %v9886_v11, %v5173_v36  ;;  %v5175_v26 = vpop.f32.mrb[163].mxu1  ;;  %v9898_v11 = vadd.f32 %v13056_v62, %v13017_v49  ;;  %v9904_v49 = vadd.f32 %v13056_v62, %v13035_v55 }
 0x5aa   : > { %v5285_v20 = vmax.f32 %v13137_v25, %v13139_v29  ;;  %v13145_v12 = vpop.eup %10499  ;;  %v8046_v25 = vld [vmem:[%s13530_s5 + $0x14] sm:$0xf]  ;;  %v8056_v29 = vld [vmem:[%s13530_s5 + $0x18] sm:$0xf] }
 0x5ac   : > { %v5178_v53 = vpop.f32.mrb[164].mxu1 }
 0x5ad   : > { %v13147_v45 = vpop.eup %10501  ;;  %v9889_v34 = vadd.f32 %v9888_v28, %v5178_v53  ;;  %v5180_v6 = vpop.f32.mrb[165].mxu1 }
 0x5ae   : > { %v5286_v58 = vmax.f32 %v13145_v12, %v13147_v45  ;;  %v8076_v12 = vld [vmem:[%s13530_s5 + $0x20] sm:$0xf]  ;;  %v6319_v45 = vld [vmem:[#allocation5 + $0x8] sm:$0xff] }
 0x5b0   : > { %v5183_v18 = vpop.f32.mrb[166].mxu1 }
 0x5b1   : > { %v9891_v15 = vadd.f32 %v9890_v27, %v5183_v18  ;;  %v5185_v50 = vpop.f32.mrb[167].mxu1  ;;  %v10504_v61 = vpop.eup %10503 }
 0x5b4   : > { %v5188_v21 = vpop.f32.mrb[168].mxu1 }
 0x5b5   : > { %v9893_v43 = vadd.f32 %v9892_v56, %v5188_v21  ;;  %v5190_v63 = vpop.f32.mrb[169].mxu1 }
 0x5b8   : > { %v5193_v41 = vpop.f32.mrb[170].mxu1 }
 0x5b9   : > { %v9895_v35 = vadd.f32 %v9894_v47, %v5193_v41  ;;  %v5195_v51 = vpop.f32.mrb[171].mxu1 }
 0x5bc   : > { %v5198_v48 = vpop.f32.mrb[172].mxu1 }
 0x5bd   : > { %v13159_v14 = vadd.f32 %v9896_v0, %v5198_v48  ;;  %v5200_v33 = vpop.f32.mrb[173].mxu1 }
 0x5c0   : > { %v5203_v60 = vpop.f32.mrb[174].mxu1 }
 0x5c1   : > { %v13163_v36 = vadd.f32 %v9898_v11, %v5203_v60  ;;  %v5205_v26 = vpop.f32.mrb[175].mxu1 }
 0x5c4   : > { %v5208_v28 = vpop.f32.mrb[176].mxu1 }
 0x5c5   : > { %v9901_v53 = vadd.f32 %v9900_v3, %v5208_v28  ;;  %v5210_v6 = vpop.f32.mrb[177].mxu1 }
 0x5c7   : > { %10505 = vtanh.f32 %v9901_v53 }
 0x5c8   : > { %v5213_v27 = vpop.f32.mrb[178].mxu1  ;;  %10507 = vtanh.f32 %v9887_v52  ;;  %v9908_v52 = vadd.f32 %v13056_v62, %v13043_v39  ;;  %v9910_v39 = vadd.f32 %v13056_v62, %v13045_v40  ;;  %v9912_v40 = vadd.f32 %v13056_v62, %v13047_v5 }
 0x5c9   : > { %v9903_v18 = vadd.f32 %v9902_v37, %v5213_v27  ;;  %v5215_v50 = vpop.f32.mrb[179].mxu1  ;;  %v9914_v5 = vadd.f32 %v13056_v62, %v13049_v31 }
 0x5cb   : > { %10509 = vtanh.f32 %v9903_v18 }
 0x5cc   : > { %v5218_v56 = vpop.f32.mrb[180].mxu1  ;;  %10511 = vtanh.f32 %v9889_v34 }
 0x5cd   : > { %v9905_v21 = vadd.f32 %v9904_v49, %v5218_v56  ;;  %v5220_v63 = vpop.f32.mrb[181].mxu1 }
 0x5cf   : > { %10513 = vtanh.f32 %v9905_v21 }
 0x5d0   : > { %v5223_v47 = vpop.f32.mrb[182].mxu1  ;;  %10515 = vtanh.f32 %v9891_v15 }
 0x5d1   : > { %v10506_v46 = vpop.eup %10505  ;;  %v9907_v41 = vadd.f32 %v9906_v19, %v5223_v47  ;;  %v5225_v51 = vpop.f32.mrb[183].mxu1 }
 0x5d2   : > { %v5287_v0 = vmax.f32 %v10504_v61, %v10506_v46  ;;  %v10508_v55 = vpop.eup %10507 }
 0x5d3   : > { %10517 = vtanh.f32 %v9907_v41 }
 0x5d4   : > { %v13178_v34 = vmax.f32 %v5279_v9, %v5287_v0  ;;  %v5228_v23 = vpop.f32.mrb[184].mxu1  ;;  %10519 = vtanh.f32 %v9893_v43  ;;  %v8016_v43 = vld [vmem:[%s13530_s5 + $0x8] sm:$0xf] }
 0x5d5   : > { %v10510_v48 = vpop.eup %10509  ;;  %v9909_v33 = vadd.f32 %v9908_v52, %v5228_v23  ;;  %v5230_v11 = vpop.f32.mrb[185].mxu1 }
 0x5d6   : > { %v5288_v60 = vmax.f32 %v10508_v55, %v10510_v48  ;;  %9116 = vmatprep.mubr.msk.f32.mxu0 %vm5304_vm3, %v13178_v34  ;;  %v10512_v15 = vpop.eup %10511 }
 0x5d7   : > { %10521 = vtanh.f32 %v9909_v33 }
 0x5d8   : > { %v13187_v16 = vmax.f32 %v5280_v59, %v5288_v60  ;;  %v5233_v22 = vpop.f32.mrb[186].mxu1  ;;  %10523 = vtanh.f32 %v9895_v35 }
 0x5d9   : > { %v10514_v9 = vpop.eup %10513  ;;  %v9911_v26 = vadd.f32 %v9910_v39, %v5233_v22  ;;  %v5235_v3 = vpop.f32.mrb[187].mxu1 }
 0x5da   : > { %v5289_v28 = vmax.f32 %v10512_v15, %v10514_v9  ;;  %9117 = vmatmul.mubr.msk.f32.vlgmr.msra.gmra.mrb[224].mxu0 %vm5304_vm3, %v13187_v16  ;;  %v10516_v1 = vpop.eup %10515 }
 0x5db   : > { %10525 = vtanh.f32 %v9911_v26  ;;  %9129 = vmatpush3.msk.msra.mxu0 %vm5329_vm2, %v13069_v57 }
 0x5dc   : > { %v13201_v17 = vmax.f32 %v5281_v24, %v5289_v28  ;;  %v5238_v59 = vpop.f32.mrb[188].mxu1  ;;  %9142 = vmatprep.subr.msk.mxu0 %vm5329_vm2, %v8016_v43  ;;  %10527 = vtanh.f32 %v13159_v14 }
 0x5dd   : > { %v10518_v35 = vpop.eup %10517  ;;  %v9913_v53 = vadd.f32 %v9912_v40, %v5238_v59  ;;  %v5240_v6 = vpop.f32.mrb[189].mxu1 }
 0x5de   : > { %v5290_v37 = vmax.f32 %v10516_v1, %v10518_v35  ;;  %9119 = vmatprep.mubr.msk.f32.mxu0 %vm5304_vm3, %v13201_v17  ;;  %v10520_v57 = vpop.eup %10519 }
 0x5df   : > { %10529 = vtanh.f32 %v9913_v53 }
 0x5e0   : > { %v13212_v54 = vmax.f32 %v5282_v32, %v5290_v37  ;;  %v5243_v42 = vpop.f32.mrb[190].mxu1  ;;  %10531 = vtanh.f32 %v13163_v36 }
 0x5e1   : > { %v10522_v24 = vpop.eup %10521  ;;  %v9915_v27 = vadd.f32 %v9914_v5, %v5243_v42  ;;  %v5245_v18 = vpop.f32.mrb[191].mxu1 }
 0x5e2   : > { %v5291_v14 = vmax.f32 %v10520_v57, %v10522_v24  ;;  %9120 = vmatmul.mubr.msk.f32.gmra.mrb[226].mxu0 %vm5304_vm3, %v13212_v54  ;;  %v10524_v50 = vpop.eup %10523 }
 0x5e3   : > { %10533 = vtanh.f32 %v9915_v27 }
 0x5e4   : > { %v13220_v31 = vmax.f32 %v5283_v44, %v5291_v14 }
 0x5e5   : > { %v10526_v62 = vpop.eup %10525 }
 0x5e6   : > { %v5292_v8 = vmax.f32 %v10524_v50, %v10526_v62  ;;  %9122 = vmatprep.mubr.msk.f32.mxu0 %vm5304_vm3, %v13220_v31  ;;  %v10528_v30 = vpop.eup %10527 }
 0x5e8   : > { %v13227_v32 = vmax.f32 %v5284_v2, %v5292_v8  ;;  %v8036_v2 = vld [vmem:[%s13530_s5 + $0x10] sm:$0xf] }
 0x5e9   : > { %v10530_v36 = vpop.eup %10529 }
 0x5ea   : > { %v5293_v49 = vmax.f32 %v10528_v30, %v10530_v36  ;;  %9123 = vmatmul.mubr.msk.f32.gmra.mrb[228].mxu0 %vm5304_vm3, %v13227_v32  ;;  %v10532_v56 = vpop.eup %10531 }
 0x5ec   : > { %v13234_v4 = vmax.f32 %v5285_v20, %v5293_v49  ;;  %v8066_v20 = vld [vmem:[%s13530_s5 + $0x1c] sm:$0xf]  ;;  %v6318_v49 = vld [vmem:[#allocation5] sm:$0xff] }
 0x5ed   : > { %v10534_v13 = vpop.eup %10533 }
 0x5ee   : > { %v5294_v44 = vmax.f32 %v10532_v56, %v10534_v13  ;;  %9125 = vmatprep.mubr.msk.f32.mxu0 %vm5304_vm3, %v13234_v4 }
 0x5f0   : > { %v13241_v7 = vmax.f32 %v5286_v58, %v5294_v44 }
 0x5f2   : > { %9126 = vmatmul.mubr.msk.f32.gmra.mrb[230].mxu0 %vm5304_vm3, %v13241_v7 }
 0x5f3   : > { %9130 = vmatprep.mubr.msk.f32.mxu0 %vm5304_vm3, %v13178_v34 }
 0x5f6   : > { %9131 = vmatmul.mubr.msk.f32.vlgmr.msra.gmra.mrb[232].mxu0 %vm5304_vm3, %v13187_v16 }
 0x5f7   : > { %9133 = vmatprep.mubr.msk.f32.mxu0 %vm5304_vm3, %v13201_v17  ;;  %9143 = vmatpush3.msk.msra.mxu0 %vm5329_vm2, %v8016_v43 }
 0x5f8   : > { %9156 = vmatprep.subr.msk.mxu0 %vm5329_vm2, %v8026_v38 }
 0x5fa   : > { %9134 = vmatmul.mubr.msk.f32.gmra.mrb[234].mxu0 %vm5304_vm3, %v13212_v54 }
 0x5fb   : > { %9136 = vmatprep.mubr.msk.f32.mxu0 %vm5304_vm3, %v13220_v31 }
 0x5fe   : > { %9137 = vmatmul.mubr.msk.f32.gmra.mrb[236].mxu0 %vm5304_vm3, %v13227_v32 }
 0x5ff   : > { %9139 = vmatprep.mubr.msk.f32.mxu0 %vm5304_vm3, %v13234_v4 }
 0x602   : > { %9140 = vmatmul.mubr.msk.f32.gmra.mrb[238].mxu0 %vm5304_vm3, %v13241_v7 }
 0x603   : > { %9144 = vmatprep.mubr.msk.f32.mxu0 %vm5304_vm3, %v13178_v34 }
 0x606   : > { %9145 = vmatmul.mubr.msk.f32.vlgmr.msra.gmra.mrb[240].mxu0 %vm5304_vm3, %v13187_v16 }
 0x607   : > { %9147 = vmatprep.mubr.msk.f32.mxu0 %vm5304_vm3, %v13201_v17  ;;  %9157 = vmatpush3.msk.msra.mxu0 %vm5329_vm2, %v8026_v38 }
 0x608   : > { %9170 = vmatprep.subr.msk.mxu0 %vm5329_vm2, %v8036_v2 }
 0x60a   : > { %9148 = vmatmul.mubr.msk.f32.gmra.mrb[242].mxu0 %vm5304_vm3, %v13212_v54 }
 0x60b   : > { %9150 = vmatprep.mubr.msk.f32.mxu0 %vm5304_vm3, %v13220_v31 }
 0x60e   : > { %9151 = vmatmul.mubr.msk.f32.gmra.mrb[244].mxu0 %vm5304_vm3, %v13227_v32 }
 0x60f   : > { %9153 = vmatprep.mubr.msk.f32.mxu0 %vm5304_vm3, %v13234_v4 }
 0x612   : > { %9154 = vmatmul.mubr.msk.f32.gmra.mrb[246].mxu0 %vm5304_vm3, %v13241_v7 }
 0x613   : > { %9158 = vmatprep.mubr.msk.f32.mxu0 %vm5304_vm3, %v13178_v34 }
 0x616   : > { %9159 = vmatmul.mubr.msk.f32.vlgmr.msra.gmra.mrb[248].mxu0 %vm5304_vm3, %v13187_v16 }
 0x617   : > { %9161 = vmatprep.mubr.msk.f32.mxu0 %vm5304_vm3, %v13201_v17  ;;  %9171 = vmatpush3.msk.msra.mxu0 %vm5329_vm2, %v8036_v2  ;;  %v6329_v2 = vld [vmem:[#allocation5 + $0x58] sm:$0xff] }
 0x618   : > { %9184 = vmatprep.subr.msk.mxu0 %vm5329_vm2, %v8046_v25 }
 0x61a   : > { %9162 = vmatmul.mubr.msk.f32.gmra.mrb[250].mxu0 %vm5304_vm3, %v13212_v54 }
 0x61b   : > { %9164 = vmatprep.mubr.msk.f32.mxu0 %vm5304_vm3, %v13220_v31 }
 0x61e   : > { %9165 = vmatmul.mubr.msk.f32.gmra.mrb[252].mxu0 %vm5304_vm3, %v13227_v32 }
 0x61f   : > { %9167 = vmatprep.mubr.msk.f32.mxu0 %vm5304_vm3, %v13234_v4 }
 0x622   : > { %9168 = vmatmul.mubr.msk.f32.gmra.mrb[254].mxu0 %vm5304_vm3, %v13241_v7 }
 0x623   : > { %9172 = vmatprep.mubr.msk.f32.mxu0 %vm5304_vm3, %v13178_v34 }
 0x626   : > { %9173 = vmatmul.mubr.msk.f32.vlgmr.msra.gmra.mrb[0].mxu0 %vm5304_vm3, %v13187_v16 }
 0x627   : > { %9175 = vmatprep.mubr.msk.f32.mxu0 %vm5304_vm3, %v13201_v17  ;;  %9185 = vmatpush3.msk.msra.mxu0 %vm5329_vm2, %v8046_v25 }
 0x628   : > { %9198 = vmatprep.subr.msk.mxu0 %vm5329_vm2, %v8056_v29 }
 0x62a   : > { %9176 = vmatmul.mubr.msk.f32.gmra.mrb[2].mxu0 %vm5304_vm3, %v13212_v54 }
 0x62b   : > { %9178 = vmatprep.mubr.msk.f32.mxu0 %vm5304_vm3, %v13220_v31 }
 0x62e   : > { %9179 = vmatmul.mubr.msk.f32.gmra.mrb[4].mxu0 %vm5304_vm3, %v13227_v32 }
 0x62f   : > { %9181 = vmatprep.mubr.msk.f32.mxu0 %vm5304_vm3, %v13234_v4 }
 0x632   : > { %9182 = vmatmul.mubr.msk.f32.gmra.mrb[6].mxu0 %vm5304_vm3, %v13241_v7 }
 0x633   : > { %9186 = vmatprep.mubr.msk.f32.mxu0 %vm5304_vm3, %v13178_v34 }
 0x636   : > { %9187 = vmatmul.mubr.msk.f32.vlgmr.msra.gmra.mrb[8].mxu0 %vm5304_vm3, %v13187_v16 }
 0x637   : > { %9189 = vmatprep.mubr.msk.f32.mxu0 %vm5304_vm3, %v13201_v17  ;;  %9199 = vmatpush3.msk.msra.mxu0 %vm5329_vm2, %v8056_v29 }
 0x638   : > { %9212 = vmatprep.subr.msk.mxu0 %vm5329_vm2, %v8066_v20 }
 0x63a   : > { %9190 = vmatmul.mubr.msk.f32.gmra.mrb[10].mxu0 %vm5304_vm3, %v13212_v54 }
 0x63b   : > { %9192 = vmatprep.mubr.msk.f32.mxu0 %vm5304_vm3, %v13220_v31 }
 0x63e   : > { %9193 = vmatmul.mubr.msk.f32.gmra.mrb[12].mxu0 %vm5304_vm3, %v13227_v32 }
 0x63f   : > { %9195 = vmatprep.mubr.msk.f32.mxu0 %vm5304_vm3, %v13234_v4 }
 0x642   : > { %9196 = vmatmul.mubr.msk.f32.gmra.mrb[14].mxu0 %vm5304_vm3, %v13241_v7 }
 0x643   : > { %9200 = vmatprep.mubr.msk.f32.mxu0 %vm5304_vm3, %v13178_v34 }
 0x646   : > { %9201 = vmatmul.mubr.msk.f32.vlgmr.msra.gmra.mrb[16].mxu0 %vm5304_vm3, %v13187_v16 }
 0x647   : > { %9203 = vmatprep.mubr.msk.f32.mxu0 %vm5304_vm3, %v13201_v17  ;;  %9213 = vmatpush3.msk.msra.mxu0 %vm5329_vm2, %v8066_v20  ;;  %v6328_v20 = vld [vmem:[#allocation5 + $0x50] sm:$0xff] }
 0x648   : > { %9226 = vmatprep.subr.msk.mxu0 %vm5329_vm2, %v8076_v12 }
 0x64a   : > { %9204 = vmatmul.mubr.msk.f32.gmra.mrb[18].mxu0 %vm5304_vm3, %v13212_v54 }
 0x64b   : > { %9206 = vmatprep.mubr.msk.f32.mxu0 %vm5304_vm3, %v13220_v31 }
 0x64e   : > { %9207 = vmatmul.mubr.msk.f32.gmra.mrb[20].mxu0 %vm5304_vm3, %v13227_v32 }
 0x64f   : > { %9209 = vmatprep.mubr.msk.f32.mxu0 %vm5304_vm3, %v13234_v4 }
 0x652   : > { %9210 = vmatmul.mubr.msk.f32.gmra.mrb[22].mxu0 %vm5304_vm3, %v13241_v7 }
 0x653   : > { %9214 = vmatprep.mubr.msk.f32.mxu0 %vm5304_vm3, %v13178_v34 }
 0x656   : > { %9215 = vmatmul.mubr.msk.f32.vlgmr.msra.gmra.mrb[24].mxu0 %vm5304_vm3, %v13187_v16 }
 0x657   : > { %9217 = vmatprep.mubr.msk.f32.mxu0 %vm5304_vm3, %v13201_v17  ;;  %9227 = vmatpush3.msk.msra.mxu0 %vm5329_vm2, %v8076_v12 }
 0x65a   : > { %9218 = vmatmul.mubr.msk.f32.gmra.mrb[26].mxu0 %vm5304_vm3, %v13212_v54 }
 0x65b   : > { %9220 = vmatprep.mubr.msk.f32.mxu0 %vm5304_vm3, %v13220_v31 }
 0x65e   : > { %9221 = vmatmul.mubr.msk.f32.gmra.mrb[28].mxu0 %vm5304_vm3, %v13227_v32 }
 0x65f   : > { %9223 = vmatprep.mubr.msk.f32.mxu0 %vm5304_vm3, %v13234_v4 }
 0x662   : > { %9224 = vmatmul.mubr.msk.f32.gmra.mrb[30].mxu0 %vm5304_vm3, %v13241_v7 }
 0x663   : > { %9228 = vmatprep.mubr.msk.f32.mxu0 %vm5304_vm3, %v13178_v34 }
 0x666   : > { %9229 = vmatmul.mubr.msk.f32.vlgmr.msra.gmra.mrb[32].mxu0 %vm5304_vm3, %v13187_v16 }
 0x667   : > { %9231 = vmatprep.mubr.msk.f32.mxu0 %vm5304_vm3, %v13201_v17 }
 0x66a   : > { %9232 = vmatmul.mubr.msk.f32.gmra.mrb[34].mxu0 %vm5304_vm3, %v13212_v54 }
 0x66b   : > { %9234 = vmatprep.mubr.msk.f32.mxu0 %vm5304_vm3, %v13220_v31 }
 0x66e   : > { %9235 = vmatmul.mubr.msk.f32.gmra.mrb[36].mxu0 %vm5304_vm3, %v13227_v32 }
 0x66f   : > { %9237 = vmatprep.mubr.msk.f32.mxu0 %vm5304_vm3, %v13234_v4  ;;  %v6324_v4 = vld [vmem:[#allocation5 + $0x30] sm:$0xff] }
 0x672   : > { %9238 = vmatmul.mubr.msk.f32.gmra.mrb[38].mxu0 %vm5304_vm3, %v13241_v7  ;;  %v6323_v7 = vld [vmem:[#allocation5 + $0x28] sm:$0xff] }
 0x673   : > { %6454 = vmatprep.mubr.f32.mxu0 %v6319_v45  ;;  %v6334_v45 = vld [vmem:[#allocation5 + $0x80] sm:$0xff] }
 0x6ad   : > { %v9118_v58 = vpop.f32.mrb[224].mxu0 }
 0x6ae   : > { %v5399_v21 = vpop.f32.mrb[225].mxu0 }
 0x6af   : > { %v9747_v63 = vpack.c.bf16 %v9118_v58, %v5399_v21 }
 0x6b5   : > { %v9121_v19 = vpop.f32.mrb[226].mxu0 }
 0x6b6   : > { %v5409_v61 = vpop.f32.mrb[227].mxu0 }
 0x6b7   : > { %v9751_v47 = vpack.c.bf16 %v9121_v19, %v5409_v61  ;;  %v6339_v61 = vld [vmem:[#allocation5 + $0xa8] sm:$0xff] }
 0x6bd   : > { %v9124_v46 = vpop.f32.mrb[228].mxu0 }
 0x6be   : > { %v5419_v41 = vpop.f32.mrb[229].mxu0 }
 0x6bf   : > { %v9755_v51 = vpack.c.bf16 %v9124_v46, %v5419_v41  ;;  %v6338_v41 = vld [vmem:[#allocation5 + $0xa0] sm:$0xff] }
 0x6c5   : > { %v9127_v0 = vpop.f32.mrb[230].mxu0 }
 0x6c6   : > { %v5429_v52 = vpop.f32.mrb[231].mxu0 }
 0x6c7   : > { %v9759_v55 = vpack.c.bf16 %v9127_v0, %v5429_v52  ;;  %v6344_v0 = vld [vmem:[#allocation5 + $0xd0] sm:$0xff] }
 0x6c9   : > { %v9132_v34 = vpop.f32.mrb[232].mxu0 }
 0x6ca   : > { %v5509_v23 = vpop.f32.mrb[233].mxu0 }
 0x6cb   : > { %v9763_v48 = vpack.c.bf16 %v9132_v34, %v5509_v23  ;;  %v6343_v34 = vld [vmem:[#allocation5 + $0xc8] sm:$0xff] }
 0x6cd   : > { %v9135_v33 = vpop.f32.mrb[234].mxu0 }
 0x6ce   : > { %v5519_v11 = vpop.f32.mrb[235].mxu0 }
 0x6cf   : > { %v9767_v60 = vpack.c.bf16 %v9135_v33, %v5519_v11 }
 0x6d1   : > { %v9138_v39 = vpop.f32.mrb[236].mxu0 }
 0x6d2   : > { %v5529_v15 = vpop.f32.mrb[237].mxu0 }
 0x6d3   : > { %v9771_v16 = vpack.c.bf16 %v9138_v39, %v5529_v15  ;;  %v6354_v15 = vld [vmem:[#allocation5 + $0x120] sm:$0xff] }
 0x6d5   : > { %v9141_v22 = vpop.f32.mrb[238].mxu0 }
 0x6d6   : > { %v5539_v9 = vpop.f32.mrb[239].mxu0 }
 0x6d7   : > { %v9775_v26 = vpack.c.bf16 %v9141_v22, %v5539_v9  ;;  %v6353_v9 = vld [vmem:[#allocation5 + $0x118] sm:$0xff] }
 0x6d9   : > { %v9146_v3 = vpop.f32.mrb[240].mxu0 }
 0x6da   : > { %v5619_v43 = vpop.f32.mrb[241].mxu0 }
 0x6db   : > { %v9745_v28 = vpack.c.bf16 %v9146_v3, %v5619_v43  ;;  %v6321_v3 = vld [vmem:[#allocation5 + $0x18] sm:$0xff] }
 0x6dd   : > { %v9149_v40 = vpop.f32.mrb[242].mxu0  ;;  %9746 = vmatprep.subr.bf16.mxu0 %v9745_v28 }
 0x6de   : > { %v5629_v1 = vpop.f32.mrb[243].mxu0  ;;  %9748 = vmatpush3.bf16.msra.mxu0 %v9747_v63  ;;  %v6333_v63 = vld [vmem:[#allocation5 + $0x78] sm:$0xff] }
 0x6df   : > { %v9749_v17 = vpack.c.bf16 %v9149_v40, %v5629_v1 }
 0x6e1   : > { %v9152_v59 = vpop.f32.mrb[244].mxu0  ;;  %9750 = vmatprep.subr.bf16.mxu0 %v9749_v17 }
 0x6e2   : > { %v5639_v35 = vpop.f32.mrb[245].mxu0  ;;  %9752 = vmatpush3.bf16.msra.mxu0 %v9751_v47 }
 0x6e3   : > { %v9753_v53 = vpack.c.bf16 %v9152_v59, %v5639_v35 }
 0x6e5   : > { %v9155_v6 = vpop.f32.mrb[246].mxu0  ;;  %9754 = vmatprep.subr.bf16.mxu0 %v9753_v53 }
 0x6e6   : > { %v5649_v37 = vpop.f32.mrb[247].mxu0  ;;  %9756 = vmatpush3.bf16.msra.mxu0 %v9755_v51 }
 0x6e7   : > { %v9757_v5 = vpack.c.bf16 %v9155_v6, %v5649_v37 }
 0x6e9   : > { %v9160_v57 = vpop.f32.mrb[248].mxu0  ;;  %9758 = vmatprep.subr.bf16.mxu0 %v9757_v5 }
 0x6ea   : > { %v5729_v54 = vpop.f32.mrb[249].mxu0  ;;  %9760 = vmatpush3.bf16.msra.mxu0 %v9759_v55 }
 0x6eb   : > { %v9761_v42 = vpack.c.bf16 %v9160_v57, %v5729_v54 }
 0x6ed   : > { %v9163_v24 = vpop.f32.mrb[250].mxu0  ;;  %9762 = vmatprep.subr.bf16.mxu0 %v9761_v42 }
 0x6ee   : > { %v5739_v27 = vpop.f32.mrb[251].mxu0  ;;  %9764 = vmatpush3.bf16.msra.mxu0 %v9763_v48  ;;  %v6349_v48 = vld [vmem:[#allocation5 + $0xf8] sm:$0xff] }
 0x6ef   : > { %v9765_v18 = vpack.c.bf16 %v9163_v24, %v5739_v27 }
 0x6f1   : > { %v9166_v14 = vpop.f32.mrb[252].mxu0  ;;  %9766 = vmatprep.subr.bf16.mxu0 %v9765_v18 }
 0x6f2   : > { %v5749_v50 = vpop.f32.mrb[253].mxu0  ;;  %9768 = vmatpush3.bf16.msra.mxu0 %v9767_v60  ;;  %v6348_v60 = vld [vmem:[#allocation5 + $0xf0] sm:$0xff] }
 0x6f3   : > { %v9769_v31 = vpack.c.bf16 %v9166_v14, %v5749_v50 }
 0x6f5   : > { %v9169_v62 = vpop.f32.mrb[254].mxu0  ;;  %9770 = vmatprep.subr.bf16.mxu0 %v9769_v31 }
 0x6f6   : > { %v5759_v8 = vpop.f32.mrb[255].mxu0  ;;  %9772 = vmatpush3.bf16.msra.mxu0 %v9771_v16 }
 0x6f7   : > { %v9773_v30 = vpack.c.bf16 %v9169_v62, %v5759_v8 }
 0x6f9   : > { %v13404_v32 = vpop.f32.mrb[0].mxu0  ;;  %9774 = vmatprep.subr.bf16.mxu0 %v9773_v30 }
 0x6fa   : > { %v5839_v36 = vpop.f32.mrb[1].mxu0  ;;  %9776 = vmatpush3.bf16.msra.mxu0 %v9775_v26 }
 0x6fb   : > { %v9779_v56 = vpack.c.bf16 %v13404_v32, %v5839_v36 }
 0x6fd   : > { %v9177_v13 = vpop.f32.mrb[2].mxu0  ;;  %6455 = vmatmul.mubr.f32.vlgmr.msra.gmra.mrb[40].mxu0 %v6318_v49 }
 0x6fe   : > { %v5849_v44 = vpop.f32.mrb[3].mxu0  ;;  %6459 = vmatprep.mubr.f32.mxu0 %v6324_v4 }
 0x6ff   : > { %v9783_v38 = vpack.c.bf16 %v9177_v13, %v5849_v44  ;;  %v6326_v13 = vld [vmem:[#allocation5 + $0x40] sm:$0xff] }
 0x701   : > { %v9180_v25 = vpop.f32.mrb[4].mxu0  ;;  %6460 = vmatmul.mubr.f32.gmra.mrb[42].mxu0 %v6323_v7 }
 0x702   : > { %v5859_v29 = vpop.f32.mrb[5].mxu0  ;;  %6464 = vmatprep.mubr.f32.mxu0 %v6329_v2 }
 0x703   : > { %v9787_v12 = vpack.c.bf16 %v9180_v25, %v5859_v29  ;;  %v6331_v25 = vld [vmem:[#allocation5 + $0x68] sm:$0xff] }
 0x705   : > { %v9183_v58 = vpop.f32.mrb[6].mxu0  ;;  %6465 = vmatmul.mubr.f32.gmra.mrb[44].mxu0 %v6328_v20 }
 0x706   : > { %v5869_v21 = vpop.f32.mrb[7].mxu0  ;;  %6469 = vmatprep.mubr.f32.mxu0 %v6334_v45 }
 0x707   : > { %v9791_v19 = vpack.c.bf16 %v9183_v58, %v5869_v21  ;;  %v6336_v58 = vld [vmem:[#allocation5 + $0x90] sm:$0xff] }
 0x709   : > { %v9188_v47 = vpop.f32.mrb[8].mxu0  ;;  %6470 = vmatmul.mubr.f32.gmra.mrb[46].mxu0 %v6333_v63 }
 0x70a   : > { %v5949_v46 = vpop.f32.mrb[9].mxu0  ;;  %6474 = vmatprep.mubr.f32.mxu0 %v6339_v61 }
 0x70b   : > { %v9795_v51 = vpack.c.bf16 %v9188_v47, %v5949_v46  ;;  %v6341_v47 = vld [vmem:[#allocation5 + $0xb8] sm:$0xff]  ;;  %v6340_v46 = vld [vmem:[#allocation5 + $0xb0] sm:$0xff] }
 0x70d   : > { %v9191_v52 = vpop.f32.mrb[10].mxu0  ;;  %6475 = vmatmul.mubr.f32.gmra.mrb[48].mxu0 %v6338_v41  ;;  %v6346_v41 = vld [vmem:[#allocation5 + $0xe0] sm:$0xff] }
 0x70e   : > { %v5959_v55 = vpop.f32.mrb[11].mxu0  ;;  %6479 = vmatprep.mubr.f32.mxu0 %v6344_v0  ;;  %v6351_v0 = vld [vmem:[#allocation5 + $0x108] sm:$0xff] }
 0x70f   : > { %v9799_v23 = vpack.c.bf16 %v9191_v52, %v5959_v55  ;;  %v6350_v52 = vld [vmem:[#allocation5 + $0x100] sm:$0xff]  ;;  %v6356_v55 = vld [vmem:[#allocation5 + $0x130] sm:$0xff] }
 0x711   : > { %v9194_v33 = vpop.f32.mrb[12].mxu0  ;;  %6480 = vmatmul.mubr.f32.gmra.mrb[50].mxu0 %v6343_v34  ;;  %v6355_v34 = vld [vmem:[#allocation5 + $0x128] sm:$0xff] }
 0x712   : > { %v5969_v11 = vpop.f32.mrb[13].mxu0  ;;  %6484 = vmatprep.mubr.f32.mxu0 %v6349_v48  ;;  %v6327_v48 = vld [vmem:[#allocation5 + $0x48] sm:$0xff] }
 0x713   : > { %v9803_v39 = vpack.c.bf16 %v9194_v33, %v5969_v11  ;;  %v6332_v33 = vld [vmem:[#allocation5 + $0x70] sm:$0xff]  ;;  %v6337_v11 = vld [vmem:[#allocation5 + $0x98] sm:$0xff] }
 0x715   : > { %v9197_v16 = vpop.f32.mrb[14].mxu0  ;;  %6485 = vmatmul.mubr.f32.gmra.mrb[52].mxu0 %v6348_v60  ;;  %v6342_v60 = vld [vmem:[#allocation5 + $0xc0] sm:$0xff] }
 0x716   : > { %v5979_v22 = vpop.f32.mrb[15].mxu0  ;;  %6489 = vmatprep.mubr.f32.mxu0 %v6354_v15  ;;  %v6352_v15 = vld [vmem:[#allocation5 + $0x110] sm:$0xff] }
 0x717   : > { %v9807_v26 = vpack.c.bf16 %v9197_v16, %v5979_v22  ;;  %v6357_v16 = vld [vmem:[#allocation5 + $0x138] sm:$0xff]  ;;  %v6719_v22 = vld [vmem:[%s13531_s6] sm:$0xff] }
 0x719   : > { %v9202_v43 = vpop.f32.mrb[16].mxu0  ;;  %6490 = vmatmul.mubr.f32.gmra.mrb[54].mxu0 %v6353_v9 }
 0x71a   : > { %v6059_v28 = vpop.f32.mrb[17].mxu0  ;;  %6559 = vmatprep.mubr.f32.mxu0 %v6321_v3 }
 0x71b   : > { %v9777_v40 = vpack.c.bf16 %v9202_v43, %v6059_v28 }
 0x71d   : > { %v9205_v1 = vpop.f32.mrb[18].mxu0  ;;  %9778 = vmatprep.subr.bf16.mxu0 %v9777_v40 }
 0x71e   : > { %v6069_v17 = vpop.f32.mrb[19].mxu0  ;;  %9780 = vmatpush3.bf16.msra.mxu0 %v9779_v56  ;;  %v6320_v56 = vld [vmem:[#allocation5 + $0x10] sm:$0xff] }
 0x71f   : > { %v9781_v59 = vpack.c.bf16 %v9205_v1, %v6069_v17 }
 0x721   : > { %v9208_v35 = vpop.f32.mrb[20].mxu0  ;;  %9782 = vmatprep.subr.bf16.mxu0 %v9781_v59 }
 0x722   : > { %v6079_v53 = vpop.f32.mrb[21].mxu0  ;;  %9784 = vmatpush3.bf16.msra.mxu0 %v9783_v38  ;;  %v6325_v38 = vld [vmem:[#allocation5 + $0x38] sm:$0xff] }
 0x723   : > { %v9785_v6 = vpack.c.bf16 %v9208_v35, %v6079_v53 }
 0x725   : > { %v9211_v37 = vpop.f32.mrb[22].mxu0  ;;  %9786 = vmatprep.subr.bf16.mxu0 %v9785_v6 }
 0x726   : > { %v6089_v5 = vpop.f32.mrb[23].mxu0  ;;  %9788 = vmatpush3.bf16.msra.mxu0 %v9787_v12  ;;  %v6330_v12 = vld [vmem:[#allocation5 + $0x60] sm:$0xff] }
 0x727   : > { %v9789_v57 = vpack.c.bf16 %v9211_v37, %v6089_v5 }
 0x729   : > { %v9216_v54 = vpop.f32.mrb[24].mxu0  ;;  %9790 = vmatprep.subr.bf16.mxu0 %v9789_v57 }
 0x72a   : > { %v6169_v42 = vpop.f32.mrb[25].mxu0  ;;  %9792 = vmatpush3.bf16.msra.mxu0 %v9791_v19  ;;  %v6335_v19 = vld [vmem:[#allocation5 + $0x88] sm:$0xff] }
 0x72b   : > { %v9793_v24 = vpack.c.bf16 %v9216_v54, %v6169_v42 }
 0x72d   : > { %v9219_v27 = vpop.f32.mrb[26].mxu0  ;;  %9794 = vmatprep.subr.bf16.mxu0 %v9793_v24 }
 0x72e   : > { %v6179_v18 = vpop.f32.mrb[27].mxu0  ;;  %9796 = vmatpush3.bf16.msra.mxu0 %v9795_v51  ;;  %v6345_v51 = vld [vmem:[#allocation5 + $0xd8] sm:$0xff] }
 0x72f   : > { %v9797_v14 = vpack.c.bf16 %v9219_v27, %v6179_v18 }
 0x731   : > { %v9222_v50 = vpop.f32.mrb[28].mxu0  ;;  %9798 = vmatprep.subr.bf16.mxu0 %v9797_v14 }
 0x732   : > { %v6189_v31 = vpop.f32.mrb[29].mxu0  ;;  %9800 = vmatpush3.bf16.msra.mxu0 %v9799_v23  ;;  %v6322_v23 = vld [vmem:[#allocation5 + $0x20] sm:$0xff] }
 0x733   : > { %v9801_v62 = vpack.c.bf16 %v9222_v50, %v6189_v31 }
 0x735   : > { %v9225_v8 = vpop.f32.mrb[30].mxu0  ;;  %9802 = vmatprep.subr.bf16.mxu0 %v9801_v62 }
 0x736   : > { %v6199_v30 = vpop.f32.mrb[31].mxu0  ;;  %9804 = vmatpush3.bf16.msra.mxu0 %v9803_v39  ;;  %v6347_v39 = vld [vmem:[#allocation5 + $0xe8] sm:$0xff] }
 0x737   : > { %v9805_v32 = vpack.c.bf16 %v9225_v8, %v6199_v30  ;;  %v8086_v30 = vld [vmem:[#allocation10] ss:$0 sm:$0xff] }
 0x739   : > { %v9230_v36 = vpop.f32.mrb[32].mxu0  ;;  %9806 = vmatprep.subr.bf16.mxu0 %v9805_v32 }
 0x73a   : > { %v6279_v49 = vpop.f32.mrb[33].mxu0  ;;  %9808 = vmatpush3.bf16.msra.mxu0 %v9807_v26  ;;  %v13421_v26 = vld [vmem:[%s13531_s6 + $0x8] sm:$0xff] }
 0x73b   : > { %v9809_v4 = vpack.c.bf16 %v9230_v36, %v6279_v49 }
 0x73d   : > { %v9233_v44 = vpop.f32.mrb[34].mxu0  ;;  %6560 = vmatmul.mubr.f32.vlgmr.msra.gmra.mrb[56].mxu0 %v6320_v56  ;;  %9810 = vmatprep.subr.bf16.mxu0 %v9809_v4 }
 0x73e   : > { %v6289_v7 = vpop.f32.mrb[35].mxu0  ;;  %9812 = vmatpush3.bf16.msra.mxu0 %v9809_v4  ;;  %6564 = vmatprep.mubr.f32.mxu0 %v6326_v13 }
 0x73f   : > { %v9813_v2 = vpack.c.bf16 %v9233_v44, %v6289_v7 }
 0x741   : > { %v9236_v29 = vpop.f32.mrb[36].mxu0  ;;  %6565 = vmatmul.mubr.f32.gmra.mrb[58].mxu0 %v6325_v38  ;;  %9814 = vmatprep.subr.bf16.mxu0 %v9813_v2 }
 0x742   : > { %v6299_v20 = vpop.f32.mrb[37].mxu0  ;;  %9816 = vmatpush3.bf16.msra.mxu0 %v9813_v2  ;;  %6569 = vmatprep.mubr.f32.mxu0 %v6331_v25 }
 0x743   : > { %v9817_v45 = vpack.c.bf16 %v9236_v29, %v6299_v20 }
 0x745   : > { %v9239_v21 = vpop.f32.mrb[38].mxu0  ;;  %6570 = vmatmul.mubr.f32.gmra.mrb[60].mxu0 %v6330_v12  ;;  %9818 = vmatprep.subr.bf16.mxu0 %v9817_v45 }
 0x746   : > { %v6309_v63 = vpop.f32.mrb[39].mxu0  ;;  %9820 = vmatpush3.bf16.msra.mxu0 %v9817_v45  ;;  %6574 = vmatprep.mubr.f32.mxu0 %v6336_v58 }
 0x747   : > { %v9821_v61 = vpack.c.bf16 %v9239_v21, %v6309_v63 }
 0x749   : > { %6575 = vmatmul.mubr.f32.gmra.mrb[62].mxu0 %v6335_v19  ;;  %9822 = vmatprep.subr.bf16.mxu0 %v9821_v61 }
 0x74a   : > { %9824 = vmatpush3.bf16.msra.mxu0 %v9821_v61  ;;  %6579 = vmatprep.mubr.f32.mxu0 %v6341_v47 }
 0x74b   : > { %9268 = vmatprep.subr.mxu0 %v6719_v22 }
 0x74d   : > { %6580 = vmatmul.mubr.f32.gmra.mrb[64].mxu0 %v6340_v46 }
 0x74e   : > { %6584 = vmatprep.mubr.f32.mxu0 %v6346_v41 }
 0x751   : > { %6585 = vmatmul.mubr.f32.gmra.mrb[66].mxu0 %v6345_v51 }
 0x752   : > { %6589 = vmatprep.mubr.f32.mxu0 %v6351_v0 }
 0x755   : > { %6590 = vmatmul.mubr.f32.gmra.mrb[68].mxu0 %v6350_v52 }
 0x756   : > { %6594 = vmatprep.mubr.f32.mxu0 %v6356_v55 }
 0x759   : > { %6595 = vmatmul.mubr.f32.gmra.mrb[70].mxu0 %v6355_v34 }
 0x75a   : > { %9256 = vmatprep.mubr.msk.f32.mxu0 %vm6365_vm4, %v6322_v23 }
 0x75d   : > { %9257 = vmatmul.mubr.msk.f32.vlgmr.msra.gmra.mrb[72].mxu0 %vm6365_vm4, %v6327_v48 }
 0x75e   : > { %9259 = vmatprep.mubr.msk.f32.mxu0 %vm6365_vm4, %v6332_v33  ;;  %9269 = vmatpush3.msra.mxu0 %v6719_v22 }
 0x75f   : > { %9273 = vmatprep.subr.mxu0 %v13421_v26 }
 0x761   : > { %9260 = vmatmul.mubr.msk.f32.gmra.mrb[74].mxu0 %vm6365_vm4, %v6337_v11 }
 0x762   : > { %9262 = vmatprep.mubr.msk.f32.mxu0 %vm6365_vm4, %v6342_v60 }
 0x765   : > { %9263 = vmatmul.mubr.msk.f32.gmra.mrb[76].mxu0 %vm6365_vm4, %v6347_v39 }
 0x766   : > { %9265 = vmatprep.mubr.msk.f32.mxu0 %vm6365_vm4, %v6352_v15 }
 0x769   : > { %9266 = vmatmul.mubr.msk.f32.gmra.mrb[78].mxu0 %vm6365_vm4, %v6357_v16 }
 0x7d0   : > { %v8541_v9 = vpop.f32.mrb[40].mxu0 }
 0x7d1   : > { %v8542_v3 = vpop.f32.mrb[41].mxu0 }
 0x7d2   : > { %v8543_v43 = vadd.f32 %v8542_v3, %v8541_v9 }
 0x7d4   : > { %v8544_v28 = vpop.f32.mrb[42].mxu0  ;;  %v6457_v49 = vadd.f32 %v8543_v43, %v8086_v30 }
 0x7d5   : > { %v8545_v40 = vpop.f32.mrb[43].mxu0 }
 0x7d6   : > { %v8546_v1 = vadd.f32 %v8545_v40, %v8544_v28 }
 0x7d8   : > { %v8547_v17 = vpop.f32.mrb[44].mxu0  ;;  %v6462_v7 = vadd.f32 %v8546_v1, %v8086_v30 }
 0x7d9   : > { %v8548_v59 = vpop.f32.mrb[45].mxu0 }
 0x7da   : > { %v8549_v35 = vadd.f32 %v8548_v59, %v8547_v17 }
 0x7dc   : > { %v8550_v53 = vpop.f32.mrb[46].mxu0  ;;  %v6467_v20 = vadd.f32 %v8549_v35, %v8086_v30 }
 0x7dd   : > { %v8551_v6 = vpop.f32.mrb[47].mxu0 }
 0x7de   : > { %v8552_v37 = vadd.f32 %v8551_v6, %v8550_v53 }
 0x7e0   : > { %v8553_v5 = vpop.f32.mrb[48].mxu0  ;;  %v6472_v63 = vadd.f32 %v8552_v37, %v8086_v30 }
 0x7e1   : > { %v8554_v57 = vpop.f32.mrb[49].mxu0 }
 0x7e2   : > { %v8555_v54 = vadd.f32 %v8554_v57, %v8553_v5 }
 0x7e4   : > { %v8556_v42 = vpop.f32.mrb[50].mxu0  ;;  %v6477_v41 = vadd.f32 %v8555_v54, %v8086_v30 }
 0x7e5   : > { %v8557_v24 = vpop.f32.mrb[51].mxu0 }
 0x7e6   : > { %v8558_v27 = vadd.f32 %v8557_v24, %v8556_v42 }
 0x7e8   : > { %v8559_v18 = vpop.f32.mrb[52].mxu0  ;;  %v6482_v34 = vadd.f32 %v8558_v27, %v8086_v30 }
 0x7e9   : > { %v8560_v14 = vpop.f32.mrb[53].mxu0 }
 0x7ea   : > { %v8561_v50 = vadd.f32 %v8560_v14, %v8559_v18 }
 0x7ec   : > { %v8562_v31 = vpop.f32.mrb[54].mxu0  ;;  %v6487_v60 = vadd.f32 %v8561_v50, %v8086_v30 }
 0x7ed   : > { %v8563_v62 = vpop.f32.mrb[55].mxu0 }
 0x7ee   : > { %v8564_v8 = vadd.f32 %v8563_v62, %v8562_v31 }
 0x7f0   : > { %v6492_v9 = vadd.f32 %v8564_v8, %v8086_v30 }
 0x810   : > { %v8597_v32 = vpop.f32.mrb[56].mxu0 }
 0x811   : > { %v8598_v36 = vpop.f32.mrb[57].mxu0 }
 0x812   : > { %v8599_v56 = vadd.f32 %v8598_v36, %v8597_v32 }
 0x814   : > { %v8600_v4 = vpop.f32.mrb[58].mxu0  ;;  %v6562_v13 = vadd.f32 %v8599_v56, %v6457_v49 }
 0x815   : > { %v8601_v44 = vpop.f32.mrb[59].mxu0 }
 0x816   : > { %v8602_v38 = vadd.f32 %v8601_v44, %v8600_v4 }
 0x818   : > { %v8603_v2 = vpop.f32.mrb[60].mxu0  ;;  %v6567_v25 = vadd.f32 %v8602_v38, %v6462_v7  ;;  %v8100_v38 = vld [vmem:[%s13531_s6 + $0x10] sm:$0xff] }
 0x819   : > { %v8604_v29 = vpop.f32.mrb[61].mxu0 }
 0x81a   : > { %v8605_v12 = vadd.f32 %v8604_v29, %v8603_v2  ;;  %v8103_v2 = vld [vmem:[%s13531_s6 + $0x18] sm:$0xff]  ;;  %v8112_v29 = vld [vmem:[%s13531_s6 + $0x30] sm:$0xff] }
 0x81c   : > { %v8606_v45 = vpop.f32.mrb[62].mxu0  ;;  %v6572_v58 = vadd.f32 %v8605_v12, %v6467_v20  ;;  %v8115_v20 = vld [vmem:[%s13531_s6 + $0x38] sm:$0xff]  ;;  %v8118_v12 = vld [vmem:[%s13531_s6 + $0x40] sm:$0xff] }
 0x81d   : > { %v8607_v21 = vpop.f32.mrb[63].mxu0 }
 0x81e   : > { %v8608_v19 = vadd.f32 %v8607_v21, %v8606_v45  ;;  %v7419_v45 = vld [vmem:[#allocation7 + $0x8] sm:$0xff] }
 0x820   : > { %v8609_v61 = vpop.f32.mrb[64].mxu0  ;;  %v6577_v47 = vadd.f32 %v8608_v19, %v6472_v63 }
 0x821   : > { %v8610_v46 = vpop.f32.mrb[65].mxu0 }
 0x822   : > { %v8611_v51 = vadd.f32 %v8610_v46, %v8609_v61 }
 0x824   : > { %v8612_v0 = vpop.f32.mrb[66].mxu0  ;;  %v6582_v52 = vadd.f32 %v8611_v51, %v6477_v41 }
 0x825   : > { %v8613_v55 = vpop.f32.mrb[67].mxu0 }
 0x826   : > { %v8614_v23 = vadd.f32 %v8613_v55, %v8612_v0 }
 0x828   : > { %v8615_v48 = vpop.f32.mrb[68].mxu0  ;;  %v6587_v33 = vadd.f32 %v8614_v23, %v6482_v34 }
 0x829   : > { %v8616_v11 = vpop.f32.mrb[69].mxu0 }
 0x82a   : > { %v8617_v39 = vadd.f32 %v8616_v11, %v8615_v48 }
 0x82c   : > { %v8618_v15 = vpop.f32.mrb[70].mxu0  ;;  %v6592_v16 = vadd.f32 %v8617_v39, %v6487_v60 }
 0x82d   : > { %v8619_v22 = vpop.f32.mrb[71].mxu0 }
 0x82e   : > { %v8620_v3 = vadd.f32 %v8619_v22, %v8618_v15 }
 0x830   : > { %v9258_v43 = vpop.f32.mrb[72].mxu0  ;;  %v6597_v28 = vadd.f32 %v8620_v3, %v6492_v9 }
 0x831   : > { %v6672_v40 = vadd.f32 %v9258_v43, %v6567_v25  ;;  %v6666_v1 = vpop.f32.mrb[73].mxu0  ;;  %v8106_v25 = vld [vmem:[%s13531_s6 + $0x20] sm:$0xff] }
 0x832   : > { %v6667_v17 = vadd.f32 %v6666_v1, %v6562_v13  ;;  %v7418_v1 = vld [vmem:[#allocation7] sm:$0xff] }
 0x833   : > { %10535 = vtanh.f32 %v6672_v40 }
 0x834   : > { %v9261_v59 = vpop.f32.mrb[74].mxu0  ;;  %10537 = vtanh.f32 %v6667_v17  ;;  %v7421_v17 = vld [vmem:[#allocation7 + $0x18] sm:$0xff] }
 0x835   : > { %v6682_v35 = vadd.f32 %v9261_v59, %v6577_v47  ;;  %v6676_v53 = vpop.f32.mrb[75].mxu0  ;;  %v7420_v59 = vld [vmem:[#allocation7 + $0x10] sm:$0xff] }
 0x836   : > { %v6677_v6 = vadd.f32 %v6676_v53, %v6572_v58  ;;  %v7422_v53 = vld [vmem:[#allocation7 + $0x20] sm:$0xff] }
 0x837   : > { %10539 = vtanh.f32 %v6682_v35  ;;  %v7423_v35 = vld [vmem:[#allocation7 + $0x28] sm:$0xff] }
 0x838   : > { %10541 = vtanh.f32 %v6677_v6  ;;  %v9264_v37 = vpop.f32.mrb[76].mxu0  ;;  %v7425_v6 = vld [vmem:[#allocation7 + $0x38] sm:$0xff] }
 0x839   : > { %v6692_v5 = vadd.f32 %v9264_v37, %v6587_v33  ;;  %v6686_v57 = vpop.f32.mrb[77].mxu0  ;;  %v7424_v37 = vld [vmem:[#allocation7 + $0x30] sm:$0xff] }
 0x83a   : > { %v6687_v54 = vadd.f32 %v6686_v57, %v6582_v52 }
 0x83b   : > { %10543 = vtanh.f32 %v6692_v5 }
 0x83c   : > { %v9267_v42 = vpop.f32.mrb[78].mxu0  ;;  %10545 = vtanh.f32 %v6687_v54 }
 0x83d   : > { %v6702_v24 = vadd.f32 %v9267_v42, %v6597_v28  ;;  %v6696_v27 = vpop.f32.mrb[79].mxu0  ;;  %v10536_v14 = vpop.eup %10535 }
 0x83e   : > { %v6697_v18 = vadd.f32 %v6696_v27, %v6592_v16  ;;  %v10538_v50 = vpop.eup %10537 }
 0x83f   : > { %10547 = vtanh.f32 %v6702_v24 }
 0x840   : > { %10549 = vtanh.f32 %v6697_v18 }
 0x841   : > { %v10540_v31 = vpop.eup %10539 }
 0x842   : > { %v10542_v62 = vpop.eup %10541  ;;  %v6714_v8 = vmax.f32 %v10536_v14, %v10540_v31 }
 0x843   : > { %v6713_v30 = vmax.f32 %v10538_v50, %v10542_v62 }
 0x845   : > { %v10544_v32 = vpop.eup %10543 }
 0x846   : > { %v10546_v36 = vpop.eup %10545 }
 0x849   : > { %v10548_v49 = vpop.eup %10547 }
 0x84a   : > { %v10550_v56 = vpop.eup %10549  ;;  %v6716_v4 = vmax.f32 %v10544_v32, %v10548_v49 }
 0x84b   : > { %v6715_v13 = vmax.f32 %v10546_v36, %v10550_v56 }
 0x84c   : > { %v6718_v44 = vmax.f32 %v6714_v8, %v6716_v4 }
 0x84d   : > { %v6717_v7 = vmax.f32 %v6713_v30, %v6715_v13 }
 0x84f   : > { %9270 = vmatprep.mubr.msk.f32.mxu0 %vm6720_vm5, %v6717_v7 }
 0x850   : > { %9271 = vmatmul.mubr.msk.f32.vlgmr.msra.gmra.mrb[80].mxu0 %vm6720_vm5, %v6718_v44 }
 0x851   : > { %9274 = vmatpush3.msra.mxu0 %v13421_v26  ;;  %9275 = vmatprep.mubr.msk.f32.mxu0 %vm6720_vm5, %v6717_v7  ;;  %v8109_v26 = vld [vmem:[%s13531_s6 + $0x28] sm:$0xff] }
 0x852   : > { %9278 = vmatprep.subr.mxu0 %v8100_v38 }
 0x854   : > { %9276 = vmatmul.mubr.msk.f32.vlgmr.msra.gmra.mrb[82].mxu0 %vm6720_vm5, %v6718_v44 }
 0x855   : > { %9279 = vmatpush3.msra.mxu0 %v8100_v38  ;;  %9280 = vmatprep.mubr.msk.f32.mxu0 %vm6720_vm5, %v6717_v7 }
 0x856   : > { %9283 = vmatprep.subr.mxu0 %v8103_v2 }
 0x858   : > { %9281 = vmatmul.mubr.msk.f32.vlgmr.msra.gmra.mrb[84].mxu0 %vm6720_vm5, %v6718_v44 }
 0x859   : > { %9284 = vmatpush3.msra.mxu0 %v8103_v2  ;;  %9285 = vmatprep.mubr.msk.f32.mxu0 %vm6720_vm5, %v6717_v7 }
 0x85a   : > { %9288 = vmatprep.subr.mxu0 %v8106_v25 }
 0x85c   : > { %9286 = vmatmul.mubr.msk.f32.vlgmr.msra.gmra.mrb[86].mxu0 %vm6720_vm5, %v6718_v44 }
 0x85d   : > { %9289 = vmatpush3.msra.mxu0 %v8106_v25  ;;  %9290 = vmatprep.mubr.msk.f32.mxu0 %vm6720_vm5, %v6717_v7 }
 0x85e   : > { %9293 = vmatprep.subr.mxu0 %v8109_v26 }
 0x860   : > { %9291 = vmatmul.mubr.msk.f32.vlgmr.msra.gmra.mrb[88].mxu0 %vm6720_vm5, %v6718_v44 }
 0x861   : > { %9294 = vmatpush3.msra.mxu0 %v8109_v26  ;;  %9295 = vmatprep.mubr.msk.f32.mxu0 %vm6720_vm5, %v6717_v7 }
 0x862   : > { %9298 = vmatprep.subr.mxu0 %v8112_v29 }
 0x864   : > { %9296 = vmatmul.mubr.msk.f32.vlgmr.msra.gmra.mrb[90].mxu0 %vm6720_vm5, %v6718_v44 }
 0x865   : > { %9299 = vmatpush3.msra.mxu0 %v8112_v29  ;;  %9300 = vmatprep.mubr.msk.f32.mxu0 %vm6720_vm5, %v6717_v7 }
 0x866   : > { %9303 = vmatprep.subr.mxu0 %v8115_v20 }
 0x868   : > { %9301 = vmatmul.mubr.msk.f32.vlgmr.msra.gmra.mrb[92].mxu0 %vm6720_vm5, %v6718_v44 }
 0x869   : > { %9304 = vmatpush3.msra.mxu0 %v8115_v20  ;;  %9305 = vmatprep.mubr.msk.f32.mxu0 %vm6720_vm5, %v6717_v7 }
 0x86a   : > { %9308 = vmatprep.subr.mxu0 %v8118_v12 }
 0x86c   : > { %9306 = vmatmul.mubr.msk.f32.vlgmr.msra.gmra.mrb[94].mxu0 %vm6720_vm5, %v6718_v44 }
 0x86d   : > { %9309 = vmatpush3.msra.mxu0 %v8118_v12  ;;  %9310 = vmatprep.mubr.msk.f32.mxu0 %vm6720_vm5, %v6717_v7 }
 0x86e   : > { %9825 = vmatprep.subr.bf16.mxu0 %v13647_v10 }
 0x870   : > { %9311 = vmatmul.mubr.msk.f32.vlgmr.msra.gmra.mrb[96].mxu0 %vm6720_vm5, %v6718_v44 }
 0x871   : > { %8122 = vmatprep.mubr.msk.f32.mxu0 %vm7433_vm6, %v7419_v45 }
 0x923   : > { %v9272_v58 = vpop.f32.mrb[80].mxu0 }
 0x924   : > { %v6793_v21 = vpop.f32.mrb[81].mxu0 }
 0x925   : > { %v9826_v63 = vpack.c.bf16 %v9272_v58, %v6793_v21 }
 0x927   : > { %v9277_v19 = vpop.f32.mrb[82].mxu0  ;;  %9827 = vmatpush1.bf16.msra.mxu0 %v9826_v63 }
 0x928   : > { %v6870_v61 = vpop.f32.mrb[83].mxu0  ;;  %9828 = vmatprep.subr.bf16.mxu0 %v13647_v10 }
 0x929   : > { %v9829_v47 = vpack.c.bf16 %v9277_v19, %v6870_v61 }
 0x92b   : > { %v9282_v46 = vpop.f32.mrb[84].mxu0  ;;  %9830 = vmatpush1.bf16.msra.mxu0 %v9829_v47 }
 0x92c   : > { %v6947_v41 = vpop.f32.mrb[85].mxu0  ;;  %9831 = vmatprep.subr.bf16.mxu0 %v13647_v10 }
 0x92d   : > { %v9832_v51 = vpack.c.bf16 %v9282_v46, %v6947_v41 }
 0x92f   : > { %v9287_v0 = vpop.f32.mrb[86].mxu0  ;;  %9833 = vmatpush1.bf16.msra.mxu0 %v9832_v51 }
 0x930   : > { %v7024_v52 = vpop.f32.mrb[87].mxu0  ;;  %9834 = vmatprep.subr.bf16.mxu0 %v13647_v10 }
 0x931   : > { %v9835_v55 = vpack.c.bf16 %v9287_v0, %v7024_v52 }
 0x933   : > { %v9292_v34 = vpop.f32.mrb[88].mxu0  ;;  %9836 = vmatpush1.bf16.msra.mxu0 %v9835_v55 }
 0x934   : > { %v7101_v23 = vpop.f32.mrb[89].mxu0  ;;  %9837 = vmatprep.subr.bf16.mxu0 %v13647_v10 }
 0x935   : > { %v9838_v48 = vpack.c.bf16 %v9292_v34, %v7101_v23 }
 0x937   : > { %v9297_v33 = vpop.f32.mrb[90].mxu0  ;;  %9839 = vmatpush1.bf16.msra.mxu0 %v9838_v48 }
 0x938   : > { %v7178_v11 = vpop.f32.mrb[91].mxu0  ;;  %9840 = vmatprep.subr.bf16.mxu0 %v13647_v10 }
 0x939   : > { %v9841_v60 = vpack.c.bf16 %v9297_v33, %v7178_v11 }
 0x93b   : > { %v9302_v39 = vpop.f32.mrb[92].mxu0  ;;  %9842 = vmatpush1.bf16.msra.mxu0 %v9841_v60 }
 0x93c   : > { %v7255_v15 = vpop.f32.mrb[93].mxu0  ;;  %9843 = vmatprep.subr.bf16.mxu0 %v13647_v10 }
 0x93d   : > { %v9844_v16 = vpack.c.bf16 %v9302_v39, %v7255_v15 }
 0x93f   : > { %v9307_v22 = vpop.f32.mrb[94].mxu0  ;;  %9845 = vmatpush1.bf16.msra.mxu0 %v9844_v16 }
 0x940   : > { %v7332_v9 = vpop.f32.mrb[95].mxu0  ;;  %9846 = vmatprep.subr.bf16.mxu0 %v13647_v10 }
 0x941   : > { %v9847_v3 = vpack.c.bf16 %v9307_v22, %v7332_v9 }
 0x943   : > { %v9312_v43 = vpop.f32.mrb[96].mxu0  ;;  %9848 = vmatpush1.bf16.msra.mxu0 %v9847_v3 }
 0x944   : > { %v7409_v28 = vpop.f32.mrb[97].mxu0  ;;  %9849 = vmatprep.subr.bf16.mxu0 %v13647_v10  ;;  %v8121_v10 = vld [vmem:[#allocation11] ss:$0 sm:$0xff] }
 0x945   : > { %v9850_v40 = vpack.c.bf16 %v9312_v43, %v7409_v28 }
 0x947   : > { %9851 = vmatpush1.bf16.msra.mxu0 %v9850_v40 }
 0x94a   : > { %7511 = vmatmul.mubr.f32.vlgmr.msra.gmra.mrb[98].mxu0 %v7418_v1 }
 0x94b   : > { %8123 = vmatprep.mubr.msk.f32.mxu0 %vm7433_vm6, %v7421_v17 }
 0x94e   : > { %7516 = vmatmul.mubr.f32.gmra.mrb[100].mxu0 %v7420_v59 }
 0x94f   : > { %8124 = vmatprep.mubr.msk.f32.mxu0 %vm7433_vm6, %v7423_v35 }
 0x952   : > { %7521 = vmatmul.mubr.f32.gmra.mrb[102].mxu0 %v7422_v53 }
 0x953   : > { %8125 = vmatprep.mubr.msk.f32.mxu0 %vm7433_vm6, %v7425_v6 }
 0x956   : > { %7526 = vmatmul.mubr.f32.gmra.mrb[104].mxu0 %v7424_v37 }
 0xa1d   : > { %v7512_v5 = vpop.f32.mrb[98].mxu0 }
 0xa1e   : > { %v7514_v57 = vpop.f32.mrb[99].mxu0  ;;  %v7513_v54 = vadd.f32 %v8121_v10, %v7512_v5 }
 0xa20   : > { %10551 = vtanh.f32 %v7513_v54 }
 0xa21   : > { %v7517_v42 = vpop.f32.mrb[100].mxu0 }
 0xa22   : > { %v7518_v24 = vadd.f32 %v8121_v10, %v7517_v42  ;;  %v7519_v27 = vpop.f32.mrb[101].mxu0 }
 0xa24   : > { %10553 = vtanh.f32 %v7518_v24 }
 0xa25   : > { %v7522_v18 = vpop.f32.mrb[102].mxu0 }
 0xa26   : > { %v7524_v14 = vpop.f32.mrb[103].mxu0  ;;  %v7523_v50 = vadd.f32 %v8121_v10, %v7522_v18 }
 0xa28   : > { %10555 = vtanh.f32 %v7523_v50 }
 0xa29   : > { %v7527_v31 = vpop.f32.mrb[104].mxu0 }
 0xa2a   : > { %v7528_v62 = vadd.f32 %v8121_v10, %v7527_v31  ;;  %v7529_v8 = vpop.f32.mrb[105].mxu0  ;;  %v10552_v30 = vpop.eup %10551 }
 0xa2c   : > { %10557 = vtanh.f32 %v7528_v62 }
 0xa2e   : > { %v10554_v32 = vpop.eup %10553 }
 0xa2f   : > { %v7535_v36 = vmax.f32 %v10552_v30, %v10554_v32 }
 0xa32   : > { %v10556_v49 = vpop.eup %10555 }
 0xa36   : > { %v10558_v56 = vpop.eup %10557 }
 0xa37   : > { %v7536_v4 = vmax.f32 %v10556_v49, %v10558_v56 }
 0xa39   : > { %v7537_v13 = vmax.f32 %v7535_v36, %v7536_v4 }
 0xa3b   : > { %7538 = vst.msk [vmem:[%s434_s12] sm:$0xff] %vm6720_vm5, %v7537_v13 }
 0xa3c   : > { %10740 = shalt.err (!%p10737_p2)
}
 0xa3d   : > { %s10741_s21 = scalar_lea.hbm %s13482_s30, 128  ;;  %s10745_s20 = scalar_lea.hbm %s13535_s10, 256 }
 0xa3e   : > { %p10742_p3 = scmp.ne.s32.totalorder %s13482_s30, %s10741_s21  ;;  %p10746_p7 = scmp.lt.u32.totalorder %s13482_s30, %s13535_s10 }
 0xa3f   : > { %p10747_p8 = scmp.lt.u32.totalorder %s10745_s20, %s10741_s21  ;;  %p10749_p13 = scmp.lt.u32.totalorder %s10741_s21, %s13482_s30 }
 0xa40   : > { %p10743_p4 = pnand %p10742_p3, %p13836_p1 }
 0xa41   : > { %p10748_p11 = por %p10747_p8, %p10746_p7 }
 0xa42   : > { %p10744_p12 = pneg %p10743_p4 }
 0xa43   : > { %p10750_p6 = por %p10749_p13, %p10748_p11 }
 0xa45   : > { %p10751_p9 = pnand %p10750_p6, %p10744_p12 }
 0xa47   : > { %10754 = shalt.err (!%p10751_p9)
}
 0xa48   : > { %10388 = dma.vmem_to_hbm [thread:$0]  (%p13836_p1), %s13484_s13, 128, %s13482_s30, %s7540_s27  }
 0xa49 PF: > { %s13837_s11 = sld [smem:[#allocation21_spill]]  ;;  %s13838_s22 = sld [smem:[#allocation19_spill]] }
 0xa4a   : > { %s13839_s12 = sld [smem:[#allocation24_spill]] }
 0xa4f   : > { %p10425_p5 = scmp.ge.s32.totalorder %s13837_s11, 2  ;;  %s7565_s18 = sand.u32 1, %s13838_s22  }
 0xa50   : > { %p13840_p0 = scmp.ne.s32.totalorder %s13839_s12, 0  ;;  %s7566_s24 = scalar_lea.sflag [#allocation4], %s7565_s18 }
 0xa52   : > { %p10410_p10 = pnand %p10425_p5, %p13840_p0 }
 0xa54   : > { %10788 = dma.done.wait (!%p10410_p10), %s7566_s24, 128  }
 0xa55   : > { %10790 = vsyncadd (!%p10410_p10), %s7566_s24, 4294967168  ;;  %s13841_s16 = sld [smem:[#allocation22_spill]]  ;;  %s13842_s15 = sld [smem:[#allocation20_spill]] }
 0xa56   : > { %s13843_s17 = sld [smem:[#allocation23_spill]]  ;;  %s13844_s13 = smov %s10797_s14 }
 0xa5b   : > { %p24_p2 = scmp.ge.s32.totalorder %s13841_s16, 4   ;;  %s13845_s14 = smov %s13842_s15 }
 0xa5c   : > { %s13846_s15 = smov %s13843_s17 }
 0xa5d   :  { %26 = sbr.rel (!%p24_p2) target bundleno = 7 (0x7), region = 144 }
 0xa64   :  { %7571 = vsyncpa [#allocation3], 1 }
 0xa65   :  { %7573 = vsyncpa [#allocation3 + $0x1], 1 }
 0xa66   :  { %7574 = vsyncpa [#allocation6], 1 }
 0xa67   :  { %7575 = vsyncpa [#allocation9], 1 }
 0xa68   :  { %7576 = vsyncpa [#allocation12], 1 }
 0xa69   :  { %7577 = vsyncpa [#allocation4], 1 }
 0xa6a   :  { %7579 = vsyncpa [#allocation4 + $0x1], 1 }

</bundles_post_ra>
